<compile_context>
chip_gen: v5e
topology: v5e:2x2
jax: 0.10.0
libtpu: 0.0.40
codegen_flags: <defaults>
</compile_context>

<pallas_src>
import jax
import jax.numpy as jnp
from jax import lax
from jax.experimental import pallas as pl
from jax.experimental.pallas import tpu as pltpu


_BF16_MIN_C = 128        # use bf16 matmul operands at/above this channel count
_FOLD_MAX_C = 256        # fold kw taps into one fat dot only below this C
_ACC_BUDGET = 32 * 1024  # max f32 elements held in the per-tile accumulator


def _pick_vmem_limit_bytes():
    # ~3/4 of physical VMEM: ~48 MiB on v7x, ~96 MiB on v5e/v6e.
    try:
        cap = int(getattr(pltpu.get_tpu_info(), "vmem_capacity_bytes", 0))
        if cap > 0:
            return cap * 3 // 4
    except Exception:
        pass
    return 48 * 1024 * 1024


def _make_kernel(D, H, W, C, K, P, compute_dtype, fold_kw, Ht):
    Dp, Hp = D + 2 * P, H + 2 * P
    Wtot = W + 2 * P   # interior starts at W offset P -> tap reads start at 0

    def zero_halo(ref):
        # Zero only the halo faces; interiors are fully overwritten each step.
        if P == 0:
            return
        z = lambda s: jnp.zeros(s, compute_dtype)
        ref[0:P, :, :, :] = z((P, Hp, Wtot, C))
        ref[P + D:Dp, :, :, :] = z((P, Hp, Wtot, C))
        ref[P:P + D, 0:P, :, :] = z((D, P, Wtot, C))
        ref[P:P + D, P + H:Hp, :, :] = z((D, P, Wtot, C))
        ref[P:P + D, P:P + H, 0:P, :] = z((D, H, P, C))
        ref[P:P + D, P:P + H, P + W:Wtot, :] = z((D, H, P, C))

    def conv_htile(src_ref, w_ref, bias, d, h0, ht):
        # ReLU(conv(src))[d, h0:h0+ht] as an (ht*W, C) f32 value.
        acc = jnp.zeros((ht * W, C), jnp.float32)
        for kd in range(K):
            for kh in range(K):
                # One aligned row read per (kd, kh); kw shifts are value
                # slices (XLU) rather than extra misaligned VMEM loads.
                row = src_ref[pl.ds(d + kd, 1), h0 + kh:h0 + kh + ht, :, :]
                row = row.reshape(ht, Wtot, C)
                if fold_kw:
                    if K == 1:
                        patch = row[:, 0:W, :].reshape(ht * W, C)
                    else:
                        patch = jnp.concatenate(
                            [row[:, kw:kw + W, :] for kw in range(K)],
                            axis=-1).reshape(ht * W, K * C)
                    acc = acc + jnp.dot(patch, w_ref[kd, kh],
                                        preferred_element_type=jnp.float32)
                else:
                    for kw in range(K):
                        tap = row[:, kw:kw + W, :].reshape(ht * W, C)
                        acc = acc + jnp.dot(tap, w_ref[kd, kh, kw],
                                            preferred_element_type=jnp.float32)
        return jnp.maximum(acc + bias, 0.0)

    def kernel(x_ref, w1_ref, b1_ref, w2_ref, b2_ref, o_ref, xpad_ref, mid_ref):
        zero_halo(xpad_ref)
        zero_halo(mid_ref)

        # Build the zero-padded input in VMEM.
        # TODO(synk): at realistic sizes DMA x straight from HBM into this
        # interior (memory_space=pl.ANY + pltpu.make_async_copy) and drop the
        # separate pipelined x block plus this VMEM->VMEM copy.
        xpad_ref[P:P + D, P:P + H, P:P + W, :] = x_ref[...].astype(compute_dtype)

        # Bias reads hoisted out of the D loops.
        b1 = b1_ref[...].astype(jnp.float32)
        b2 = b2_ref[...].astype(jnp.float32)

        h_tiles = [(h0, min(Ht, H - h0)) for h0 in range(0, H, Ht)]

        # Conv1 + ReLU, streamed slab-by-slab into the padded mid scratch.
        def conv1_body(d, carry):
            for h0, ht in h_tiles:
                y = conv_htile(xpad_ref, w1_ref, b1, d, h0, ht)
                mid_ref[pl.ds(P + d, 1), P + h0:P + h0 + ht, P:P + W, :] = (
                    y.reshape(1, ht, W, C).astype(compute_dtype))
            return carry
        lax.fori_loop(0, D, conv1_body, 0)

        # Conv2 + ReLU + residual, streamed straight to the output block.
        def conv2_body(d, carry):
            for h0, ht in h_tiles:
                y = conv_htile(mid_ref, w2_ref, b2, d, h0, ht)
                res = x_ref[pl.ds(d, 1), h0:h0 + ht, :, :].astype(jnp.float32)
                o_ref[pl.ds(d, 1), h0:h0 + ht, :, :] = (
                    y.reshape(1, ht, W, C) + res).astype(o_ref.dtype)
            return carry
        lax.fori_loop(0, D, conv2_body, 0)

    return kernel


def residual_conv_unit_3d(x_ncdhw, w1, b1, w2, b2, kernel_size):
    """x_ncdhw: (B, C, D, H, W) float32; weights in PyTorch OIDHW layout."""
    K = int(kernel_size)
    assert K % 2 == 1, "kernel_size must be odd to match PyTorch 'same' padding"
    P = K // 2
    B, C, D, H, W = x_ncdhw.shape
    Dp, Hp, Wtot = D + 2 * P, H + 2 * P, W + 2 * P

    compute_dtype = jnp.bfloat16 if C >= _BF16_MIN_C else jnp.float32
    fold_kw = C < _FOLD_MAX_C
    Ht = max(1, min(H, _ACC_BUDGET // max(1, W * C)))

    # Layout glue only: NDHWC activations; weights as
    #   fold:    (Kd, Kh, Kw*Cin, Cout)  -- folded contraction index = (kw, cin)
    #   no fold: (Kd, Kh, Kw, Cin, Cout)
    x = jnp.transpose(x_ncdhw, (0, 2, 3, 4, 1))                     # NDHWC
    wt1 = jnp.transpose(w1, (2, 3, 4, 1, 0)).astype(compute_dtype)
    wt2 = jnp.transpose(w2, (2, 3, 4, 1, 0)).astype(compute_dtype)
    if fold_kw:
        wt1 = wt1.reshape(K, K, K * C, C)
        wt2 = wt2.reshape(K, K, K * C, C)
        w_spec = pl.BlockSpec((K, K, K * C, C), lambda b: (0, 0, 0, 0))
    else:
        w_spec = pl.BlockSpec((K, K, K, C, C), lambda b: (0, 0, 0, 0, 0))
    b1r = b1.reshape(1, C).astype(jnp.float32)
    b2r = b2.reshape(1, C).astype(jnp.float32)

    kernel = _make_kernel(D, H, W, C, K, P, compute_dtype, fold_kw, Ht)

    out_ndhwc = pl.pallas_call(
        kernel,
        out_shape=jax.ShapeDtypeStruct((B, D, H, W, C), x.dtype),
        grid_spec=pltpu.PrefetchScalarGridSpec(
            num_scalar_prefetch=0,
            grid=(B,),                        # one grid step per batch element
            in_specs=[
                pl.BlockSpec((None, D, H, W, C), lambda b: (b, 0, 0, 0, 0)),
                # Weights / biases: constant index maps -> fetched once.
                # TODO(synk): single-buffer these (pipeline_mode=pl.Buffered(1))
                # to drop the redundant second weight buffer at large C.
                w_spec,
                pl.BlockSpec((1, C), lambda b: (0, 0)),
                w_spec,
                pl.BlockSpec((1, C), lambda b: (0, 0)),
            ],
            out_specs=pl.BlockSpec((None, D, H, W, C), lambda b: (b, 0, 0, 0, 0)),
            scratch_shapes=[
                pltpu.VMEM((Dp, Hp, Wtot, C), compute_dtype),   # padded x
                pltpu.VMEM((Dp, Hp, Wtot, C), compute_dtype),   # padded ReLU(conv1)
            ],
        ),
        compiler_params=pltpu.CompilerParams(
            # Batch blocks are independent and no cross-step scratch state is
            # carried -> safe to shard the batch axis across TensorCores.
            dimension_semantics=("parallel",),
            vmem_limit_bytes=_pick_vmem_limit_bytes()),
    )(x, wt1, b1r, wt2, b2r)

    return jnp.transpose(out_ndhwc, (0, 4, 1, 2, 3))                # back to NCDHW


def _reference(x, w1, b1, w2, b2, pad):
    """Pure-JAX reference matching PyTorch Conv3d (cross-correlation, NCDHW)."""
    def conv(inp, w, b):
        y = jax.lax.conv_general_dilated(
            inp, w, window_strides=(1, 1, 1),
            padding=[(pad, pad)] * 3,
            dimension_numbers=("NCDHW", "OIDHW", "NCDHW"))
        return y + b.reshape(1, -1, 1, 1, 1)

    h = jax.nn.relu(conv(x, w1, b1))
    h = jax.nn.relu(conv(h, w2, b2))
    return h + x


if __name__ == "__main__":
    B, C, D, H, W = 2, 8, 8, 8, 8   # features = 8
    K = 3                           # odd kernel size

    key = jax.random.PRNGKey(0)
    kx, kw1, kb1, kw2, kb2 = jax.random.split(key, 5)

    x = jax.random.normal(kx, (B, C, D, H, W), dtype=jnp.float32)

    # Deterministic init mimicking PyTorch Conv3d defaults: U(-1/sqrt(fan_in), ..)
    fan_in = C * K * K * K
    bound = 1.0 / (fan_in ** 0.5)
    w1 = jax.random.uniform(kw1, (C, C, K, K, K), jnp.float32, -bound, bound)
    b1 = jax.random.uniform(kb1, (C,), jnp.float32, -bound, bound)
    w2 = jax.random.uniform(kw2, (C, C, K, K, K), jnp.float32, -bound, bound)
    b2 = jax.random.uniform(kb2, (C,), jnp.float32, -bound, bound)

    out = residual_conv_unit_3d(x, w1, b1, w2, b2, K)
    out = jax.block_until_ready(out)

    ref = _reference(x, w1, b1, w2, b2, K // 2)
    assert out.shape == ref.shape == (B, C, D, H, W)
    err = float(jnp.max(jnp.abs(out - ref)))
    # Small-C path keeps f32 matmul operands, so the tight tolerance holds.
    assert jnp.allclose(out, ref, atol=1e-4, rtol=1e-4), err

    print("KERNEL_OK")
</pallas_src>

<mosaic_0001>
module attributes {stable_mosaic.version = 11 : i64} {
  func.func @kernel(%arg0: i32, %arg1: memref<1x8x8x8x8xf32, #tpu.memory_space<vmem>>, %arg2: memref<3x3x24x8xf32, #tpu.memory_space<vmem>>, %arg3: memref<1x8xf32, #tpu.memory_space<vmem>>, %arg4: memref<3x3x24x8xf32, #tpu.memory_space<vmem>>, %arg5: memref<1x8xf32, #tpu.memory_space<vmem>>, %arg6: memref<1x8x8x8x8xf32, #tpu.memory_space<vmem>>, %arg7: memref<10x10x10x8xf32, #tpu.memory_space<vmem>>, %arg8: memref<10x10x10x8xf32, #tpu.memory_space<vmem>>) attributes {dimension_semantics = [#tpu.dimension_semantics<parallel>], iteration_bounds = array<i64: 2>, scalar_prefetch = 0 : i64, scratch_operands = 2 : i64, tpu.core_type = #tpu.core_type<tc>, window_params = [{transform_indices = @transform_0, window_bounds = array<i64: 1, 8, 8, 8, 8>}, {pipeline_mode = #tpu.pipeline_mode<synchronous>, transform_indices = @transform_1, window_bounds = array<i64: 3, 3, 24, 8>}, {pipeline_mode = #tpu.pipeline_mode<synchronous>, transform_indices = @transform_2, window_bounds = array<i64: 1, 8>}, {pipeline_mode = #tpu.pipeline_mode<synchronous>, transform_indices = @transform_3, window_bounds = array<i64: 3, 3, 24, 8>}, {pipeline_mode = #tpu.pipeline_mode<synchronous>, transform_indices = @transform_4, window_bounds = array<i64: 1, 8>}, {transform_indices = @transform_5, window_bounds = array<i64: 1, 8, 8, 8, 8>}]} {
    %cst = arith.constant 0.000000e+00 : f32
    %0 = vector.broadcast %cst : f32 to vector<1x10x10x8xf32>
    %c0 = arith.constant 0 : index
    %c0_0 = arith.constant 0 : index
    %c0_1 = arith.constant 0 : index
    %c0_2 = arith.constant 0 : index
    %1 = vector.load %arg7[%c0, %c0_0, %c0_1, %c0_2] : memref<10x10x10x8xf32, #tpu.memory_space<vmem>>, vector<1x10x10x8xf32>
    tpu.vector_store %arg7[%c0, %c0_0, %c0_1, %c0_2], %0 {strides = array<i32>} : memref<10x10x10x8xf32, #tpu.memory_space<vmem>>, vector<1x10x10x8xf32>,
    %cst_3 = arith.constant 0.000000e+00 : f32
    %2 = vector.broadcast %cst_3 : f32 to vector<1x10x10x8xf32>
    %c9 = arith.constant 9 : index
    %c0_4 = arith.constant 0 : index
    %c0_5 = arith.constant 0 : index
    %c0_6 = arith.constant 0 : index
    %3 = vector.load %arg7[%c9, %c0_4, %c0_5, %c0_6] : memref<10x10x10x8xf32, #tpu.memory_space<vmem>>, vector<1x10x10x8xf32>
    tpu.vector_store %arg7[%c9, %c0_4, %c0_5, %c0_6], %2 {strides = array<i32>} : memref<10x10x10x8xf32, #tpu.memory_space<vmem>>, vector<1x10x10x8xf32>,
    %cst_7 = arith.constant 0.000000e+00 : f32
    %4 = vector.broadcast %cst_7 : f32 to vector<8x1x10x8xf32>
    %c1 = arith.constant 1 : index
    %c0_8 = arith.constant 0 : index
    %c0_9 = arith.constant 0 : index
    %c0_10 = arith.constant 0 : index
    %5 = vector.load %arg7[%c1, %c0_8, %c0_9, %c0_10] : memref<10x10x10x8xf32, #tpu.memory_space<vmem>>, vector<8x1x10x8xf32>
    tpu.vector_store %arg7[%c1, %c0_8, %c0_9, %c0_10], %4 {strides = array<i32>} : memref<10x10x10x8xf32, #tpu.memory_space<vmem>>, vector<8x1x10x8xf32>,
    %cst_11 = arith.constant 0.000000e+00 : f32
    %6 = vector.broadcast %cst_11 : f32 to vector<8x1x10x8xf32>
    %c1_12 = arith.constant 1 : index
    %c9_13 = arith.constant 9 : index
    %c0_14 = arith.constant 0 : index
    %c0_15 = arith.constant 0 : index
    %7 = vector.load %arg7[%c1_12, %c9_13, %c0_14, %c0_15] : memref<10x10x10x8xf32, #tpu.memory_space<vmem>>, vector<8x1x10x8xf32>
    tpu.vector_store %arg7[%c1_12, %c9_13, %c0_14, %c0_15], %6 {strides = array<i32>} : memref<10x10x10x8xf32, #tpu.memory_space<vmem>>, vector<8x1x10x8xf32>,
    %cst_16 = arith.constant 0.000000e+00 : f32
    %8 = vector.broadcast %cst_16 : f32 to vector<8x8x1x8xf32>
    %c1_17 = arith.constant 1 : index
    %c1_18 = arith.constant 1 : index
    %c0_19 = arith.constant 0 : index
    %c0_20 = arith.constant 0 : index
    %9 = vector.load %arg7[%c1_17, %c1_18, %c0_19, %c0_20] : memref<10x10x10x8xf32, #tpu.memory_space<vmem>>, vector<8x8x1x8xf32>
    tpu.vector_store %arg7[%c1_17, %c1_18, %c0_19, %c0_20], %8 {strides = array<i32>} : memref<10x10x10x8xf32, #tpu.memory_space<vmem>>, vector<8x8x1x8xf32>,
    %cst_21 = arith.constant 0.000000e+00 : f32
    %10 = vector.broadcast %cst_21 : f32 to vector<8x8x1x8xf32>
    %c1_22 = arith.constant 1 : index
    %c1_23 = arith.constant 1 : index
    %c9_24 = arith.constant 9 : index
    %c0_25 = arith.constant 0 : index
    %11 = vector.load %arg7[%c1_22, %c1_23, %c9_24, %c0_25] : memref<10x10x10x8xf32, #tpu.memory_space<vmem>>, vector<8x8x1x8xf32>
    tpu.vector_store %arg7[%c1_22, %c1_23, %c9_24, %c0_25], %10 {strides = array<i32>} : memref<10x10x10x8xf32, #tpu.memory_space<vmem>>, vector<8x8x1x8xf32>,
    %cst_26 = arith.constant 0.000000e+00 : f32
    %12 = vector.broadcast %cst_26 : f32 to vector<1x10x10x8xf32>
    %c0_27 = arith.constant 0 : index
    %c0_28 = arith.constant 0 : index
    %c0_29 = arith.constant 0 : index
    %c0_30 = arith.constant 0 : index
    %13 = vector.load %arg8[%c0_27, %c0_28, %c0_29, %c0_30] : memref<10x10x10x8xf32, #tpu.memory_space<vmem>>, vector<1x10x10x8xf32>
    tpu.vector_store %arg8[%c0_27, %c0_28, %c0_29, %c0_30], %12 {strides = array<i32>} : memref<10x10x10x8xf32, #tpu.memory_space<vmem>>, vector<1x10x10x8xf32>,
    %cst_31 = arith.constant 0.000000e+00 : f32
    %14 = vector.broadcast %cst_31 : f32 to vector<1x10x10x8xf32>
    %c9_32 = arith.constant 9 : index
    %c0_33 = arith.constant 0 : index
    %c0_34 = arith.constant 0 : index
    %c0_35 = arith.constant 0 : index
    %15 = vector.load %arg8[%c9_32, %c0_33, %c0_34, %c0_35] : memref<10x10x10x8xf32, #tpu.memory_space<vmem>>, vector<1x10x10x8xf32>
    tpu.vector_store %arg8[%c9_32, %c0_33, %c0_34, %c0_35], %14 {strides = array<i32>} : memref<10x10x10x8xf32, #tpu.memory_space<vmem>>, vector<1x10x10x8xf32>,
    %cst_36 = arith.constant 0.000000e+00 : f32
    %16 = vector.broadcast %cst_36 : f32 to vector<8x1x10x8xf32>
    %c1_37 = arith.constant 1 : index
    %c0_38 = arith.constant 0 : index
    %c0_39 = arith.constant 0 : index
    %c0_40 = arith.constant 0 : index
    %17 = vector.load %arg8[%c1_37, %c0_38, %c0_39, %c0_40] : memref<10x10x10x8xf32, #tpu.memory_space<vmem>>, vector<8x1x10x8xf32>
    tpu.vector_store %arg8[%c1_37, %c0_38, %c0_39, %c0_40], %16 {strides = array<i32>} : memref<10x10x10x8xf32, #tpu.memory_space<vmem>>, vector<8x1x10x8xf32>,
    %cst_41 = arith.constant 0.000000e+00 : f32
    %18 = vector.broadcast %cst_41 : f32 to vector<8x1x10x8xf32>
    %c1_42 = arith.constant 1 : index
    %c9_43 = arith.constant 9 : index
    %c0_44 = arith.constant 0 : index
    %c0_45 = arith.constant 0 : index
    %19 = vector.load %arg8[%c1_42, %c9_43, %c0_44, %c0_45] : memref<10x10x10x8xf32, #tpu.memory_space<vmem>>, vector<8x1x10x8xf32>
    tpu.vector_store %arg8[%c1_42, %c9_43, %c0_44, %c0_45], %18 {strides = array<i32>} : memref<10x10x10x8xf32, #tpu.memory_space<vmem>>, vector<8x1x10x8xf32>,
    %cst_46 = arith.constant 0.000000e+00 : f32
    %20 = vector.broadcast %cst_46 : f32 to vector<8x8x1x8xf32>
    %c1_47 = arith.constant 1 : index
    %c1_48 = arith.constant 1 : index
    %c0_49 = arith.constant 0 : index
    %c0_50 = arith.constant 0 : index
    %21 = vector.load %arg8[%c1_47, %c1_48, %c0_49, %c0_50] : memref<10x10x10x8xf32, #tpu.memory_space<vmem>>, vector<8x8x1x8xf32>
    tpu.vector_store %arg8[%c1_47, %c1_48, %c0_49, %c0_50], %20 {strides = array<i32>} : memref<10x10x10x8xf32, #tpu.memory_space<vmem>>, vector<8x8x1x8xf32>,
    %cst_51 = arith.constant 0.000000e+00 : f32
    %22 = vector.broadcast %cst_51 : f32 to vector<8x8x1x8xf32>
    %c1_52 = arith.constant 1 : index
    %c1_53 = arith.constant 1 : index
    %c9_54 = arith.constant 9 : index
    %c0_55 = arith.constant 0 : index
    %23 = vector.load %arg8[%c1_52, %c1_53, %c9_54, %c0_55] : memref<10x10x10x8xf32, #tpu.memory_space<vmem>>, vector<8x8x1x8xf32>
    tpu.vector_store %arg8[%c1_52, %c1_53, %c9_54, %c0_55], %22 {strides = array<i32>} : memref<10x10x10x8xf32, #tpu.memory_space<vmem>>, vector<8x8x1x8xf32>,
    %c0_56 = arith.constant 0 : index
    %c0_57 = arith.constant 0 : index
    %c0_58 = arith.constant 0 : index
    %c0_59 = arith.constant 0 : index
    %c0_60 = arith.constant 0 : index
    %24 = vector.load %arg1[%c0_56, %c0_57, %c0_58, %c0_59, %c0_60] : memref<1x8x8x8x8xf32, #tpu.memory_space<vmem>>, vector<1x8x8x8x8xf32>
    %25 = vector.shape_cast %24 : vector<1x8x8x8x8xf32> to vector<8x8x8x8xf32>
    %c1_61 = arith.constant 1 : index
    %c1_62 = arith.constant 1 : index
    %c1_63 = arith.constant 1 : index
    %c0_64 = arith.constant 0 : index
    %26 = vector.load %arg7[%c1_61, %c1_62, %c1_63, %c0_64] : memref<10x10x10x8xf32, #tpu.memory_space<vmem>>, vector<8x8x8x8xf32>
    tpu.vector_store %arg7[%c1_61, %c1_62, %c1_63, %c0_64], %25 {strides = array<i32>} : memref<10x10x10x8xf32, #tpu.memory_space<vmem>>, vector<8x8x8x8xf32>,
    %c0_65 = arith.constant 0 : index
    %c0_66 = arith.constant 0 : index
    %27 = vector.load %arg3[%c0_65, %c0_66] : memref<1x8xf32, #tpu.memory_space<vmem>>, vector<1x8xf32>
    %c0_67 = arith.constant 0 : index
    %c0_68 = arith.constant 0 : index
    %28 = vector.load %arg5[%c0_67, %c0_68] : memref<1x8xf32, #tpu.memory_space<vmem>>, vector<1x8xf32>
    %c0_i32 = arith.constant 0 : i32
    %c8_i32 = arith.constant 8 : i32
    %29 = arith.addi %c0_i32, %c8_i32 : i32
    %c1_i32 = arith.constant 1 : i32
    scf.for %arg9 = %c0_i32 to %29 step %c1_i32  : i32 {
      %cst_74 = arith.constant 0.000000e+00 : f32
      %31 = vector.broadcast %cst_74 : f32 to vector<64x8xf32>
      %c0_i32_75 = arith.constant 0 : i32
      %32 = arith.addi %arg9, %c0_i32_75 : i32
      %33 = arith.index_cast %32 : i32 to index
      %c0_76 = arith.constant 0 : index
      %c0_77 = arith.constant 0 : index
      %c0_78 = arith.constant 0 : index
      %34 = vector.load %arg7[%33, %c0_76, %c0_77, %c0_78] : memref<10x10x10x8xf32, #tpu.memory_space<vmem>>, vector<1x8x10x8xf32>
      %35 = vector.shape_cast %34 : vector<1x8x10x8xf32> to vector<8x10x8xf32>
      %36 = vector.extract_strided_slice %35 {offsets = [0, 0, 0], sizes = [8, 8, 8], strides = [1, 1, 1]} : vector<8x10x8xf32> to vector<8x8x8xf32>
      %37 = vector.extract_strided_slice %35 {offsets = [0, 1, 0], sizes = [8, 8, 8], strides = [1, 1, 1]} : vector<8x10x8xf32> to vector<8x8x8xf32>
      %38 = vector.extract_strided_slice %35 {offsets = [0, 2, 0], sizes = [8, 8, 8], strides = [1, 1, 1]} : vector<8x10x8xf32> to vector<8x8x8xf32>
      %39 = tpu.concatenate %36, %37, %38 in 2 : vector<8x8x8xf32>, vector<8x8x8xf32>, vector<8x8x8xf32> -> vector<8x8x24xf32>
      %40 = vector.shape_cast %39 : vector<8x8x24xf32> to vector<64x24xf32>
      %c0_79 = arith.constant 0 : index
      %c0_80 = arith.constant 0 : index
      %c0_81 = arith.constant 0 : index
      %c0_82 = arith.constant 0 : index
      %41 = vector.load %arg2[%c0_79, %c0_80, %c0_81, %c0_82] : memref<3x3x24x8xf32, #tpu.memory_space<vmem>>, vector<1x1x24x8xf32>
      %42 = vector.shape_cast %41 : vector<1x1x24x8xf32> to vector<24x8xf32>
      %cst_83 = arith.constant dense<0.000000e+00> : vector<64x8xf32>
      %43 = tpu.matmul %40, %42, %cst_83 {dimension_numbers = #tpu.dot_dimension_numbers<[1], [0], [0], [1], [0, 0, 1, 1], [], []>} : vector<64x24xf32>, vector<24x8xf32>, vector<64x8xf32> -> vector<64x8xf32>
      %44 = arith.addf %31, %43 : vector<64x8xf32>
      %c0_i32_84 = arith.constant 0 : i32
      %45 = arith.addi %arg9, %c0_i32_84 : i32
      %46 = arith.index_cast %45 : i32 to index
      %c1_85 = arith.constant 1 : index
      %c0_86 = arith.constant 0 : index
      %c0_87 = arith.constant 0 : index
      %47 = vector.load %arg7[%46, %c1_85, %c0_86, %c0_87] : memref<10x10x10x8xf32, #tpu.memory_space<vmem>>, vector<1x8x10x8xf32>
      %48 = vector.shape_cast %47 : vector<1x8x10x8xf32> to vector<8x10x8xf32>
      %49 = vector.extract_strided_slice %48 {offsets = [0, 0, 0], sizes = [8, 8, 8], strides = [1, 1, 1]} : vector<8x10x8xf32> to vector<8x8x8xf32>
      %50 = vector.extract_strided_slice %48 {offsets = [0, 1, 0], sizes = [8, 8, 8], strides = [1, 1, 1]} : vector<8x10x8xf32> to vector<8x8x8xf32>
      %51 = vector.extract_strided_slice %48 {offsets = [0, 2, 0], sizes = [8, 8, 8], strides = [1, 1, 1]} : vector<8x10x8xf32> to vector<8x8x8xf32>
      %52 = tpu.concatenate %49, %50, %51 in 2 : vector<8x8x8xf32>, vector<8x8x8xf32>, vector<8x8x8xf32> -> vector<8x8x24xf32>
      %53 = vector.shape_cast %52 : vector<8x8x24xf32> to vector<64x24xf32>
      %c0_88 = arith.constant 0 : index
      %c1_89 = arith.constant 1 : index
      %c0_90 = arith.constant 0 : index
      %c0_91 = arith.constant 0 : index
      %54 = vector.load %arg2[%c0_88, %c1_89, %c0_90, %c0_91] : memref<3x3x24x8xf32, #tpu.memory_space<vmem>>, vector<1x1x24x8xf32>
      %55 = vector.shape_cast %54 : vector<1x1x24x8xf32> to vector<24x8xf32>
      %cst_92 = arith.constant dense<0.000000e+00> : vector<64x8xf32>
      %56 = tpu.matmul %53, %55, %cst_92 {dimension_numbers = #tpu.dot_dimension_numbers<[1], [0], [0], [1], [0, 0, 1, 1], [], []>} : vector<64x24xf32>, vector<24x8xf32>, vector<64x8xf32> -> vector<64x8xf32>
      %57 = arith.addf %44, %56 : vector<64x8xf32>
      %c0_i32_93 = arith.constant 0 : i32
      %58 = arith.addi %arg9, %c0_i32_93 : i32
      %59 = arith.index_cast %58 : i32 to index
      %c2 = arith.constant 2 : index
      %c0_94 = arith.constant 0 : index
      %c0_95 = arith.constant 0 : index
      %60 = vector.load %arg7[%59, %c2, %c0_94, %c0_95] : memref<10x10x10x8xf32, #tpu.memory_space<vmem>>, vector<1x8x10x8xf32>
      %61 = vector.shape_cast %60 : vector<1x8x10x8xf32> to vector<8x10x8xf32>
      %62 = vector.extract_strided_slice %61 {offsets = [0, 0, 0], sizes = [8, 8, 8], strides = [1, 1, 1]} : vector<8x10x8xf32> to vector<8x8x8xf32>
      %63 = vector.extract_strided_slice %61 {offsets = [0, 1, 0], sizes = [8, 8, 8], strides = [1, 1, 1]} : vector<8x10x8xf32> to vector<8x8x8xf32>
      %64 = vector.extract_strided_slice %61 {offsets = [0, 2, 0], sizes = [8, 8, 8], strides = [1, 1, 1]} : vector<8x10x8xf32> to vector<8x8x8xf32>
      %65 = tpu.concatenate %62, %63, %64 in 2 : vector<8x8x8xf32>, vector<8x8x8xf32>, vector<8x8x8xf32> -> vector<8x8x24xf32>
      %66 = vector.shape_cast %65 : vector<8x8x24xf32> to vector<64x24xf32>
      %c0_96 = arith.constant 0 : index
      %c2_97 = arith.constant 2 : index
      %c0_98 = arith.constant 0 : index
      %c0_99 = arith.constant 0 : index
      %67 = vector.load %arg2[%c0_96, %c2_97, %c0_98, %c0_99] : memref<3x3x24x8xf32, #tpu.memory_space<vmem>>, vector<1x1x24x8xf32>
      %68 = vector.shape_cast %67 : vector<1x1x24x8xf32> to vector<24x8xf32>
      %cst_100 = arith.constant dense<0.000000e+00> : vector<64x8xf32>
      %69 = tpu.matmul %66, %68, %cst_100 {dimension_numbers = #tpu.dot_dimension_numbers<[1], [0], [0], [1], [0, 0, 1, 1], [], []>} : vector<64x24xf32>, vector<24x8xf32>, vector<64x8xf32> -> vector<64x8xf32>
      %70 = arith.addf %57, %69 : vector<64x8xf32>
      %c1_i32_101 = arith.constant 1 : i32
      %71 = arith.addi %arg9, %c1_i32_101 : i32
      %72 = arith.index_cast %71 : i32 to index
      %c0_102 = arith.constant 0 : index
      %c0_103 = arith.constant 0 : index
      %c0_104 = arith.constant 0 : index
      %73 = vector.load %arg7[%72, %c0_102, %c0_103, %c0_104] : memref<10x10x10x8xf32, #tpu.memory_space<vmem>>, vector<1x8x10x8xf32>
      %74 = vector.shape_cast %73 : vector<1x8x10x8xf32> to vector<8x10x8xf32>
      %75 = vector.extract_strided_slice %74 {offsets = [0, 0, 0], sizes = [8, 8, 8], strides = [1, 1, 1]} : vector<8x10x8xf32> to vector<8x8x8xf32>
      %76 = vector.extract_strided_slice %74 {offsets = [0, 1, 0], sizes = [8, 8, 8], strides = [1, 1, 1]} : vector<8x10x8xf32> to vector<8x8x8xf32>
      %77 = vector.extract_strided_slice %74 {offsets = [0, 2, 0], sizes = [8, 8, 8], strides = [1, 1, 1]} : vector<8x10x8xf32> to vector<8x8x8xf32>
      %78 = tpu.concatenate %75, %76, %77 in 2 : vector<8x8x8xf32>, vector<8x8x8xf32>, vector<8x8x8xf32> -> vector<8x8x24xf32>
      %79 = vector.shape_cast %78 : vector<8x8x24xf32> to vector<64x24xf32>
      %c1_105 = arith.constant 1 : index
      %c0_106 = arith.constant 0 : index
      %c0_107 = arith.constant 0 : index
      %c0_108 = arith.constant 0 : index
      %80 = vector.load %arg2[%c1_105, %c0_106, %c0_107, %c0_108] : memref<3x3x24x8xf32, #tpu.memory_space<vmem>>, vector<1x1x24x8xf32>
      %81 = vector.shape_cast %80 : vector<1x1x24x8xf32> to vector<24x8xf32>
      %cst_109 = arith.constant dense<0.000000e+00> : vector<64x8xf32>
      %82 = tpu.matmul %79, %81, %cst_109 {dimension_numbers = #tpu.dot_dimension_numbers<[1], [0], [0], [1], [0, 0, 1, 1], [], []>} : vector<64x24xf32>, vector<24x8xf32>, vector<64x8xf32> -> vector<64x8xf32>
      %83 = arith.addf %70, %82 : vector<64x8xf32>
      %c1_i32_110 = arith.constant 1 : i32
      %84 = arith.addi %arg9, %c1_i32_110 : i32
      %85 = arith.index_cast %84 : i32 to index
      %c1_111 = arith.constant 1 : index
      %c0_112 = arith.constant 0 : index
      %c0_113 = arith.constant 0 : index
      %86 = vector.load %arg7[%85, %c1_111, %c0_112, %c0_113] : memref<10x10x10x8xf32, #tpu.memory_space<vmem>>, vector<1x8x10x8xf32>
      %87 = vector.shape_cast %86 : vector<1x8x10x8xf32> to vector<8x10x8xf32>
      %88 = vector.extract_strided_slice %87 {offsets = [0, 0, 0], sizes = [8, 8, 8], strides = [1, 1, 1]} : vector<8x10x8xf32> to vector<8x8x8xf32>
      %89 = vector.extract_strided_slice %87 {offsets = [0, 1, 0], sizes = [8, 8, 8], strides = [1, 1, 1]} : vector<8x10x8xf32> to vector<8x8x8xf32>
      %90 = vector.extract_strided_slice %87 {offsets = [0, 2, 0], sizes = [8, 8, 8], strides = [1, 1, 1]} : vector<8x10x8xf32> to vector<8x8x8xf32>
      %91 = tpu.concatenate %88, %89, %90 in 2 : vector<8x8x8xf32>, vector<8x8x8xf32>, vector<8x8x8xf32> -> vector<8x8x24xf32>
      %92 = vector.shape_cast %91 : vector<8x8x24xf32> to vector<64x24xf32>
      %c1_114 = arith.constant 1 : index
      %c1_115 = arith.constant 1 : index
      %c0_116 = arith.constant 0 : index
      %c0_117 = arith.constant 0 : index
      %93 = vector.load %arg2[%c1_114, %c1_115, %c0_116, %c0_117] : memref<3x3x24x8xf32, #tpu.memory_space<vmem>>, vector<1x1x24x8xf32>
      %94 = vector.shape_cast %93 : vector<1x1x24x8xf32> to vector<24x8xf32>
      %cst_118 = arith.constant dense<0.000000e+00> : vector<64x8xf32>
      %95 = tpu.matmul %92, %94, %cst_118 {dimension_numbers = #tpu.dot_dimension_numbers<[1], [0], [0], [1], [0, 0, 1, 1], [], []>} : vector<64x24xf32>, vector<24x8xf32>, vector<64x8xf32> -> vector<64x8xf32>
      %96 = arith.addf %83, %95 : vector<64x8xf32>
      %c1_i32_119 = arith.constant 1 : i32
      %97 = arith.addi %arg9, %c1_i32_119 : i32
      %98 = arith.index_cast %97 : i32 to index
      %c2_120 = arith.constant 2 : index
      %c0_121 = arith.constant 0 : index
      %c0_122 = arith.constant 0 : index
      %99 = vector.load %arg7[%98, %c2_120, %c0_121, %c0_122] : memref<10x10x10x8xf32, #tpu.memory_space<vmem>>, vector<1x8x10x8xf32>
      %100 = vector.shape_cast %99 : vector<1x8x10x8xf32> to vector<8x10x8xf32>
      %101 = vector.extract_strided_slice %100 {offsets = [0, 0, 0], sizes = [8, 8, 8], strides = [1, 1, 1]} : vector<8x10x8xf32> to vector<8x8x8xf32>
      %102 = vector.extract_strided_slice %100 {offsets = [0, 1, 0], sizes = [8, 8, 8], strides = [1, 1, 1]} : vector<8x10x8xf32> to vector<8x8x8xf32>
      %103 = vector.extract_strided_slice %100 {offsets = [0, 2, 0], sizes = [8, 8, 8], strides = [1, 1, 1]} : vector<8x10x8xf32> to vector<8x8x8xf32>
      %104 = tpu.concatenate %101, %102, %103 in 2 : vector<8x8x8xf32>, vector<8x8x8xf32>, vector<8x8x8xf32> -> vector<8x8x24xf32>
      %105 = vector.shape_cast %104 : vector<8x8x24xf32> to vector<64x24xf32>
      %c1_123 = arith.constant 1 : index
      %c2_124 = arith.constant 2 : index
      %c0_125 = arith.constant 0 : index
      %c0_126 = arith.constant 0 : index
      %106 = vector.load %arg2[%c1_123, %c2_124, %c0_125, %c0_126] : memref<3x3x24x8xf32, #tpu.memory_space<vmem>>, vector<1x1x24x8xf32>
      %107 = vector.shape_cast %106 : vector<1x1x24x8xf32> to vector<24x8xf32>
      %cst_127 = arith.constant dense<0.000000e+00> : vector<64x8xf32>
      %108 = tpu.matmul %105, %107, %cst_127 {dimension_numbers = #tpu.dot_dimension_numbers<[1], [0], [0], [1], [0, 0, 1, 1], [], []>} : vector<64x24xf32>, vector<24x8xf32>, vector<64x8xf32> -> vector<64x8xf32>
      %109 = arith.addf %96, %108 : vector<64x8xf32>
      %c2_i32 = arith.constant 2 : i32
      %110 = arith.addi %arg9, %c2_i32 : i32
      %111 = arith.index_cast %110 : i32 to index
      %c0_128 = arith.constant 0 : index
      %c0_129 = arith.constant 0 : index
      %c0_130 = arith.constant 0 : index
      %112 = vector.load %arg7[%111, %c0_128, %c0_129, %c0_130] : memref<10x10x10x8xf32, #tpu.memory_space<vmem>>, vector<1x8x10x8xf32>
      %113 = vector.shape_cast %112 : vector<1x8x10x8xf32> to vector<8x10x8xf32>
      %114 = vector.extract_strided_slice %113 {offsets = [0, 0, 0], sizes = [8, 8, 8], strides = [1, 1, 1]} : vector<8x10x8xf32> to vector<8x8x8xf32>
      %115 = vector.extract_strided_slice %113 {offsets = [0, 1, 0], sizes = [8, 8, 8], strides = [1, 1, 1]} : vector<8x10x8xf32> to vector<8x8x8xf32>
      %116 = vector.extract_strided_slice %113 {offsets = [0, 2, 0], sizes = [8, 8, 8], strides = [1, 1, 1]} : vector<8x10x8xf32> to vector<8x8x8xf32>
      %117 = tpu.concatenate %114, %115, %116 in 2 : vector<8x8x8xf32>, vector<8x8x8xf32>, vector<8x8x8xf32> -> vector<8x8x24xf32>
      %118 = vector.shape_cast %117 : vector<8x8x24xf32> to vector<64x24xf32>
      %c2_131 = arith.constant 2 : index
      %c0_132 = arith.constant 0 : index
      %c0_133 = arith.constant 0 : index
      %c0_134 = arith.constant 0 : index
      %119 = vector.load %arg2[%c2_131, %c0_132, %c0_133, %c0_134] : memref<3x3x24x8xf32, #tpu.memory_space<vmem>>, vector<1x1x24x8xf32>
      %120 = vector.shape_cast %119 : vector<1x1x24x8xf32> to vector<24x8xf32>
      %cst_135 = arith.constant dense<0.000000e+00> : vector<64x8xf32>
      %121 = tpu.matmul %118, %120, %cst_135 {dimension_numbers = #tpu.dot_dimension_numbers<[1], [0], [0], [1], [0, 0, 1, 1], [], []>} : vector<64x24xf32>, vector<24x8xf32>, vector<64x8xf32> -> vector<64x8xf32>
      %122 = arith.addf %109, %121 : vector<64x8xf32>
      %c2_i32_136 = arith.constant 2 : i32
      %123 = arith.addi %arg9, %c2_i32_136 : i32
      %124 = arith.index_cast %123 : i32 to index
      %c1_137 = arith.constant 1 : index
      %c0_138 = arith.constant 0 : index
      %c0_139 = arith.constant 0 : index
      %125 = vector.load %arg7[%124, %c1_137, %c0_138, %c0_139] : memref<10x10x10x8xf32, #tpu.memory_space<vmem>>, vector<1x8x10x8xf32>
      %126 = vector.shape_cast %125 : vector<1x8x10x8xf32> to vector<8x10x8xf32>
      %127 = vector.extract_strided_slice %126 {offsets = [0, 0, 0], sizes = [8, 8, 8], strides = [1, 1, 1]} : vector<8x10x8xf32> to vector<8x8x8xf32>
      %128 = vector.extract_strided_slice %126 {offsets = [0, 1, 0], sizes = [8, 8, 8], strides = [1, 1, 1]} : vector<8x10x8xf32> to vector<8x8x8xf32>
      %129 = vector.extract_strided_slice %126 {offsets = [0, 2, 0], sizes = [8, 8, 8], strides = [1, 1, 1]} : vector<8x10x8xf32> to vector<8x8x8xf32>
      %130 = tpu.concatenate %127, %128, %129 in 2 : vector<8x8x8xf32>, vector<8x8x8xf32>, vector<8x8x8xf32> -> vector<8x8x24xf32>
      %131 = vector.shape_cast %130 : vector<8x8x24xf32> to vector<64x24xf32>
      %c2_140 = arith.constant 2 : index
      %c1_141 = arith.constant 1 : index
      %c0_142 = arith.constant 0 : index
      %c0_143 = arith.constant 0 : index
      %132 = vector.load %arg2[%c2_140, %c1_141, %c0_142, %c0_143] : memref<3x3x24x8xf32, #tpu.memory_space<vmem>>, vector<1x1x24x8xf32>
      %133 = vector.shape_cast %132 : vector<1x1x24x8xf32> to vector<24x8xf32>
      %cst_144 = arith.constant dense<0.000000e+00> : vector<64x8xf32>
      %134 = tpu.matmul %131, %133, %cst_144 {dimension_numbers = #tpu.dot_dimension_numbers<[1], [0], [0], [1], [0, 0, 1, 1], [], []>} : vector<64x24xf32>, vector<24x8xf32>, vector<64x8xf32> -> vector<64x8xf32>
      %135 = arith.addf %122, %134 : vector<64x8xf32>
      %c2_i32_145 = arith.constant 2 : i32
      %136 = arith.addi %arg9, %c2_i32_145 : i32
      %137 = arith.index_cast %136 : i32 to index
      %c2_146 = arith.constant 2 : index
      %c0_147 = arith.constant 0 : index
      %c0_148 = arith.constant 0 : index
      %138 = vector.load %arg7[%137, %c2_146, %c0_147, %c0_148] : memref<10x10x10x8xf32, #tpu.memory_space<vmem>>, vector<1x8x10x8xf32>
      %139 = vector.shape_cast %138 : vector<1x8x10x8xf32> to vector<8x10x8xf32>
      %140 = vector.extract_strided_slice %139 {offsets = [0, 0, 0], sizes = [8, 8, 8], strides = [1, 1, 1]} : vector<8x10x8xf32> to vector<8x8x8xf32>
      %141 = vector.extract_strided_slice %139 {offsets = [0, 1, 0], sizes = [8, 8, 8], strides = [1, 1, 1]} : vector<8x10x8xf32> to vector<8x8x8xf32>
      %142 = vector.extract_strided_slice %139 {offsets = [0, 2, 0], sizes = [8, 8, 8], strides = [1, 1, 1]} : vector<8x10x8xf32> to vector<8x8x8xf32>
      %143 = tpu.concatenate %140, %141, %142 in 2 : vector<8x8x8xf32>, vector<8x8x8xf32>, vector<8x8x8xf32> -> vector<8x8x24xf32>
      %144 = vector.shape_cast %143 : vector<8x8x24xf32> to vector<64x24xf32>
      %c2_149 = arith.constant 2 : index
      %c2_150 = arith.constant 2 : index
      %c0_151 = arith.constant 0 : index
      %c0_152 = arith.constant 0 : index
      %145 = vector.load %arg2[%c2_149, %c2_150, %c0_151, %c0_152] : memref<3x3x24x8xf32, #tpu.memory_space<vmem>>, vector<1x1x24x8xf32>
      %146 = vector.shape_cast %145 : vector<1x1x24x8xf32> to vector<24x8xf32>
      %cst_153 = arith.constant dense<0.000000e+00> : vector<64x8xf32>
      %147 = tpu.matmul %144, %146, %cst_153 {dimension_numbers = #tpu.dot_dimension_numbers<[1], [0], [0], [1], [0, 0, 1, 1], [], []>} : vector<64x24xf32>, vector<24x8xf32>, vector<64x8xf32> -> vector<64x8xf32>
      %148 = arith.addf %135, %147 : vector<64x8xf32>
      %149 = vector.broadcast %27 : vector<1x8xf32> to vector<64x8xf32>
      %150 = arith.addf %148, %149 : vector<64x8xf32>
      %cst_154 = arith.constant 0.000000e+00 : f32
      %151 = vector.broadcast %cst_154 : f32 to vector<64x8xf32>
      %152 = arith.maximumf %150, %151 : vector<64x8xf32>
      %153 = vector.shape_cast %152 : vector<64x8xf32> to vector<1x8x8x8xf32>
      %c1_i32_155 = arith.constant 1 : i32
      %154 = arith.addi %c1_i32_155, %arg9 : i32
      %155 = arith.index_cast %154 : i32 to index
      %c1_156 = arith.constant 1 : index
      %c1_157 = arith.constant 1 : index
      %c0_158 = arith.constant 0 : index
      %156 = vector.load %arg8[%155, %c1_156, %c1_157, %c0_158] : memref<10x10x10x8xf32, #tpu.memory_space<vmem>>, vector<1x8x8x8xf32>
      tpu.vector_store %arg8[%155, %c1_156, %c1_157, %c0_158], %153 {strides = array<i32>} : memref<10x10x10x8xf32, #tpu.memory_space<vmem>>, vector<1x8x8x8xf32>,
    }
    %c8_i32_69 = arith.constant 8 : i32
    %c0_i32_70 = arith.constant 0 : i32
    %c8_i32_71 = arith.constant 8 : i32
    %30 = arith.addi %c0_i32_70, %c8_i32_71 : i32
    %c1_i32_72 = arith.constant 1 : i32
    scf.for %arg9 = %c0_i32_70 to %30 step %c1_i32_72  : i32 {
      %cst_74 = arith.constant 0.000000e+00 : f32
      %31 = vector.broadcast %cst_74 : f32 to vector<64x8xf32>
      %c0_i32_75 = arith.constant 0 : i32
      %32 = arith.addi %arg9, %c0_i32_75 : i32
      %33 = arith.index_cast %32 : i32 to index
      %c0_76 = arith.constant 0 : index
      %c0_77 = arith.constant 0 : index
      %c0_78 = arith.constant 0 : index
      %34 = vector.load %arg8[%33, %c0_76, %c0_77, %c0_78] : memref<10x10x10x8xf32, #tpu.memory_space<vmem>>, vector<1x8x10x8xf32>
      %35 = vector.shape_cast %34 : vector<1x8x10x8xf32> to vector<8x10x8xf32>
      %36 = vector.extract_strided_slice %35 {offsets = [0, 0, 0], sizes = [8, 8, 8], strides = [1, 1, 1]} : vector<8x10x8xf32> to vector<8x8x8xf32>
      %37 = vector.extract_strided_slice %35 {offsets = [0, 1, 0], sizes = [8, 8, 8], strides = [1, 1, 1]} : vector<8x10x8xf32> to vector<8x8x8xf32>
      %38 = vector.extract_strided_slice %35 {offsets = [0, 2, 0], sizes = [8, 8, 8], strides = [1, 1, 1]} : vector<8x10x8xf32> to vector<8x8x8xf32>
      %39 = tpu.concatenate %36, %37, %38 in 2 : vector<8x8x8xf32>, vector<8x8x8xf32>, vector<8x8x8xf32> -> vector<8x8x24xf32>
      %40 = vector.shape_cast %39 : vector<8x8x24xf32> to vector<64x24xf32>
      %c0_79 = arith.constant 0 : index
      %c0_80 = arith.constant 0 : index
      %c0_81 = arith.constant 0 : index
      %c0_82 = arith.constant 0 : index
      %41 = vector.load %arg4[%c0_79, %c0_80, %c0_81, %c0_82] : memref<3x3x24x8xf32, #tpu.memory_space<vmem>>, vector<1x1x24x8xf32>
      %42 = vector.shape_cast %41 : vector<1x1x24x8xf32> to vector<24x8xf32>
      %cst_83 = arith.constant dense<0.000000e+00> : vector<64x8xf32>
      %43 = tpu.matmul %40, %42, %cst_83 {dimension_numbers = #tpu.dot_dimension_numbers<[1], [0], [0], [1], [0, 0, 1, 1], [], []>} : vector<64x24xf32>, vector<24x8xf32>, vector<64x8xf32> -> vector<64x8xf32>
      %44 = arith.addf %31, %43 : vector<64x8xf32>
      %c0_i32_84 = arith.constant 0 : i32
      %45 = arith.addi %arg9, %c0_i32_84 : i32
      %46 = arith.index_cast %45 : i32 to index
      %c1_85 = arith.constant 1 : index
      %c0_86 = arith.constant 0 : index
      %c0_87 = arith.constant 0 : index
      %47 = vector.load %arg8[%46, %c1_85, %c0_86, %c0_87] : memref<10x10x10x8xf32, #tpu.memory_space<vmem>>, vector<1x8x10x8xf32>
      %48 = vector.shape_cast %47 : vector<1x8x10x8xf32> to vector<8x10x8xf32>
      %49 = vector.extract_strided_slice %48 {offsets = [0, 0, 0], sizes = [8, 8, 8], strides = [1, 1, 1]} : vector<8x10x8xf32> to vector<8x8x8xf32>
      %50 = vector.extract_strided_slice %48 {offsets = [0, 1, 0], sizes = [8, 8, 8], strides = [1, 1, 1]} : vector<8x10x8xf32> to vector<8x8x8xf32>
      %51 = vector.extract_strided_slice %48 {offsets = [0, 2, 0], sizes = [8, 8, 8], strides = [1, 1, 1]} : vector<8x10x8xf32> to vector<8x8x8xf32>
      %52 = tpu.concatenate %49, %50, %51 in 2 : vector<8x8x8xf32>, vector<8x8x8xf32>, vector<8x8x8xf32> -> vector<8x8x24xf32>
      %53 = vector.shape_cast %52 : vector<8x8x24xf32> to vector<64x24xf32>
      %c0_88 = arith.constant 0 : index
      %c1_89 = arith.constant 1 : index
      %c0_90 = arith.constant 0 : index
      %c0_91 = arith.constant 0 : index
      %54 = vector.load %arg4[%c0_88, %c1_89, %c0_90, %c0_91] : memref<3x3x24x8xf32, #tpu.memory_space<vmem>>, vector<1x1x24x8xf32>
      %55 = vector.shape_cast %54 : vector<1x1x24x8xf32> to vector<24x8xf32>
      %cst_92 = arith.constant dense<0.000000e+00> : vector<64x8xf32>
      %56 = tpu.matmul %53, %55, %cst_92 {dimension_numbers = #tpu.dot_dimension_numbers<[1], [0], [0], [1], [0, 0, 1, 1], [], []>} : vector<64x24xf32>, vector<24x8xf32>, vector<64x8xf32> -> vector<64x8xf32>
      %57 = arith.addf %44, %56 : vector<64x8xf32>
      %c0_i32_93 = arith.constant 0 : i32
      %58 = arith.addi %arg9, %c0_i32_93 : i32
      %59 = arith.index_cast %58 : i32 to index
      %c2 = arith.constant 2 : index
      %c0_94 = arith.constant 0 : index
      %c0_95 = arith.constant 0 : index
      %60 = vector.load %arg8[%59, %c2, %c0_94, %c0_95] : memref<10x10x10x8xf32, #tpu.memory_space<vmem>>, vector<1x8x10x8xf32>
      %61 = vector.shape_cast %60 : vector<1x8x10x8xf32> to vector<8x10x8xf32>
      %62 = vector.extract_strided_slice %61 {offsets = [0, 0, 0], sizes = [8, 8, 8], strides = [1, 1, 1]} : vector<8x10x8xf32> to vector<8x8x8xf32>
      %63 = vector.extract_strided_slice %61 {offsets = [0, 1, 0], sizes = [8, 8, 8], strides = [1, 1, 1]} : vector<8x10x8xf32> to vector<8x8x8xf32>
      %64 = vector.extract_strided_slice %61 {offsets = [0, 2, 0], sizes = [8, 8, 8], strides = [1, 1, 1]} : vector<8x10x8xf32> to vector<8x8x8xf32>
      %65 = tpu.concatenate %62, %63, %64 in 2 : vector<8x8x8xf32>, vector<8x8x8xf32>, vector<8x8x8xf32> -> vector<8x8x24xf32>
      %66 = vector.shape_cast %65 : vector<8x8x24xf32> to vector<64x24xf32>
      %c0_96 = arith.constant 0 : index
      %c2_97 = arith.constant 2 : index
      %c0_98 = arith.constant 0 : index
      %c0_99 = arith.constant 0 : index
      %67 = vector.load %arg4[%c0_96, %c2_97, %c0_98, %c0_99] : memref<3x3x24x8xf32, #tpu.memory_space<vmem>>, vector<1x1x24x8xf32>
      %68 = vector.shape_cast %67 : vector<1x1x24x8xf32> to vector<24x8xf32>
      %cst_100 = arith.constant dense<0.000000e+00> : vector<64x8xf32>
      %69 = tpu.matmul %66, %68, %cst_100 {dimension_numbers = #tpu.dot_dimension_numbers<[1], [0], [0], [1], [0, 0, 1, 1], [], []>} : vector<64x24xf32>, vector<24x8xf32>, vector<64x8xf32> -> vector<64x8xf32>
      %70 = arith.addf %57, %69 : vector<64x8xf32>
      %c1_i32_101 = arith.constant 1 : i32
      %71 = arith.addi %arg9, %c1_i32_101 : i32
      %72 = arith.index_cast %71 : i32 to index
      %c0_102 = arith.constant 0 : index
      %c0_103 = arith.constant 0 : index
      %c0_104 = arith.constant 0 : index
      %73 = vector.load %arg8[%72, %c0_102, %c0_103, %c0_104] : memref<10x10x10x8xf32, #tpu.memory_space<vmem>>, vector<1x8x10x8xf32>
      %74 = vector.shape_cast %73 : vector<1x8x10x8xf32> to vector<8x10x8xf32>
      %75 = vector.extract_strided_slice %74 {offsets = [0, 0, 0], sizes = [8, 8, 8], strides = [1, 1, 1]} : vector<8x10x8xf32> to vector<8x8x8xf32>
      %76 = vector.extract_strided_slice %74 {offsets = [0, 1, 0], sizes = [8, 8, 8], strides = [1, 1, 1]} : vector<8x10x8xf32> to vector<8x8x8xf32>
      %77 = vector.extract_strided_slice %74 {offsets = [0, 2, 0], sizes = [8, 8, 8], strides = [1, 1, 1]} : vector<8x10x8xf32> to vector<8x8x8xf32>
      %78 = tpu.concatenate %75, %76, %77 in 2 : vector<8x8x8xf32>, vector<8x8x8xf32>, vector<8x8x8xf32> -> vector<8x8x24xf32>
      %79 = vector.shape_cast %78 : vector<8x8x24xf32> to vector<64x24xf32>
      %c1_105 = arith.constant 1 : index
      %c0_106 = arith.constant 0 : index
      %c0_107 = arith.constant 0 : index
      %c0_108 = arith.constant 0 : index
      %80 = vector.load %arg4[%c1_105, %c0_106, %c0_107, %c0_108] : memref<3x3x24x8xf32, #tpu.memory_space<vmem>>, vector<1x1x24x8xf32>
      %81 = vector.shape_cast %80 : vector<1x1x24x8xf32> to vector<24x8xf32>
      %cst_109 = arith.constant dense<0.000000e+00> : vector<64x8xf32>
      %82 = tpu.matmul %79, %81, %cst_109 {dimension_numbers = #tpu.dot_dimension_numbers<[1], [0], [0], [1], [0, 0, 1, 1], [], []>} : vector<64x24xf32>, vector<24x8xf32>, vector<64x8xf32> -> vector<64x8xf32>
      %83 = arith.addf %70, %82 : vector<64x8xf32>
      %c1_i32_110 = arith.constant 1 : i32
      %84 = arith.addi %arg9, %c1_i32_110 : i32
      %85 = arith.index_cast %84 : i32 to index
      %c1_111 = arith.constant 1 : index
      %c0_112 = arith.constant 0 : index
      %c0_113 = arith.constant 0 : index
      %86 = vector.load %arg8[%85, %c1_111, %c0_112, %c0_113] : memref<10x10x10x8xf32, #tpu.memory_space<vmem>>, vector<1x8x10x8xf32>
      %87 = vector.shape_cast %86 : vector<1x8x10x8xf32> to vector<8x10x8xf32>
      %88 = vector.extract_strided_slice %87 {offsets = [0, 0, 0], sizes = [8, 8, 8], strides = [1, 1, 1]} : vector<8x10x8xf32> to vector<8x8x8xf32>
      %89 = vector.extract_strided_slice %87 {offsets = [0, 1, 0], sizes = [8, 8, 8], strides = [1, 1, 1]} : vector<8x10x8xf32> to vector<8x8x8xf32>
      %90 = vector.extract_strided_slice %87 {offsets = [0, 2, 0], sizes = [8, 8, 8], strides = [1, 1, 1]} : vector<8x10x8xf32> to vector<8x8x8xf32>
      %91 = tpu.concatenate %88, %89, %90 in 2 : vector<8x8x8xf32>, vector<8x8x8xf32>, vector<8x8x8xf32> -> vector<8x8x24xf32>
      %92 = vector.shape_cast %91 : vector<8x8x24xf32> to vector<64x24xf32>
      %c1_114 = arith.constant 1 : index
      %c1_115 = arith.constant 1 : index
      %c0_116 = arith.constant 0 : index
      %c0_117 = arith.constant 0 : index
      %93 = vector.load %arg4[%c1_114, %c1_115, %c0_116, %c0_117] : memref<3x3x24x8xf32, #tpu.memory_space<vmem>>, vector<1x1x24x8xf32>
      %94 = vector.shape_cast %93 : vector<1x1x24x8xf32> to vector<24x8xf32>
      %cst_118 = arith.constant dense<0.000000e+00> : vector<64x8xf32>
      %95 = tpu.matmul %92, %94, %cst_118 {dimension_numbers = #tpu.dot_dimension_numbers<[1], [0], [0], [1], [0, 0, 1, 1], [], []>} : vector<64x24xf32>, vector<24x8xf32>, vector<64x8xf32> -> vector<64x8xf32>
      %96 = arith.addf %83, %95 : vector<64x8xf32>
      %c1_i32_119 = arith.constant 1 : i32
      %97 = arith.addi %arg9, %c1_i32_119 : i32
      %98 = arith.index_cast %97 : i32 to index
      %c2_120 = arith.constant 2 : index
      %c0_121 = arith.constant 0 : index
      %c0_122 = arith.constant 0 : index
      %99 = vector.load %arg8[%98, %c2_120, %c0_121, %c0_122] : memref<10x10x10x8xf32, #tpu.memory_space<vmem>>, vector<1x8x10x8xf32>
      %100 = vector.shape_cast %99 : vector<1x8x10x8xf32> to vector<8x10x8xf32>
      %101 = vector.extract_strided_slice %100 {offsets = [0, 0, 0], sizes = [8, 8, 8], strides = [1, 1, 1]} : vector<8x10x8xf32> to vector<8x8x8xf32>
      %102 = vector.extract_strided_slice %100 {offsets = [0, 1, 0], sizes = [8, 8, 8], strides = [1, 1, 1]} : vector<8x10x8xf32> to vector<8x8x8xf32>
      %103 = vector.extract_strided_slice %100 {offsets = [0, 2, 0], sizes = [8, 8, 8], strides = [1, 1, 1]} : vector<8x10x8xf32> to vector<8x8x8xf32>
      %104 = tpu.concatenate %101, %102, %103 in 2 : vector<8x8x8xf32>, vector<8x8x8xf32>, vector<8x8x8xf32> -> vector<8x8x24xf32>
      %105 = vector.shape_cast %104 : vector<8x8x24xf32> to vector<64x24xf32>
      %c1_123 = arith.constant 1 : index
      %c2_124 = arith.constant 2 : index
      %c0_125 = arith.constant 0 : index
      %c0_126 = arith.constant 0 : index
      %106 = vector.load %arg4[%c1_123, %c2_124, %c0_125, %c0_126] : memref<3x3x24x8xf32, #tpu.memory_space<vmem>>, vector<1x1x24x8xf32>
      %107 = vector.shape_cast %106 : vector<1x1x24x8xf32> to vector<24x8xf32>
      %cst_127 = arith.constant dense<0.000000e+00> : vector<64x8xf32>
      %108 = tpu.matmul %105, %107, %cst_127 {dimension_numbers = #tpu.dot_dimension_numbers<[1], [0], [0], [1], [0, 0, 1, 1], [], []>} : vector<64x24xf32>, vector<24x8xf32>, vector<64x8xf32> -> vector<64x8xf32>
      %109 = arith.addf %96, %108 : vector<64x8xf32>
      %c2_i32 = arith.constant 2 : i32
      %110 = arith.addi %arg9, %c2_i32 : i32
      %111 = arith.index_cast %110 : i32 to index
      %c0_128 = arith.constant 0 : index
      %c0_129 = arith.constant 0 : index
      %c0_130 = arith.constant 0 : index
      %112 = vector.load %arg8[%111, %c0_128, %c0_129, %c0_130] : memref<10x10x10x8xf32, #tpu.memory_space<vmem>>, vector<1x8x10x8xf32>
      %113 = vector.shape_cast %112 : vector<1x8x10x8xf32> to vector<8x10x8xf32>
      %114 = vector.extract_strided_slice %113 {offsets = [0, 0, 0], sizes = [8, 8, 8], strides = [1, 1, 1]} : vector<8x10x8xf32> to vector<8x8x8xf32>
      %115 = vector.extract_strided_slice %113 {offsets = [0, 1, 0], sizes = [8, 8, 8], strides = [1, 1, 1]} : vector<8x10x8xf32> to vector<8x8x8xf32>
      %116 = vector.extract_strided_slice %113 {offsets = [0, 2, 0], sizes = [8, 8, 8], strides = [1, 1, 1]} : vector<8x10x8xf32> to vector<8x8x8xf32>
      %117 = tpu.concatenate %114, %115, %116 in 2 : vector<8x8x8xf32>, vector<8x8x8xf32>, vector<8x8x8xf32> -> vector<8x8x24xf32>
      %118 = vector.shape_cast %117 : vector<8x8x24xf32> to vector<64x24xf32>
      %c2_131 = arith.constant 2 : index
      %c0_132 = arith.constant 0 : index
      %c0_133 = arith.constant 0 : index
      %c0_134 = arith.constant 0 : index
      %119 = vector.load %arg4[%c2_131, %c0_132, %c0_133, %c0_134] : memref<3x3x24x8xf32, #tpu.memory_space<vmem>>, vector<1x1x24x8xf32>
      %120 = vector.shape_cast %119 : vector<1x1x24x8xf32> to vector<24x8xf32>
      %cst_135 = arith.constant dense<0.000000e+00> : vector<64x8xf32>
      %121 = tpu.matmul %118, %120, %cst_135 {dimension_numbers = #tpu.dot_dimension_numbers<[1], [0], [0], [1], [0, 0, 1, 1], [], []>} : vector<64x24xf32>, vector<24x8xf32>, vector<64x8xf32> -> vector<64x8xf32>
      %122 = arith.addf %109, %121 : vector<64x8xf32>
      %c2_i32_136 = arith.constant 2 : i32
      %123 = arith.addi %arg9, %c2_i32_136 : i32
      %124 = arith.index_cast %123 : i32 to index
      %c1_137 = arith.constant 1 : index
      %c0_138 = arith.constant 0 : index
      %c0_139 = arith.constant 0 : index
      %125 = vector.load %arg8[%124, %c1_137, %c0_138, %c0_139] : memref<10x10x10x8xf32, #tpu.memory_space<vmem>>, vector<1x8x10x8xf32>
      %126 = vector.shape_cast %125 : vector<1x8x10x8xf32> to vector<8x10x8xf32>
      %127 = vector.extract_strided_slice %126 {offsets = [0, 0, 0], sizes = [8, 8, 8], strides = [1, 1, 1]} : vector<8x10x8xf32> to vector<8x8x8xf32>
      %128 = vector.extract_strided_slice %126 {offsets = [0, 1, 0], sizes = [8, 8, 8], strides = [1, 1, 1]} : vector<8x10x8xf32> to vector<8x8x8xf32>
      %129 = vector.extract_strided_slice %126 {offsets = [0, 2, 0], sizes = [8, 8, 8], strides = [1, 1, 1]} : vector<8x10x8xf32> to vector<8x8x8xf32>
      %130 = tpu.concatenate %127, %128, %129 in 2 : vector<8x8x8xf32>, vector<8x8x8xf32>, vector<8x8x8xf32> -> vector<8x8x24xf32>
      %131 = vector.shape_cast %130 : vector<8x8x24xf32> to vector<64x24xf32>
      %c2_140 = arith.constant 2 : index
      %c1_141 = arith.constant 1 : index
      %c0_142 = arith.constant 0 : index
      %c0_143 = arith.constant 0 : index
      %132 = vector.load %arg4[%c2_140, %c1_141, %c0_142, %c0_143] : memref<3x3x24x8xf32, #tpu.memory_space<vmem>>, vector<1x1x24x8xf32>
      %133 = vector.shape_cast %132 : vector<1x1x24x8xf32> to vector<24x8xf32>
      %cst_144 = arith.constant dense<0.000000e+00> : vector<64x8xf32>
      %134 = tpu.matmul %131, %133, %cst_144 {dimension_numbers = #tpu.dot_dimension_numbers<[1], [0], [0], [1], [0, 0, 1, 1], [], []>} : vector<64x24xf32>, vector<24x8xf32>, vector<64x8xf32> -> vector<64x8xf32>
      %135 = arith.addf %122, %134 : vector<64x8xf32>
      %c2_i32_145 = arith.constant 2 : i32
      %136 = arith.addi %arg9, %c2_i32_145 : i32
      %137 = arith.index_cast %136 : i32 to index
      %c2_146 = arith.constant 2 : index
      %c0_147 = arith.constant 0 : index
      %c0_148 = arith.constant 0 : index
      %138 = vector.load %arg8[%137, %c2_146, %c0_147, %c0_148] : memref<10x10x10x8xf32, #tpu.memory_space<vmem>>, vector<1x8x10x8xf32>
      %139 = vector.shape_cast %138 : vector<1x8x10x8xf32> to vector<8x10x8xf32>
      %140 = vector.extract_strided_slice %139 {offsets = [0, 0, 0], sizes = [8, 8, 8], strides = [1, 1, 1]} : vector<8x10x8xf32> to vector<8x8x8xf32>
      %141 = vector.extract_strided_slice %139 {offsets = [0, 1, 0], sizes = [8, 8, 8], strides = [1, 1, 1]} : vector<8x10x8xf32> to vector<8x8x8xf32>
      %142 = vector.extract_strided_slice %139 {offsets = [0, 2, 0], sizes = [8, 8, 8], strides = [1, 1, 1]} : vector<8x10x8xf32> to vector<8x8x8xf32>
      %143 = tpu.concatenate %140, %141, %142 in 2 : vector<8x8x8xf32>, vector<8x8x8xf32>, vector<8x8x8xf32> -> vector<8x8x24xf32>
      %144 = vector.shape_cast %143 : vector<8x8x24xf32> to vector<64x24xf32>
      %c2_149 = arith.constant 2 : index
      %c2_150 = arith.constant 2 : index
      %c0_151 = arith.constant 0 : index
      %c0_152 = arith.constant 0 : index
      %145 = vector.load %arg4[%c2_149, %c2_150, %c0_151, %c0_152] : memref<3x3x24x8xf32, #tpu.memory_space<vmem>>, vector<1x1x24x8xf32>
      %146 = vector.shape_cast %145 : vector<1x1x24x8xf32> to vector<24x8xf32>
      %cst_153 = arith.constant dense<0.000000e+00> : vector<64x8xf32>
      %147 = tpu.matmul %144, %146, %cst_153 {dimension_numbers = #tpu.dot_dimension_numbers<[1], [0], [0], [1], [0, 0, 1, 1], [], []>} : vector<64x24xf32>, vector<24x8xf32>, vector<64x8xf32> -> vector<64x8xf32>
      %148 = arith.addf %135, %147 : vector<64x8xf32>
      %149 = vector.broadcast %28 : vector<1x8xf32> to vector<64x8xf32>
      %150 = arith.addf %148, %149 : vector<64x8xf32>
      %cst_154 = arith.constant 0.000000e+00 : f32
      %151 = vector.broadcast %cst_154 : f32 to vector<64x8xf32>
      %152 = arith.maximumf %150, %151 : vector<64x8xf32>
      %c0_155 = arith.constant 0 : index
      %153 = arith.index_cast %arg9 : i32 to index
      %c0_156 = arith.constant 0 : index
      %c0_157 = arith.constant 0 : index
      %c0_158 = arith.constant 0 : index
      %154 = vector.load %arg1[%c0_155, %153, %c0_156, %c0_157, %c0_158] : memref<1x8x8x8x8xf32, #tpu.memory_space<vmem>>, vector<1x1x8x8x8xf32>
      %155 = vector.shape_cast %154 : vector<1x1x8x8x8xf32> to vector<1x8x8x8xf32>
      %156 = vector.shape_cast %152 : vector<64x8xf32> to vector<1x8x8x8xf32>
      %157 = arith.addf %156, %155 : vector<1x8x8x8xf32>
      %c0_159 = arith.constant 0 : index
      %158 = arith.index_cast %arg9 : i32 to index
      %c0_160 = arith.constant 0 : index
      %c0_161 = arith.constant 0 : index
      %c0_162 = arith.constant 0 : index
      %159 = vector.load %arg6[%c0_159, %158, %c0_160, %c0_161, %c0_162] : memref<1x8x8x8x8xf32, #tpu.memory_space<vmem>>, vector<1x1x8x8x8xf32>
      %160 = vector.shape_cast %159 : vector<1x1x8x8x8xf32> to vector<1x8x8x8xf32>
      %161 = vector.shape_cast %157 : vector<1x8x8x8xf32> to vector<1x1x8x8x8xf32>
      tpu.vector_store %arg6[%c0_159, %158, %c0_160, %c0_161, %c0_162], %161 {strides = array<i32>} : memref<1x8x8x8x8xf32, #tpu.memory_space<vmem>>, vector<1x1x8x8x8xf32>,
    }
    %c8_i32_73 = arith.constant 8 : i32
    return
  }
  func.func @transform_0(%arg0: i32) -> (i32, i32, i32, i32, i32) {
    %c0_i32 = arith.constant 0 : i32
    %c0_i32_0 = arith.constant 0 : i32
    %c0_i32_1 = arith.constant 0 : i32
    %c0_i32_2 = arith.constant 0 : i32
    %c0_i32_3 = arith.constant 0 : i32
    return %arg0, %c0_i32, %c0_i32_0, %c0_i32_1, %c0_i32_2 : i32, i32, i32, i32, i32
  }
  func.func @transform_1(%arg0: i32) -> (i32, i32, i32, i32) {
    %c0_i32 = arith.constant 0 : i32
    %c0_i32_0 = arith.constant 0 : i32
    %c0_i32_1 = arith.constant 0 : i32
    %c0_i32_2 = arith.constant 0 : i32
    %c0_i32_3 = arith.constant 0 : i32
    return %c0_i32, %c0_i32_0, %c0_i32_1, %c0_i32_2 : i32, i32, i32, i32
  }
  func.func @transform_2(%arg0: i32) -> (i32, i32) {
    %c0_i32 = arith.constant 0 : i32
    %c0_i32_0 = arith.constant 0 : i32
    %c0_i32_1 = arith.constant 0 : i32
    return %c0_i32, %c0_i32_0 : i32, i32
  }
  func.func @transform_3(%arg0: i32) -> (i32, i32, i32, i32) {
    %c0_i32 = arith.constant 0 : i32
    %c0_i32_0 = arith.constant 0 : i32
    %c0_i32_1 = arith.constant 0 : i32
    %c0_i32_2 = arith.constant 0 : i32
    %c0_i32_3 = arith.constant 0 : i32
    return %c0_i32, %c0_i32_0, %c0_i32_1, %c0_i32_2 : i32, i32, i32, i32
  }
  func.func @transform_4(%arg0: i32) -> (i32, i32) {
    %c0_i32 = arith.constant 0 : i32
    %c0_i32_0 = arith.constant 0 : i32
    %c0_i32_1 = arith.constant 0 : i32
    return %c0_i32, %c0_i32_0 : i32, i32
  }
  func.func @transform_5(%arg0: i32) -> (i32, i32, i32, i32, i32) {
    %c0_i32 = arith.constant 0 : i32
    %c0_i32_0 = arith.constant 0 : i32
    %c0_i32_1 = arith.constant 0 : i32
    %c0_i32_2 = arith.constant 0 : i32
    %c0_i32_3 = arith.constant 0 : i32
    return %arg0, %c0_i32, %c0_i32_0, %c0_i32_1, %c0_i32_2 : i32, i32, i32, i32, i32
  }
}

</mosaic_0001>

<bundles_post_ra>
// kernel: tpu_custom_call.1
= control target key start
LH: loop header
LB: loop body
LE: loop exit
PB: predicated region body
PF: predicated region fallthrough
CT: control target
= control target key end

     0   :  { %10 = vsyncpa [#allocation5], 0  ;;  %s9448_s0 = inlined_call_operand.hbm [shape: f32[2,8,8,8,8], index: 0, kind: input, shape index: {}]   ;;  %s9449_s1 = inlined_call_operand.vmem [shape: f32[3,3,24,8], index: 1, kind: input, shape index: {}]   ;;  %s9450_s2 = inlined_call_operand.vmem [shape: f32[1,8], index: 2, kind: input, shape index: {}]   ;;  %s9451_s3 = inlined_call_operand.vmem [shape: f32[3,3,24,8], index: 3, kind: input, shape index: {}]   ;;  %s9452_s4 = inlined_call_operand.vmem [shape: f32[1,8], index: 4, kind: input, shape index: {}]   ;;  %s9453_s5 = inlined_call_operand.hbm [shape: f32[2,8,8,8,8], index: 5, kind: output, shape index: {}]  }
   0x1   :  { %12 = vsyncpa [#allocation5 + $0x1], 0 }
   0x2   :  { %13 = vsyncpa [#allocation6], 0 }
   0x3   :  { %15 = vsyncpa [#allocation6 + $0x1], 0  ;;  %s5763_s18 = smov 0   ;;  %s5765_s19 = smov 0  }
   0x4   :  { %s5767_s20 = smov 0   ;;  %s5769_s21 = smov 0  }
   0x5 LB: > { %s5784_s22 = sadd.s32 4294967295, %s5714_s21   ;;  %s5022_s23 = sadd.s32 4294967294, %s5714_s21   ;;  %s5714_s21 = sphi %s5769_s21, %s9463_s21   ;;  %s5710_s20 = sphi %s5767_s20, %s9462_s20   ;;  %s5706_s19 = sphi %s5765_s19, %s9461_s19   ;;  %s5702_s18 = sphi %s5763_s18, %s9460_s18  }
   0x6   : > { %s5788_s24 = sadd.s32 1, %s5714_s21   ;;  %s28_s25 = sadd.s32 1, %s5710_s20 }
   0x7   : > { %s25_s26 = ssub.s32 %s5714_s21, %s5788_s24  ;;  %p35_p0 = scmp.ne.s32.totalorder %s5710_s20, %s5706_s19 }
   0x8   : > { %p26_p1 = scmp.eq.s32.totalorder %s25_s26, 0  ;;  %p36_p2 = scmp.eq.s32.totalorder %s5714_s21, 0 }
   0x9   : > { %p41_p3 = scmp.ne.s32.totalorder %s5706_s19, %s5702_s18  ;;  %p42_p4 = scmp.eq.s32.totalorder %s5784_s22, 0 }
   0xa   : > { %s5800_s27 = scalar_select %p26_p1, %s5710_s20, %s28_s25  }
   0xb   : > { %p5802_p5 = por %p36_p2, %p35_p0  ;;  %p5806_p6 = por %p42_p4, %p41_p3 }
   0xc   : > { %p149_p7 = scmp.eq.s32.totalorder %s5784_s22, 1  ;;  %p155_p8 = scmp.eq.s32.totalorder %s5022_s23, 1 }
   0xd   : > { %p5525_p10 = scmp.lt.s32.totalorder %s5714_s21, 2  ;;  %s187_s7 = sand.u32 1, %s5710_s20  }
   0xe   : > { %p5813_p11 = por %p149_p7, %p35_p0  ;;  %p5817_p12 = por %p155_p8, %p41_p3 }
   0xf   : > { %s5493_s8 = sshll.u32 %s5714_s21, 9  ;;  %s5025_s9 = sshll.u32 %s187_s7, 9 }
  0x10   : > { %s196_s12 = scalar_lea.hbm %s9448_s0, %s5493_s8  ;;  %s191_s14 = scalar_lea.vmem [#allocation4], %s5025_s9 }
  0x11   : > { %s197_s13 = sshll.u32 %s196_s12, 4  ;;  %s199_s15 = sshll.u32 %s191_s14, 4  ;;  %s198_s13 = int_to_ptr.hbm [resolvable:$true] %s197_s13  ;;  %s200_s15 = int_to_ptr.vmem [resolvable:$true] %s199_s15 }
  0x12   : > { %p5828_p13 = pnand %p5525_p10, %p5802_p5  ;;  %p5028_p0 = scmp.ge.s32.totalorder %s5714_s21, 1 }
  0x13   : > { %p207_p1 = scmp.lt.s32.totalorder %s5714_s21, 3  ;;  %s188_s17 = scalar_lea.sflag [#allocation5], %s187_s7 }
  0x14   : > { %s5610_s23 = sshra.s32 %s198_s13, 4  ;;  %p5614_p3 = pneg %p5828_p13  ;;  %s5611_s23 = int_to_ptr.hbm [resolvable:$true] %s5610_s23 }
  0x15   : > { %s5612_s25 = scalar_lea.hbm %s5611_s23, 512  ;;  %s5617_s28 = scalar_lea.hbm %s9448_s0, 1024 }
  0x16   : > { %p5613_p2 = scmp.ne.s32.totalorder %s5611_s23, %s5612_s25  ;;  %p5618_p5 = scmp.lt.s32.totalorder %s5611_s23, %s9448_s0 }
  0x17   : > { %p5619_p8 = scmp.lt.s32.totalorder %s5617_s28, %s5612_s25 }
  0x18   : > { %p5615_p4 = pnand %p5614_p3, %p5613_p2 }
  0x19   : > { %p5620_p10 = por %p5619_p8, %p5618_p5 }
  0x1a   : > { %p5616_p7 = pneg %p5615_p4 }
  0x1c   : > { %p5621_p9 = pnand %p5620_p10, %p5616_p7 }
  0x1e   : > { %5624 = shalt.err (!%p5621_p9)
}
  0x1f   : > { %s5724_s7 = smov 128   ;;  %s5725_s11 = smov 8  }
  0x20   : > { %5520 = dma.hbm_to_vmem [thread:$0]  (!%p5828_p13), %s198_s13, 8192, %s200_s15, %s188_s17, %s5724_s7, %s5724_s7, %s5725_s11  }
  0x21   : > { %p208_p2 = pnand %p5028_p0, %p207_p1 }
  0x22   : > { %s5849_s12 = sand.u32 (!%p208_p2), 1, %s5706_s19  }
  0x23   : > { %211 = sbr.rel (%p208_p2) target bundleno = 1797 (0x705), region = 40  ;;  %s5029_s14 = sshll.u32 (!%p208_p2), %s5849_s12, 9 }
  0x24   : > { %s214_s23 = scalar_lea.sflag (!%p208_p2), [#allocation5], %s5849_s12  ;;  %s5855_s25 = scalar_lea.vmem (!%p208_p2), [#allocation4], %s5029_s14 }
  0x28   : > { %5693 = dma.done.wait (%p5806_p6), %s214_s23, 8192  }
  0x29   : > { %5695 = vsyncadd (%p5806_p6), %s214_s23, 4294959104  ;;  %vm245_vm0 = vcmask 64512   ;;  %v5726_v0 = vmov 0.0   ;;  %v5876_v1 = vld [vmem:[%s9450_s2] sm:$0x1]  ;;  %vm247_vm1 = vcmask 58368  }
  0x2a   : > { %246 = vst.msk [vmem:[#allocation2] sm:$0xff] %vm245_vm0, %v5726_v0  ;;  %v5881_v2 = vld [vmem:[%s9452_s4] sm:$0x1]  ;;  %vm323_vm2 = vcmask 57344   ;;  %v657_v4 = vld [vmem:[%s5855_s25 + $0x8] sm:$0xff]  ;;  %v658_v5 = vld [vmem:[%s5855_s25 + $0x10] sm:$0xff] }
  0x2b   : > { %249 = vst.msk [vmem:[#allocation2 + $0x10] sm:$0xff] %vm245_vm0, %v5726_v0  ;;  %v656_v3 = vld [vmem:[%s5855_s25] sm:$0xff]  ;;  %v659_v6 = vld [vmem:[%s5855_s25 + $0x18] sm:$0xff]  ;;  %v661_v8 = vld [vmem:[%s5855_s25 + $0x28] sm:$0xff]  ;;  %s6801_s17 = scalar_lea.vmem [#allocation7], %s5029_s14  ;;  %s6803_s26 = smov 0  }
  0x2c   : > { %251 = vst.msk [vmem:[#allocation2 + $0x20] sm:$0xff] %vm245_vm0, %v5726_v0  ;;  %v660_v7 = vld [vmem:[%s5855_s25 + $0x20] sm:$0xff]  ;;  %v662_v9 = vld [vmem:[%s5855_s25 + $0x30] sm:$0xff]  ;;  %v663_v10 = vld [vmem:[%s5855_s25 + $0x38] sm:$0xff] }
  0x2d   : > { %253 = vst.msk [vmem:[#allocation2 + $0x30] sm:$0xff] %vm245_vm0, %v5726_v0  ;;  %v664_v11 = vld [vmem:[%s5855_s25 + $0x40] sm:$0xff]  ;;  %v665_v12 = vld [vmem:[%s5855_s25 + $0x48] sm:$0xff]  ;;  %v666_v13 = vld [vmem:[%s5855_s25 + $0x50] sm:$0xff] }
  0x2e   : > { %255 = vst.msk [vmem:[#allocation2 + $0x40] sm:$0xff] %vm245_vm0, %v5726_v0  ;;  %v667_v14 = vld [vmem:[%s5855_s25 + $0x58] sm:$0xff]  ;;  %v668_v15 = vld [vmem:[%s5855_s25 + $0x60] sm:$0xff]  ;;  %v669_v16 = vld [vmem:[%s5855_s25 + $0x68] sm:$0xff] }
  0x2f   : > { %257 = vst.msk [vmem:[#allocation2 + $0x50] sm:$0xff] %vm245_vm0, %v5726_v0  ;;  %v670_v17 = vld [vmem:[%s5855_s25 + $0x70] sm:$0xff]  ;;  %v671_v18 = vld [vmem:[%s5855_s25 + $0x78] sm:$0xff]  ;;  %v672_v19 = vld [vmem:[%s5855_s25 + $0x80] sm:$0xff] }
  0x30   : > { %259 = vst.msk [vmem:[#allocation2 + $0x60] sm:$0xff] %vm245_vm0, %v5726_v0  ;;  %v673_v20 = vld [vmem:[%s5855_s25 + $0x88] sm:$0xff]  ;;  %v674_v21 = vld [vmem:[%s5855_s25 + $0x90] sm:$0xff]  ;;  %v675_v22 = vld [vmem:[%s5855_s25 + $0x98] sm:$0xff] }
  0x31   : > { %261 = vst.msk [vmem:[#allocation2 + $0x70] sm:$0xff] %vm245_vm0, %v5726_v0  ;;  %v676_v23 = vld [vmem:[%s5855_s25 + $0xa0] sm:$0xff]  ;;  %v677_v24 = vld [vmem:[%s5855_s25 + $0xa8] sm:$0xff]  ;;  %v678_v25 = vld [vmem:[%s5855_s25 + $0xb0] sm:$0xff] }
  0x32   : > { %263 = vst.msk [vmem:[#allocation2 + $0x80] sm:$0xff] %vm245_vm0, %v5726_v0  ;;  %v679_v26 = vld [vmem:[%s5855_s25 + $0xb8] sm:$0xff]  ;;  %v680_v27 = vld [vmem:[%s5855_s25 + $0xc0] sm:$0xff]  ;;  %v681_v28 = vld [vmem:[%s5855_s25 + $0xc8] sm:$0xff] }
  0x33   : > { %265 = vst.msk [vmem:[#allocation2 + $0x90] sm:$0xff] %vm245_vm0, %v5726_v0  ;;  %v682_v29 = vld [vmem:[%s5855_s25 + $0xd0] sm:$0xff]  ;;  %v683_v30 = vld [vmem:[%s5855_s25 + $0xd8] sm:$0xff]  ;;  %v684_v31 = vld [vmem:[%s5855_s25 + $0xe0] sm:$0xff] }
  0x34   : > { %268 = vst.msk [vmem:[#allocation2 + $0x5a0] sm:$0xff] %vm245_vm0, %v5726_v0  ;;  %v685_v32 = vld [vmem:[%s5855_s25 + $0xe8] sm:$0xff]  ;;  %v686_v33 = vld [vmem:[%s5855_s25 + $0xf0] sm:$0xff]  ;;  %v687_v34 = vld [vmem:[%s5855_s25 + $0xf8] sm:$0xff] }
  0x35   : > { %270 = vst.msk [vmem:[#allocation2 + $0x5b0] sm:$0xff] %vm245_vm0, %v5726_v0  ;;  %v688_v35 = vld [vmem:[%s5855_s25 + $0x100] sm:$0xff]  ;;  %v689_v36 = vld [vmem:[%s5855_s25 + $0x108] sm:$0xff]  ;;  %v690_v37 = vld [vmem:[%s5855_s25 + $0x110] sm:$0xff] }
  0x36   : > { %272 = vst.msk [vmem:[#allocation2 + $0x5c0] sm:$0xff] %vm245_vm0, %v5726_v0  ;;  %v691_v38 = vld [vmem:[%s5855_s25 + $0x118] sm:$0xff]  ;;  %v692_v39 = vld [vmem:[%s5855_s25 + $0x120] sm:$0xff]  ;;  %v693_v40 = vld [vmem:[%s5855_s25 + $0x128] sm:$0xff] }
  0x37   : > { %274 = vst.msk [vmem:[#allocation2 + $0x5d0] sm:$0xff] %vm245_vm0, %v5726_v0  ;;  %v694_v41 = vld [vmem:[%s5855_s25 + $0x130] sm:$0xff]  ;;  %v695_v42 = vld [vmem:[%s5855_s25 + $0x138] sm:$0xff]  ;;  %v696_v43 = vld [vmem:[%s5855_s25 + $0x140] sm:$0xff] }
  0x38   : > { %276 = vst.msk [vmem:[#allocation2 + $0x5e0] sm:$0xff] %vm245_vm0, %v5726_v0  ;;  %v697_v44 = vld [vmem:[%s5855_s25 + $0x148] sm:$0xff]  ;;  %v698_v45 = vld [vmem:[%s5855_s25 + $0x150] sm:$0xff]  ;;  %v699_v46 = vld [vmem:[%s5855_s25 + $0x158] sm:$0xff] }
  0x39   : > { %278 = vst.msk [vmem:[#allocation2 + $0x5f0] sm:$0xff] %vm245_vm0, %v5726_v0  ;;  %v700_v47 = vld [vmem:[%s5855_s25 + $0x160] sm:$0xff]  ;;  %v701_v48 = vld [vmem:[%s5855_s25 + $0x168] sm:$0xff]  ;;  %v702_v49 = vld [vmem:[%s5855_s25 + $0x170] sm:$0xff] }
  0x3a   : > { %280 = vst.msk [vmem:[#allocation2 + $0x600] sm:$0xff] %vm245_vm0, %v5726_v0  ;;  %v703_v50 = vld [vmem:[%s5855_s25 + $0x178] sm:$0xff]  ;;  %v704_v51 = vld [vmem:[%s5855_s25 + $0x180] sm:$0xff]  ;;  %v705_v52 = vld [vmem:[%s5855_s25 + $0x188] sm:$0xff] }
  0x3b   : > { %282 = vst.msk [vmem:[#allocation2 + $0x610] sm:$0xff] %vm245_vm0, %v5726_v0  ;;  %v706_v53 = vld [vmem:[%s5855_s25 + $0x190] sm:$0xff]  ;;  %v707_v54 = vld [vmem:[%s5855_s25 + $0x198] sm:$0xff]  ;;  %v708_v55 = vld [vmem:[%s5855_s25 + $0x1a0] sm:$0xff] }
  0x3c   : > { %284 = vst.msk [vmem:[#allocation2 + $0x620] sm:$0xff] %vm245_vm0, %v5726_v0  ;;  %v709_v56 = vld [vmem:[%s5855_s25 + $0x1a8] sm:$0xff]  ;;  %v710_v57 = vld [vmem:[%s5855_s25 + $0x1b0] sm:$0xff]  ;;  %v711_v58 = vld [vmem:[%s5855_s25 + $0x1b8] sm:$0xff] }
  0x3d   : > { %286 = vst.msk [vmem:[#allocation2 + $0x630] sm:$0xff] %vm245_vm0, %v5726_v0  ;;  %v712_v59 = vld [vmem:[%s5855_s25 + $0x1c0] sm:$0xff]  ;;  %v713_v60 = vld [vmem:[%s5855_s25 + $0x1c8] sm:$0xff]  ;;  %v714_v61 = vld [vmem:[%s5855_s25 + $0x1d0] sm:$0xff] }
  0x3e   : > { %289 = vst.msk [vmem:[#allocation2 + $0xa0] sm:$0xff] %vm245_vm0, %v5726_v0  ;;  %v715_v62 = vld [vmem:[%s5855_s25 + $0x1d8] sm:$0xff]  ;;  %v716_v63 = vld [vmem:[%s5855_s25 + $0x1e0] sm:$0xff] }
  0x3f   : > { %291 = vst.msk [vmem:[#allocation2 + $0x140] sm:$0xff] %vm245_vm0, %v5726_v0 }
  0x40   : > { %293 = vst.msk [vmem:[#allocation2 + $0x1e0] sm:$0xff] %vm245_vm0, %v5726_v0 }
  0x41   : > { %295 = vst.msk [vmem:[#allocation2 + $0x280] sm:$0xff] %vm245_vm0, %v5726_v0 }
  0x42   : > { %297 = vst.msk [vmem:[#allocation2 + $0x320] sm:$0xff] %vm245_vm0, %v5726_v0 }
  0x43   : > { %299 = vst.msk [vmem:[#allocation2 + $0x3c0] sm:$0xff] %vm245_vm0, %v5726_v0 }
  0x44   : > { %301 = vst.msk [vmem:[#allocation2 + $0x460] sm:$0xff] %vm245_vm0, %v5726_v0 }
  0x45   : > { %303 = vst.msk [vmem:[#allocation2 + $0x500] sm:$0xff] %vm245_vm0, %v5726_v0 }
  0x46   : > { %306 = vst.msk [vmem:[#allocation2 + $0x130] sm:$0xff] %vm245_vm0, %v5726_v0 }
  0x47   : > { %308 = vst.msk [vmem:[#allocation2 + $0x1d0] sm:$0xff] %vm245_vm0, %v5726_v0 }
  0x48   : > { %310 = vst.msk [vmem:[#allocation2 + $0x270] sm:$0xff] %vm245_vm0, %v5726_v0 }
  0x49   : > { %312 = vst.msk [vmem:[#allocation2 + $0x310] sm:$0xff] %vm245_vm0, %v5726_v0 }
  0x4a   : > { %314 = vst.msk [vmem:[#allocation2 + $0x3b0] sm:$0xff] %vm245_vm0, %v5726_v0 }
  0x4b   : > { %316 = vst.msk [vmem:[#allocation2 + $0x450] sm:$0xff] %vm245_vm0, %v5726_v0 }
  0x4c   : > { %318 = vst.msk [vmem:[#allocation2 + $0x4f0] sm:$0xff] %vm245_vm0, %v5726_v0 }
  0x4d   : > { %320 = vst.msk [vmem:[#allocation2 + $0x590] sm:$0xff] %vm245_vm0, %v5726_v0 }
  0x4e   : > { %452 = vst.msk [vmem:[#allocation3] sm:$0xff] %vm245_vm0, %v5726_v0 }
  0x4f   : > { %454 = vst.msk [vmem:[#allocation3 + $0x10] sm:$0xff] %vm245_vm0, %v5726_v0 }
  0x50   : > { %456 = vst.msk [vmem:[#allocation3 + $0x20] sm:$0xff] %vm245_vm0, %v5726_v0 }
  0x51   : > { %458 = vst.msk [vmem:[#allocation3 + $0x30] sm:$0xff] %vm245_vm0, %v5726_v0 }
  0x52   : > { %460 = vst.msk [vmem:[#allocation3 + $0x40] sm:$0xff] %vm245_vm0, %v5726_v0 }
  0x53   : > { %462 = vst.msk [vmem:[#allocation3 + $0x50] sm:$0xff] %vm245_vm0, %v5726_v0 }
  0x54   : > { %464 = vst.msk [vmem:[#allocation3 + $0x60] sm:$0xff] %vm245_vm0, %v5726_v0 }
  0x55   : > { %466 = vst.msk [vmem:[#allocation3 + $0x70] sm:$0xff] %vm245_vm0, %v5726_v0 }
  0x56   : > { %468 = vst.msk [vmem:[#allocation3 + $0x80] sm:$0xff] %vm245_vm0, %v5726_v0 }
  0x57   : > { %470 = vst.msk [vmem:[#allocation3 + $0x90] sm:$0xff] %vm245_vm0, %v5726_v0 }
  0x58   : > { %473 = vst.msk [vmem:[#allocation3 + $0x5a0] sm:$0xff] %vm245_vm0, %v5726_v0 }
  0x59   : > { %475 = vst.msk [vmem:[#allocation3 + $0x5b0] sm:$0xff] %vm245_vm0, %v5726_v0 }
  0x5a   : > { %477 = vst.msk [vmem:[#allocation3 + $0x5c0] sm:$0xff] %vm245_vm0, %v5726_v0 }
  0x5b   : > { %479 = vst.msk [vmem:[#allocation3 + $0x5d0] sm:$0xff] %vm245_vm0, %v5726_v0 }
  0x5c   : > { %481 = vst.msk [vmem:[#allocation3 + $0x5e0] sm:$0xff] %vm245_vm0, %v5726_v0 }
  0x5d   : > { %483 = vst.msk [vmem:[#allocation3 + $0x5f0] sm:$0xff] %vm245_vm0, %v5726_v0 }
  0x5e   : > { %485 = vst.msk [vmem:[#allocation3 + $0x600] sm:$0xff] %vm245_vm0, %v5726_v0 }
  0x5f   : > { %487 = vst.msk [vmem:[#allocation3 + $0x610] sm:$0xff] %vm245_vm0, %v5726_v0 }
  0x60   : > { %489 = vst.msk [vmem:[#allocation3 + $0x620] sm:$0xff] %vm245_vm0, %v5726_v0 }
  0x61   : > { %491 = vst.msk [vmem:[#allocation3 + $0x630] sm:$0xff] %vm245_vm0, %v5726_v0 }
  0x62   : > { %494 = vst.msk [vmem:[#allocation3 + $0xa0] sm:$0xff] %vm245_vm0, %v5726_v0 }
  0x63   : > { %496 = vst.msk [vmem:[#allocation3 + $0x140] sm:$0xff] %vm245_vm0, %v5726_v0 }
  0x64   : > { %498 = vst.msk [vmem:[#allocation3 + $0x1e0] sm:$0xff] %vm245_vm0, %v5726_v0 }
  0x65   : > { %500 = vst.msk [vmem:[#allocation3 + $0x280] sm:$0xff] %vm245_vm0, %v5726_v0 }
  0x66   : > { %502 = vst.msk [vmem:[#allocation3 + $0x320] sm:$0xff] %vm245_vm0, %v5726_v0 }
  0x67   : > { %504 = vst.msk [vmem:[#allocation3 + $0x3c0] sm:$0xff] %vm245_vm0, %v5726_v0 }
  0x68   : > { %506 = vst.msk [vmem:[#allocation3 + $0x460] sm:$0xff] %vm245_vm0, %v5726_v0 }
  0x69   : > { %508 = vst.msk [vmem:[#allocation3 + $0x500] sm:$0xff] %vm245_vm0, %v5726_v0 }
  0x6a   : > { %511 = vst.msk [vmem:[#allocation3 + $0x130] sm:$0xff] %vm245_vm0, %v5726_v0 }
  0x6b   : > { %513 = vst.msk [vmem:[#allocation3 + $0x1d0] sm:$0xff] %vm245_vm0, %v5726_v0 }
  0x6c   : > { %515 = vst.msk [vmem:[#allocation3 + $0x270] sm:$0xff] %vm245_vm0, %v5726_v0 }
  0x6d   : > { %517 = vst.msk [vmem:[#allocation3 + $0x310] sm:$0xff] %vm245_vm0, %v5726_v0 }
  0x6e   : > { %519 = vst.msk [vmem:[#allocation3 + $0x3b0] sm:$0xff] %vm245_vm0, %v5726_v0 }
  0x6f   : > { %521 = vst.msk [vmem:[#allocation3 + $0x450] sm:$0xff] %vm245_vm0, %v5726_v0 }
  0x70   : > { %523 = vst.msk [vmem:[#allocation3 + $0x4f0] sm:$0xff] %vm245_vm0, %v5726_v0 }
  0x71   : > { %525 = vst.msk [vmem:[#allocation3 + $0x590] sm:$0xff] %vm245_vm0, %v5726_v0 }
  0x72   : > { %248 = vst.msk [vmem:[#allocation2 + $0x8] sm:$0x3] %vm247_vm1, %v5726_v0 }
  0x73   : > { %250 = vst.msk [vmem:[#allocation2 + $0x18] sm:$0x3] %vm247_vm1, %v5726_v0 }
  0x74   : > { %252 = vst.msk [vmem:[#allocation2 + $0x28] sm:$0x3] %vm247_vm1, %v5726_v0 }
  0x75   : > { %254 = vst.msk [vmem:[#allocation2 + $0x38] sm:$0x3] %vm247_vm1, %v5726_v0 }
  0x76   : > { %256 = vst.msk [vmem:[#allocation2 + $0x48] sm:$0x3] %vm247_vm1, %v5726_v0 }
  0x77   : > { %258 = vst.msk [vmem:[#allocation2 + $0x58] sm:$0x3] %vm247_vm1, %v5726_v0 }
  0x78   : > { %260 = vst.msk [vmem:[#allocation2 + $0x68] sm:$0x3] %vm247_vm1, %v5726_v0 }
  0x79   : > { %262 = vst.msk [vmem:[#allocation2 + $0x78] sm:$0x3] %vm247_vm1, %v5726_v0 }
  0x7a   : > { %264 = vst.msk [vmem:[#allocation2 + $0x88] sm:$0x3] %vm247_vm1, %v5726_v0 }
  0x7b   : > { %266 = vst.msk [vmem:[#allocation2 + $0x98] sm:$0x3] %vm247_vm1, %v5726_v0 }
  0x7c   : > { %269 = vst.msk [vmem:[#allocation2 + $0x5a8] sm:$0x3] %vm247_vm1, %v5726_v0 }
  0x7d   : > { %271 = vst.msk [vmem:[#allocation2 + $0x5b8] sm:$0x3] %vm247_vm1, %v5726_v0 }
  0x7e   : > { %273 = vst.msk [vmem:[#allocation2 + $0x5c8] sm:$0x3] %vm247_vm1, %v5726_v0 }
  0x7f   : > { %275 = vst.msk [vmem:[#allocation2 + $0x5d8] sm:$0x3] %vm247_vm1, %v5726_v0 }
  0x80   : > { %277 = vst.msk [vmem:[#allocation2 + $0x5e8] sm:$0x3] %vm247_vm1, %v5726_v0 }
  0x81   : > { %279 = vst.msk [vmem:[#allocation2 + $0x5f8] sm:$0x3] %vm247_vm1, %v5726_v0 }
  0x82   : > { %281 = vst.msk [vmem:[#allocation2 + $0x608] sm:$0x3] %vm247_vm1, %v5726_v0 }
  0x83   : > { %283 = vst.msk [vmem:[#allocation2 + $0x618] sm:$0x3] %vm247_vm1, %v5726_v0 }
  0x84   : > { %285 = vst.msk [vmem:[#allocation2 + $0x628] sm:$0x3] %vm247_vm1, %v5726_v0 }
  0x85   : > { %287 = vst.msk [vmem:[#allocation2 + $0x638] sm:$0x3] %vm247_vm1, %v5726_v0 }
  0x86   : > { %290 = vst.msk [vmem:[#allocation2 + $0xa8] sm:$0x3] %vm247_vm1, %v5726_v0 }
  0x87   : > { %292 = vst.msk [vmem:[#allocation2 + $0x148] sm:$0x3] %vm247_vm1, %v5726_v0 }
  0x88   : > { %294 = vst.msk [vmem:[#allocation2 + $0x1e8] sm:$0x3] %vm247_vm1, %v5726_v0 }
  0x89   : > { %296 = vst.msk [vmem:[#allocation2 + $0x288] sm:$0x3] %vm247_vm1, %v5726_v0 }
  0x8a   : > { %298 = vst.msk [vmem:[#allocation2 + $0x328] sm:$0x3] %vm247_vm1, %v5726_v0 }
  0x8b   : > { %300 = vst.msk [vmem:[#allocation2 + $0x3c8] sm:$0x3] %vm247_vm1, %v5726_v0 }
  0x8c   : > { %302 = vst.msk [vmem:[#allocation2 + $0x468] sm:$0x3] %vm247_vm1, %v5726_v0 }
  0x8d   : > { %304 = vst.msk [vmem:[#allocation2 + $0x508] sm:$0x3] %vm247_vm1, %v5726_v0 }
  0x8e   : > { %307 = vst.msk [vmem:[#allocation2 + $0x138] sm:$0x3] %vm247_vm1, %v5726_v0 }
  0x8f   : > { %309 = vst.msk [vmem:[#allocation2 + $0x1d8] sm:$0x3] %vm247_vm1, %v5726_v0 }
  0x90   : > { %311 = vst.msk [vmem:[#allocation2 + $0x278] sm:$0x3] %vm247_vm1, %v5726_v0 }
  0x91   : > { %313 = vst.msk [vmem:[#allocation2 + $0x318] sm:$0x3] %vm247_vm1, %v5726_v0 }
  0x92   : > { %315 = vst.msk [vmem:[#allocation2 + $0x3b8] sm:$0x3] %vm247_vm1, %v5726_v0 }
  0x93   : > { %317 = vst.msk [vmem:[#allocation2 + $0x458] sm:$0x3] %vm247_vm1, %v5726_v0 }
  0x94   : > { %319 = vst.msk [vmem:[#allocation2 + $0x4f8] sm:$0x3] %vm247_vm1, %v5726_v0 }
  0x95   : > { %321 = vst.msk [vmem:[#allocation2 + $0x598] sm:$0x3] %vm247_vm1, %v5726_v0 }
  0x96   : > { %453 = vst.msk [vmem:[#allocation3 + $0x8] sm:$0x3] %vm247_vm1, %v5726_v0 }
  0x97   : > { %455 = vst.msk [vmem:[#allocation3 + $0x18] sm:$0x3] %vm247_vm1, %v5726_v0 }
  0x98   : > { %457 = vst.msk [vmem:[#allocation3 + $0x28] sm:$0x3] %vm247_vm1, %v5726_v0 }
  0x99   : > { %459 = vst.msk [vmem:[#allocation3 + $0x38] sm:$0x3] %vm247_vm1, %v5726_v0 }
  0x9a   : > { %461 = vst.msk [vmem:[#allocation3 + $0x48] sm:$0x3] %vm247_vm1, %v5726_v0 }
  0x9b   : > { %463 = vst.msk [vmem:[#allocation3 + $0x58] sm:$0x3] %vm247_vm1, %v5726_v0 }
  0x9c   : > { %465 = vst.msk [vmem:[#allocation3 + $0x68] sm:$0x3] %vm247_vm1, %v5726_v0 }
  0x9d   : > { %467 = vst.msk [vmem:[#allocation3 + $0x78] sm:$0x3] %vm247_vm1, %v5726_v0 }
  0x9e   : > { %469 = vst.msk [vmem:[#allocation3 + $0x88] sm:$0x3] %vm247_vm1, %v5726_v0 }
  0x9f   : > { %471 = vst.msk [vmem:[#allocation3 + $0x98] sm:$0x3] %vm247_vm1, %v5726_v0 }
  0xa0   : > { %474 = vst.msk [vmem:[#allocation3 + $0x5a8] sm:$0x3] %vm247_vm1, %v5726_v0 }
  0xa1   : > { %476 = vst.msk [vmem:[#allocation3 + $0x5b8] sm:$0x3] %vm247_vm1, %v5726_v0 }
  0xa2   : > { %478 = vst.msk [vmem:[#allocation3 + $0x5c8] sm:$0x3] %vm247_vm1, %v5726_v0 }
  0xa3   : > { %480 = vst.msk [vmem:[#allocation3 + $0x5d8] sm:$0x3] %vm247_vm1, %v5726_v0 }
  0xa4   : > { %482 = vst.msk [vmem:[#allocation3 + $0x5e8] sm:$0x3] %vm247_vm1, %v5726_v0 }
  0xa5   : > { %484 = vst.msk [vmem:[#allocation3 + $0x5f8] sm:$0x3] %vm247_vm1, %v5726_v0 }
  0xa6   : > { %486 = vst.msk [vmem:[#allocation3 + $0x608] sm:$0x3] %vm247_vm1, %v5726_v0 }
  0xa7   : > { %488 = vst.msk [vmem:[#allocation3 + $0x618] sm:$0x3] %vm247_vm1, %v5726_v0 }
  0xa8   : > { %490 = vst.msk [vmem:[#allocation3 + $0x628] sm:$0x3] %vm247_vm1, %v5726_v0 }
  0xa9   : > { %492 = vst.msk [vmem:[#allocation3 + $0x638] sm:$0x3] %vm247_vm1, %v5726_v0 }
  0xaa   : > { %495 = vst.msk [vmem:[#allocation3 + $0xa8] sm:$0x3] %vm247_vm1, %v5726_v0 }
  0xab   : > { %497 = vst.msk [vmem:[#allocation3 + $0x148] sm:$0x3] %vm247_vm1, %v5726_v0 }
  0xac   : > { %499 = vst.msk [vmem:[#allocation3 + $0x1e8] sm:$0x3] %vm247_vm1, %v5726_v0 }
  0xad   : > { %501 = vst.msk [vmem:[#allocation3 + $0x288] sm:$0x3] %vm247_vm1, %v5726_v0 }
  0xae   : > { %503 = vst.msk [vmem:[#allocation3 + $0x328] sm:$0x3] %vm247_vm1, %v5726_v0 }
  0xaf   : > { %505 = vst.msk [vmem:[#allocation3 + $0x3c8] sm:$0x3] %vm247_vm1, %v5726_v0 }
  0xb0   : > { %507 = vst.msk [vmem:[#allocation3 + $0x468] sm:$0x3] %vm247_vm1, %v5726_v0 }
  0xb1   : > { %509 = vst.msk [vmem:[#allocation3 + $0x508] sm:$0x3] %vm247_vm1, %v5726_v0 }
  0xb2   : > { %512 = vst.msk [vmem:[#allocation3 + $0x138] sm:$0x3] %vm247_vm1, %v5726_v0 }
  0xb3   : > { %514 = vst.msk [vmem:[#allocation3 + $0x1d8] sm:$0x3] %vm247_vm1, %v5726_v0 }
  0xb4   : > { %516 = vst.msk [vmem:[#allocation3 + $0x278] sm:$0x3] %vm247_vm1, %v5726_v0 }
  0xb5   : > { %518 = vst.msk [vmem:[#allocation3 + $0x318] sm:$0x3] %vm247_vm1, %v5726_v0 }
  0xb6   : > { %520 = vst.msk [vmem:[#allocation3 + $0x3b8] sm:$0x3] %vm247_vm1, %v5726_v0 }
  0xb7   : > { %522 = vst.msk [vmem:[#allocation3 + $0x458] sm:$0x3] %vm247_vm1, %v5726_v0 }
  0xb8   : > { %524 = vst.msk [vmem:[#allocation3 + $0x4f8] sm:$0x3] %vm247_vm1, %v5726_v0 }
  0xb9   : > { %526 = vst.msk [vmem:[#allocation3 + $0x598] sm:$0x3] %vm247_vm1, %v5726_v0 }
  0xba   : > { %324 = vst.msk [vmem:[#allocation2 + $0xb0] sm:$0x1] %vm323_vm2, %v5726_v0 }
  0xbb   : > { %325 = vst.msk [vmem:[#allocation2 + $0xc0] sm:$0x1] %vm323_vm2, %v5726_v0 }
  0xbc   : > { %326 = vst.msk [vmem:[#allocation2 + $0xd0] sm:$0x1] %vm323_vm2, %v5726_v0 }
  0xbd   : > { %327 = vst.msk [vmem:[#allocation2 + $0xe0] sm:$0x1] %vm323_vm2, %v5726_v0 }
  0xbe   : > { %328 = vst.msk [vmem:[#allocation2 + $0xf0] sm:$0x1] %vm323_vm2, %v5726_v0 }
  0xbf   : > { %329 = vst.msk [vmem:[#allocation2 + $0x100] sm:$0x1] %vm323_vm2, %v5726_v0 }
  0xc0   : > { %330 = vst.msk [vmem:[#allocation2 + $0x110] sm:$0x1] %vm323_vm2, %v5726_v0 }
  0xc1   : > { %331 = vst.msk [vmem:[#allocation2 + $0x120] sm:$0x1] %vm323_vm2, %v5726_v0 }
  0xc2   : > { %332 = vst.msk [vmem:[#allocation2 + $0x150] sm:$0x1] %vm323_vm2, %v5726_v0 }
  0xc3   : > { %333 = vst.msk [vmem:[#allocation2 + $0x160] sm:$0x1] %vm323_vm2, %v5726_v0 }
  0xc4   : > { %334 = vst.msk [vmem:[#allocation2 + $0x170] sm:$0x1] %vm323_vm2, %v5726_v0 }
  0xc5   : > { %335 = vst.msk [vmem:[#allocation2 + $0x180] sm:$0x1] %vm323_vm2, %v5726_v0 }
  0xc6   : > { %336 = vst.msk [vmem:[#allocation2 + $0x190] sm:$0x1] %vm323_vm2, %v5726_v0 }
  0xc7   : > { %337 = vst.msk [vmem:[#allocation2 + $0x1a0] sm:$0x1] %vm323_vm2, %v5726_v0 }
  0xc8   : > { %338 = vst.msk [vmem:[#allocation2 + $0x1b0] sm:$0x1] %vm323_vm2, %v5726_v0 }
  0xc9   : > { %339 = vst.msk [vmem:[#allocation2 + $0x1c0] sm:$0x1] %vm323_vm2, %v5726_v0 }
  0xca   : > { %340 = vst.msk [vmem:[#allocation2 + $0x1f0] sm:$0x1] %vm323_vm2, %v5726_v0 }
  0xcb   : > { %341 = vst.msk [vmem:[#allocation2 + $0x200] sm:$0x1] %vm323_vm2, %v5726_v0 }
  0xcc   : > { %342 = vst.msk [vmem:[#allocation2 + $0x210] sm:$0x1] %vm323_vm2, %v5726_v0 }
  0xcd   : > { %343 = vst.msk [vmem:[#allocation2 + $0x220] sm:$0x1] %vm323_vm2, %v5726_v0 }
  0xce   : > { %344 = vst.msk [vmem:[#allocation2 + $0x230] sm:$0x1] %vm323_vm2, %v5726_v0 }
  0xcf   : > { %345 = vst.msk [vmem:[#allocation2 + $0x240] sm:$0x1] %vm323_vm2, %v5726_v0 }
  0xd0   : > { %346 = vst.msk [vmem:[#allocation2 + $0x250] sm:$0x1] %vm323_vm2, %v5726_v0 }
  0xd1   : > { %347 = vst.msk [vmem:[#allocation2 + $0x260] sm:$0x1] %vm323_vm2, %v5726_v0 }
  0xd2   : > { %348 = vst.msk [vmem:[#allocation2 + $0x290] sm:$0x1] %vm323_vm2, %v5726_v0 }
  0xd3   : > { %349 = vst.msk [vmem:[#allocation2 + $0x2a0] sm:$0x1] %vm323_vm2, %v5726_v0 }
  0xd4   : > { %350 = vst.msk [vmem:[#allocation2 + $0x2b0] sm:$0x1] %vm323_vm2, %v5726_v0 }
  0xd5   : > { %351 = vst.msk [vmem:[#allocation2 + $0x2c0] sm:$0x1] %vm323_vm2, %v5726_v0 }
  0xd6   : > { %352 = vst.msk [vmem:[#allocation2 + $0x2d0] sm:$0x1] %vm323_vm2, %v5726_v0 }
  0xd7   : > { %353 = vst.msk [vmem:[#allocation2 + $0x2e0] sm:$0x1] %vm323_vm2, %v5726_v0 }
  0xd8   : > { %354 = vst.msk [vmem:[#allocation2 + $0x2f0] sm:$0x1] %vm323_vm2, %v5726_v0 }
  0xd9   : > { %355 = vst.msk [vmem:[#allocation2 + $0x300] sm:$0x1] %vm323_vm2, %v5726_v0 }
  0xda   : > { %356 = vst.msk [vmem:[#allocation2 + $0x330] sm:$0x1] %vm323_vm2, %v5726_v0 }
  0xdb   : > { %357 = vst.msk [vmem:[#allocation2 + $0x340] sm:$0x1] %vm323_vm2, %v5726_v0 }
  0xdc   : > { %358 = vst.msk [vmem:[#allocation2 + $0x350] sm:$0x1] %vm323_vm2, %v5726_v0 }
  0xdd   : > { %359 = vst.msk [vmem:[#allocation2 + $0x360] sm:$0x1] %vm323_vm2, %v5726_v0 }
  0xde   : > { %360 = vst.msk [vmem:[#allocation2 + $0x370] sm:$0x1] %vm323_vm2, %v5726_v0 }
  0xdf   : > { %361 = vst.msk [vmem:[#allocation2 + $0x380] sm:$0x1] %vm323_vm2, %v5726_v0 }
  0xe0   : > { %362 = vst.msk [vmem:[#allocation2 + $0x390] sm:$0x1] %vm323_vm2, %v5726_v0 }
  0xe1   : > { %363 = vst.msk [vmem:[#allocation2 + $0x3a0] sm:$0x1] %vm323_vm2, %v5726_v0 }
  0xe2   : > { %364 = vst.msk [vmem:[#allocation2 + $0x3d0] sm:$0x1] %vm323_vm2, %v5726_v0 }
  0xe3   : > { %365 = vst.msk [vmem:[#allocation2 + $0x3e0] sm:$0x1] %vm323_vm2, %v5726_v0 }
  0xe4   : > { %366 = vst.msk [vmem:[#allocation2 + $0x3f0] sm:$0x1] %vm323_vm2, %v5726_v0 }
  0xe5   : > { %367 = vst.msk [vmem:[#allocation2 + $0x400] sm:$0x1] %vm323_vm2, %v5726_v0 }
  0xe6   : > { %368 = vst.msk [vmem:[#allocation2 + $0x410] sm:$0x1] %vm323_vm2, %v5726_v0 }
  0xe7   : > { %369 = vst.msk [vmem:[#allocation2 + $0x420] sm:$0x1] %vm323_vm2, %v5726_v0 }
  0xe8   : > { %370 = vst.msk [vmem:[#allocation2 + $0x430] sm:$0x1] %vm323_vm2, %v5726_v0 }
  0xe9   : > { %371 = vst.msk [vmem:[#allocation2 + $0x440] sm:$0x1] %vm323_vm2, %v5726_v0 }
  0xea   : > { %372 = vst.msk [vmem:[#allocation2 + $0x470] sm:$0x1] %vm323_vm2, %v5726_v0 }
  0xeb   : > { %373 = vst.msk [vmem:[#allocation2 + $0x480] sm:$0x1] %vm323_vm2, %v5726_v0 }
  0xec   : > { %374 = vst.msk [vmem:[#allocation2 + $0x490] sm:$0x1] %vm323_vm2, %v5726_v0 }
  0xed   : > { %375 = vst.msk [vmem:[#allocation2 + $0x4a0] sm:$0x1] %vm323_vm2, %v5726_v0 }
  0xee   : > { %376 = vst.msk [vmem:[#allocation2 + $0x4b0] sm:$0x1] %vm323_vm2, %v5726_v0 }
  0xef   : > { %377 = vst.msk [vmem:[#allocation2 + $0x4c0] sm:$0x1] %vm323_vm2, %v5726_v0 }
  0xf0   : > { %378 = vst.msk [vmem:[#allocation2 + $0x4d0] sm:$0x1] %vm323_vm2, %v5726_v0 }
  0xf1   : > { %379 = vst.msk [vmem:[#allocation2 + $0x4e0] sm:$0x1] %vm323_vm2, %v5726_v0 }
  0xf2   : > { %380 = vst.msk [vmem:[#allocation2 + $0x510] sm:$0x1] %vm323_vm2, %v5726_v0 }
  0xf3   : > { %381 = vst.msk [vmem:[#allocation2 + $0x520] sm:$0x1] %vm323_vm2, %v5726_v0 }
  0xf4   : > { %382 = vst.msk [vmem:[#allocation2 + $0x530] sm:$0x1] %vm323_vm2, %v5726_v0 }
  0xf5   : > { %383 = vst.msk [vmem:[#allocation2 + $0x540] sm:$0x1] %vm323_vm2, %v5726_v0 }
  0xf6   : > { %384 = vst.msk [vmem:[#allocation2 + $0x550] sm:$0x1] %vm323_vm2, %v5726_v0 }
  0xf7   : > { %385 = vst.msk [vmem:[#allocation2 + $0x560] sm:$0x1] %vm323_vm2, %v5726_v0 }
  0xf8   : > { %386 = vst.msk [vmem:[#allocation2 + $0x570] sm:$0x1] %vm323_vm2, %v5726_v0 }
  0xf9   : > { %387 = vst.msk [vmem:[#allocation2 + $0x580] sm:$0x1] %vm323_vm2, %v5726_v0 }
  0xfa   : > { %388 = vst.msk [vmem:[#allocation2 + $0xb9] sm:$0x1] %vm323_vm2, %v5726_v0 }
  0xfb   : > { %389 = vst.msk [vmem:[#allocation2 + $0xc9] sm:$0x1] %vm323_vm2, %v5726_v0 }
  0xfc   : > { %390 = vst.msk [vmem:[#allocation2 + $0xd9] sm:$0x1] %vm323_vm2, %v5726_v0 }
  0xfd   : > { %391 = vst.msk [vmem:[#allocation2 + $0xe9] sm:$0x1] %vm323_vm2, %v5726_v0 }
  0xfe   : > { %392 = vst.msk [vmem:[#allocation2 + $0xf9] sm:$0x1] %vm323_vm2, %v5726_v0 }
  0xff   : > { %393 = vst.msk [vmem:[#allocation2 + $0x109] sm:$0x1] %vm323_vm2, %v5726_v0 }
 0x100   : > { %394 = vst.msk [vmem:[#allocation2 + $0x119] sm:$0x1] %vm323_vm2, %v5726_v0 }
 0x101   : > { %395 = vst.msk [vmem:[#allocation2 + $0x129] sm:$0x1] %vm323_vm2, %v5726_v0 }
 0x102   : > { %396 = vst.msk [vmem:[#allocation2 + $0x159] sm:$0x1] %vm323_vm2, %v5726_v0 }
 0x103   : > { %397 = vst.msk [vmem:[#allocation2 + $0x169] sm:$0x1] %vm323_vm2, %v5726_v0 }
 0x104   : > { %398 = vst.msk [vmem:[#allocation2 + $0x179] sm:$0x1] %vm323_vm2, %v5726_v0 }
 0x105   : > { %399 = vst.msk [vmem:[#allocation2 + $0x189] sm:$0x1] %vm323_vm2, %v5726_v0 }
 0x106   : > { %400 = vst.msk [vmem:[#allocation2 + $0x199] sm:$0x1] %vm323_vm2, %v5726_v0 }
 0x107   : > { %401 = vst.msk [vmem:[#allocation2 + $0x1a9] sm:$0x1] %vm323_vm2, %v5726_v0 }
 0x108   : > { %402 = vst.msk [vmem:[#allocation2 + $0x1b9] sm:$0x1] %vm323_vm2, %v5726_v0 }
 0x109   : > { %403 = vst.msk [vmem:[#allocation2 + $0x1c9] sm:$0x1] %vm323_vm2, %v5726_v0 }
 0x10a   : > { %404 = vst.msk [vmem:[#allocation2 + $0x1f9] sm:$0x1] %vm323_vm2, %v5726_v0 }
 0x10b   : > { %405 = vst.msk [vmem:[#allocation2 + $0x209] sm:$0x1] %vm323_vm2, %v5726_v0 }
 0x10c   : > { %406 = vst.msk [vmem:[#allocation2 + $0x219] sm:$0x1] %vm323_vm2, %v5726_v0 }
 0x10d   : > { %407 = vst.msk [vmem:[#allocation2 + $0x229] sm:$0x1] %vm323_vm2, %v5726_v0 }
 0x10e   : > { %408 = vst.msk [vmem:[#allocation2 + $0x239] sm:$0x1] %vm323_vm2, %v5726_v0 }
 0x10f   : > { %409 = vst.msk [vmem:[#allocation2 + $0x249] sm:$0x1] %vm323_vm2, %v5726_v0 }
 0x110   : > { %410 = vst.msk [vmem:[#allocation2 + $0x259] sm:$0x1] %vm323_vm2, %v5726_v0 }
 0x111   : > { %411 = vst.msk [vmem:[#allocation2 + $0x269] sm:$0x1] %vm323_vm2, %v5726_v0 }
 0x112   : > { %412 = vst.msk [vmem:[#allocation2 + $0x299] sm:$0x1] %vm323_vm2, %v5726_v0 }
 0x113   : > { %413 = vst.msk [vmem:[#allocation2 + $0x2a9] sm:$0x1] %vm323_vm2, %v5726_v0 }
 0x114   : > { %414 = vst.msk [vmem:[#allocation2 + $0x2b9] sm:$0x1] %vm323_vm2, %v5726_v0 }
 0x115   : > { %415 = vst.msk [vmem:[#allocation2 + $0x2c9] sm:$0x1] %vm323_vm2, %v5726_v0 }
 0x116   : > { %416 = vst.msk [vmem:[#allocation2 + $0x2d9] sm:$0x1] %vm323_vm2, %v5726_v0 }
 0x117   : > { %417 = vst.msk [vmem:[#allocation2 + $0x2e9] sm:$0x1] %vm323_vm2, %v5726_v0 }
 0x118   : > { %418 = vst.msk [vmem:[#allocation2 + $0x2f9] sm:$0x1] %vm323_vm2, %v5726_v0 }
 0x119   : > { %419 = vst.msk [vmem:[#allocation2 + $0x309] sm:$0x1] %vm323_vm2, %v5726_v0 }
 0x11a   : > { %420 = vst.msk [vmem:[#allocation2 + $0x339] sm:$0x1] %vm323_vm2, %v5726_v0 }
 0x11b   : > { %421 = vst.msk [vmem:[#allocation2 + $0x349] sm:$0x1] %vm323_vm2, %v5726_v0 }
 0x11c   : > { %422 = vst.msk [vmem:[#allocation2 + $0x359] sm:$0x1] %vm323_vm2, %v5726_v0 }
 0x11d   : > { %423 = vst.msk [vmem:[#allocation2 + $0x369] sm:$0x1] %vm323_vm2, %v5726_v0 }
 0x11e   : > { %424 = vst.msk [vmem:[#allocation2 + $0x379] sm:$0x1] %vm323_vm2, %v5726_v0 }
 0x11f   : > { %425 = vst.msk [vmem:[#allocation2 + $0x389] sm:$0x1] %vm323_vm2, %v5726_v0 }
 0x120   : > { %426 = vst.msk [vmem:[#allocation2 + $0x399] sm:$0x1] %vm323_vm2, %v5726_v0 }
 0x121   : > { %427 = vst.msk [vmem:[#allocation2 + $0x3a9] sm:$0x1] %vm323_vm2, %v5726_v0 }
 0x122   : > { %428 = vst.msk [vmem:[#allocation2 + $0x3d9] sm:$0x1] %vm323_vm2, %v5726_v0 }
 0x123   : > { %429 = vst.msk [vmem:[#allocation2 + $0x3e9] sm:$0x1] %vm323_vm2, %v5726_v0 }
 0x124   : > { %430 = vst.msk [vmem:[#allocation2 + $0x3f9] sm:$0x1] %vm323_vm2, %v5726_v0 }
 0x125   : > { %431 = vst.msk [vmem:[#allocation2 + $0x409] sm:$0x1] %vm323_vm2, %v5726_v0 }
 0x126   : > { %432 = vst.msk [vmem:[#allocation2 + $0x419] sm:$0x1] %vm323_vm2, %v5726_v0 }
 0x127   : > { %433 = vst.msk [vmem:[#allocation2 + $0x429] sm:$0x1] %vm323_vm2, %v5726_v0 }
 0x128   : > { %434 = vst.msk [vmem:[#allocation2 + $0x439] sm:$0x1] %vm323_vm2, %v5726_v0 }
 0x129   : > { %435 = vst.msk [vmem:[#allocation2 + $0x449] sm:$0x1] %vm323_vm2, %v5726_v0 }
 0x12a   : > { %436 = vst.msk [vmem:[#allocation2 + $0x479] sm:$0x1] %vm323_vm2, %v5726_v0 }
 0x12b   : > { %437 = vst.msk [vmem:[#allocation2 + $0x489] sm:$0x1] %vm323_vm2, %v5726_v0 }
 0x12c   : > { %438 = vst.msk [vmem:[#allocation2 + $0x499] sm:$0x1] %vm323_vm2, %v5726_v0 }
 0x12d   : > { %439 = vst.msk [vmem:[#allocation2 + $0x4a9] sm:$0x1] %vm323_vm2, %v5726_v0 }
 0x12e   : > { %440 = vst.msk [vmem:[#allocation2 + $0x4b9] sm:$0x1] %vm323_vm2, %v5726_v0 }
 0x12f   : > { %441 = vst.msk [vmem:[#allocation2 + $0x4c9] sm:$0x1] %vm323_vm2, %v5726_v0 }
 0x130   : > { %442 = vst.msk [vmem:[#allocation2 + $0x4d9] sm:$0x1] %vm323_vm2, %v5726_v0 }
 0x131   : > { %443 = vst.msk [vmem:[#allocation2 + $0x4e9] sm:$0x1] %vm323_vm2, %v5726_v0 }
 0x132   : > { %444 = vst.msk [vmem:[#allocation2 + $0x519] sm:$0x1] %vm323_vm2, %v5726_v0 }
 0x133   : > { %445 = vst.msk [vmem:[#allocation2 + $0x529] sm:$0x1] %vm323_vm2, %v5726_v0 }
 0x134   : > { %446 = vst.msk [vmem:[#allocation2 + $0x539] sm:$0x1] %vm323_vm2, %v5726_v0 }
 0x135   : > { %447 = vst.msk [vmem:[#allocation2 + $0x549] sm:$0x1] %vm323_vm2, %v5726_v0 }
 0x136   : > { %448 = vst.msk [vmem:[#allocation2 + $0x559] sm:$0x1] %vm323_vm2, %v5726_v0 }
 0x137   : > { %449 = vst.msk [vmem:[#allocation2 + $0x569] sm:$0x1] %vm323_vm2, %v5726_v0 }
 0x138   : > { %450 = vst.msk [vmem:[#allocation2 + $0x579] sm:$0x1] %vm323_vm2, %v5726_v0 }
 0x139   : > { %451 = vst.msk [vmem:[#allocation2 + $0x589] sm:$0x1] %vm323_vm2, %v5726_v0 }
 0x13a   : > { %528 = vst.msk [vmem:[#allocation3 + $0xb0] sm:$0x1] %vm323_vm2, %v5726_v0 }
 0x13b   : > { %529 = vst.msk [vmem:[#allocation3 + $0xc0] sm:$0x1] %vm323_vm2, %v5726_v0 }
 0x13c   : > { %530 = vst.msk [vmem:[#allocation3 + $0xd0] sm:$0x1] %vm323_vm2, %v5726_v0 }
 0x13d   : > { %531 = vst.msk [vmem:[#allocation3 + $0xe0] sm:$0x1] %vm323_vm2, %v5726_v0 }
 0x13e   : > { %532 = vst.msk [vmem:[#allocation3 + $0xf0] sm:$0x1] %vm323_vm2, %v5726_v0 }
 0x13f   : > { %533 = vst.msk [vmem:[#allocation3 + $0x100] sm:$0x1] %vm323_vm2, %v5726_v0 }
 0x140   : > { %534 = vst.msk [vmem:[#allocation3 + $0x110] sm:$0x1] %vm323_vm2, %v5726_v0 }
 0x141   : > { %535 = vst.msk [vmem:[#allocation3 + $0x120] sm:$0x1] %vm323_vm2, %v5726_v0 }
 0x142   : > { %536 = vst.msk [vmem:[#allocation3 + $0x150] sm:$0x1] %vm323_vm2, %v5726_v0 }
 0x143   : > { %537 = vst.msk [vmem:[#allocation3 + $0x160] sm:$0x1] %vm323_vm2, %v5726_v0 }
 0x144   : > { %538 = vst.msk [vmem:[#allocation3 + $0x170] sm:$0x1] %vm323_vm2, %v5726_v0 }
 0x145   : > { %539 = vst.msk [vmem:[#allocation3 + $0x180] sm:$0x1] %vm323_vm2, %v5726_v0 }
 0x146   : > { %540 = vst.msk [vmem:[#allocation3 + $0x190] sm:$0x1] %vm323_vm2, %v5726_v0 }
 0x147   : > { %541 = vst.msk [vmem:[#allocation3 + $0x1a0] sm:$0x1] %vm323_vm2, %v5726_v0 }
 0x148   : > { %542 = vst.msk [vmem:[#allocation3 + $0x1b0] sm:$0x1] %vm323_vm2, %v5726_v0 }
 0x149   : > { %543 = vst.msk [vmem:[#allocation3 + $0x1c0] sm:$0x1] %vm323_vm2, %v5726_v0 }
 0x14a   : > { %544 = vst.msk [vmem:[#allocation3 + $0x1f0] sm:$0x1] %vm323_vm2, %v5726_v0 }
 0x14b   : > { %545 = vst.msk [vmem:[#allocation3 + $0x200] sm:$0x1] %vm323_vm2, %v5726_v0 }
 0x14c   : > { %546 = vst.msk [vmem:[#allocation3 + $0x210] sm:$0x1] %vm323_vm2, %v5726_v0 }
 0x14d   : > { %547 = vst.msk [vmem:[#allocation3 + $0x220] sm:$0x1] %vm323_vm2, %v5726_v0 }
 0x14e   : > { %548 = vst.msk [vmem:[#allocation3 + $0x230] sm:$0x1] %vm323_vm2, %v5726_v0 }
 0x14f   : > { %549 = vst.msk [vmem:[#allocation3 + $0x240] sm:$0x1] %vm323_vm2, %v5726_v0 }
 0x150   : > { %550 = vst.msk [vmem:[#allocation3 + $0x250] sm:$0x1] %vm323_vm2, %v5726_v0 }
 0x151   : > { %551 = vst.msk [vmem:[#allocation3 + $0x260] sm:$0x1] %vm323_vm2, %v5726_v0 }
 0x152   : > { %552 = vst.msk [vmem:[#allocation3 + $0x290] sm:$0x1] %vm323_vm2, %v5726_v0 }
 0x153   : > { %553 = vst.msk [vmem:[#allocation3 + $0x2a0] sm:$0x1] %vm323_vm2, %v5726_v0 }
 0x154   : > { %554 = vst.msk [vmem:[#allocation3 + $0x2b0] sm:$0x1] %vm323_vm2, %v5726_v0 }
 0x155   : > { %555 = vst.msk [vmem:[#allocation3 + $0x2c0] sm:$0x1] %vm323_vm2, %v5726_v0 }
 0x156   : > { %556 = vst.msk [vmem:[#allocation3 + $0x2d0] sm:$0x1] %vm323_vm2, %v5726_v0 }
 0x157   : > { %557 = vst.msk [vmem:[#allocation3 + $0x2e0] sm:$0x1] %vm323_vm2, %v5726_v0 }
 0x158   : > { %558 = vst.msk [vmem:[#allocation3 + $0x2f0] sm:$0x1] %vm323_vm2, %v5726_v0 }
 0x159   : > { %559 = vst.msk [vmem:[#allocation3 + $0x300] sm:$0x1] %vm323_vm2, %v5726_v0 }
 0x15a   : > { %560 = vst.msk [vmem:[#allocation3 + $0x330] sm:$0x1] %vm323_vm2, %v5726_v0 }
 0x15b   : > { %561 = vst.msk [vmem:[#allocation3 + $0x340] sm:$0x1] %vm323_vm2, %v5726_v0 }
 0x15c   : > { %562 = vst.msk [vmem:[#allocation3 + $0x350] sm:$0x1] %vm323_vm2, %v5726_v0 }
 0x15d   : > { %563 = vst.msk [vmem:[#allocation3 + $0x360] sm:$0x1] %vm323_vm2, %v5726_v0 }
 0x15e   : > { %564 = vst.msk [vmem:[#allocation3 + $0x370] sm:$0x1] %vm323_vm2, %v5726_v0 }
 0x15f   : > { %565 = vst.msk [vmem:[#allocation3 + $0x380] sm:$0x1] %vm323_vm2, %v5726_v0 }
 0x160   : > { %566 = vst.msk [vmem:[#allocation3 + $0x390] sm:$0x1] %vm323_vm2, %v5726_v0 }
 0x161   : > { %567 = vst.msk [vmem:[#allocation3 + $0x3a0] sm:$0x1] %vm323_vm2, %v5726_v0 }
 0x162   : > { %568 = vst.msk [vmem:[#allocation3 + $0x3d0] sm:$0x1] %vm323_vm2, %v5726_v0 }
 0x163   : > { %569 = vst.msk [vmem:[#allocation3 + $0x3e0] sm:$0x1] %vm323_vm2, %v5726_v0 }
 0x164   : > { %570 = vst.msk [vmem:[#allocation3 + $0x3f0] sm:$0x1] %vm323_vm2, %v5726_v0 }
 0x165   : > { %571 = vst.msk [vmem:[#allocation3 + $0x400] sm:$0x1] %vm323_vm2, %v5726_v0 }
 0x166   : > { %572 = vst.msk [vmem:[#allocation3 + $0x410] sm:$0x1] %vm323_vm2, %v5726_v0 }
 0x167   : > { %573 = vst.msk [vmem:[#allocation3 + $0x420] sm:$0x1] %vm323_vm2, %v5726_v0 }
 0x168   : > { %574 = vst.msk [vmem:[#allocation3 + $0x430] sm:$0x1] %vm323_vm2, %v5726_v0 }
 0x169   : > { %575 = vst.msk [vmem:[#allocation3 + $0x440] sm:$0x1] %vm323_vm2, %v5726_v0 }
 0x16a   : > { %576 = vst.msk [vmem:[#allocation3 + $0x470] sm:$0x1] %vm323_vm2, %v5726_v0 }
 0x16b   : > { %577 = vst.msk [vmem:[#allocation3 + $0x480] sm:$0x1] %vm323_vm2, %v5726_v0 }
 0x16c   : > { %578 = vst.msk [vmem:[#allocation3 + $0x490] sm:$0x1] %vm323_vm2, %v5726_v0 }
 0x16d   : > { %579 = vst.msk [vmem:[#allocation3 + $0x4a0] sm:$0x1] %vm323_vm2, %v5726_v0 }
 0x16e   : > { %580 = vst.msk [vmem:[#allocation3 + $0x4b0] sm:$0x1] %vm323_vm2, %v5726_v0 }
 0x16f   : > { %581 = vst.msk [vmem:[#allocation3 + $0x4c0] sm:$0x1] %vm323_vm2, %v5726_v0 }
 0x170   : > { %582 = vst.msk [vmem:[#allocation3 + $0x4d0] sm:$0x1] %vm323_vm2, %v5726_v0 }
 0x171   : > { %583 = vst.msk [vmem:[#allocation3 + $0x4e0] sm:$0x1] %vm323_vm2, %v5726_v0 }
 0x172   : > { %584 = vst.msk [vmem:[#allocation3 + $0x510] sm:$0x1] %vm323_vm2, %v5726_v0 }
 0x173   : > { %585 = vst.msk [vmem:[#allocation3 + $0x520] sm:$0x1] %vm323_vm2, %v5726_v0 }
 0x174   : > { %586 = vst.msk [vmem:[#allocation3 + $0x530] sm:$0x1] %vm323_vm2, %v5726_v0 }
 0x175   : > { %587 = vst.msk [vmem:[#allocation3 + $0x540] sm:$0x1] %vm323_vm2, %v5726_v0 }
 0x176   : > { %588 = vst.msk [vmem:[#allocation3 + $0x550] sm:$0x1] %vm323_vm2, %v5726_v0 }
 0x177   : > { %589 = vst.msk [vmem:[#allocation3 + $0x560] sm:$0x1] %vm323_vm2, %v5726_v0 }
 0x178   : > { %590 = vst.msk [vmem:[#allocation3 + $0x570] sm:$0x1] %vm323_vm2, %v5726_v0 }
 0x179   : > { %591 = vst.msk [vmem:[#allocation3 + $0x580] sm:$0x1] %vm323_vm2, %v5726_v0 }
 0x17a   : > { %592 = vst.msk [vmem:[#allocation3 + $0xb9] sm:$0x1] %vm323_vm2, %v5726_v0 }
 0x17b   : > { %593 = vst.msk [vmem:[#allocation3 + $0xc9] sm:$0x1] %vm323_vm2, %v5726_v0 }
 0x17c   : > { %594 = vst.msk [vmem:[#allocation3 + $0xd9] sm:$0x1] %vm323_vm2, %v5726_v0 }
 0x17d   : > { %595 = vst.msk [vmem:[#allocation3 + $0xe9] sm:$0x1] %vm323_vm2, %v5726_v0 }
 0x17e   : > { %596 = vst.msk [vmem:[#allocation3 + $0xf9] sm:$0x1] %vm323_vm2, %v5726_v0 }
 0x17f   : > { %597 = vst.msk [vmem:[#allocation3 + $0x109] sm:$0x1] %vm323_vm2, %v5726_v0 }
 0x180   : > { %598 = vst.msk [vmem:[#allocation3 + $0x119] sm:$0x1] %vm323_vm2, %v5726_v0 }
 0x181   : > { %599 = vst.msk [vmem:[#allocation3 + $0x129] sm:$0x1] %vm323_vm2, %v5726_v0 }
 0x182   : > { %600 = vst.msk [vmem:[#allocation3 + $0x159] sm:$0x1] %vm323_vm2, %v5726_v0 }
 0x183   : > { %601 = vst.msk [vmem:[#allocation3 + $0x169] sm:$0x1] %vm323_vm2, %v5726_v0 }
 0x184   : > { %602 = vst.msk [vmem:[#allocation3 + $0x179] sm:$0x1] %vm323_vm2, %v5726_v0 }
 0x185   : > { %603 = vst.msk [vmem:[#allocation3 + $0x189] sm:$0x1] %vm323_vm2, %v5726_v0 }
 0x186   : > { %604 = vst.msk [vmem:[#allocation3 + $0x199] sm:$0x1] %vm323_vm2, %v5726_v0 }
 0x187   : > { %605 = vst.msk [vmem:[#allocation3 + $0x1a9] sm:$0x1] %vm323_vm2, %v5726_v0 }
 0x188   : > { %606 = vst.msk [vmem:[#allocation3 + $0x1b9] sm:$0x1] %vm323_vm2, %v5726_v0 }
 0x189   : > { %607 = vst.msk [vmem:[#allocation3 + $0x1c9] sm:$0x1] %vm323_vm2, %v5726_v0 }
 0x18a   : > { %608 = vst.msk [vmem:[#allocation3 + $0x1f9] sm:$0x1] %vm323_vm2, %v5726_v0 }
 0x18b   : > { %609 = vst.msk [vmem:[#allocation3 + $0x209] sm:$0x1] %vm323_vm2, %v5726_v0 }
 0x18c   : > { %610 = vst.msk [vmem:[#allocation3 + $0x219] sm:$0x1] %vm323_vm2, %v5726_v0 }
 0x18d   : > { %611 = vst.msk [vmem:[#allocation3 + $0x229] sm:$0x1] %vm323_vm2, %v5726_v0 }
 0x18e   : > { %612 = vst.msk [vmem:[#allocation3 + $0x239] sm:$0x1] %vm323_vm2, %v5726_v0 }
 0x18f   : > { %613 = vst.msk [vmem:[#allocation3 + $0x249] sm:$0x1] %vm323_vm2, %v5726_v0 }
 0x190   : > { %614 = vst.msk [vmem:[#allocation3 + $0x259] sm:$0x1] %vm323_vm2, %v5726_v0 }
 0x191   : > { %615 = vst.msk [vmem:[#allocation3 + $0x269] sm:$0x1] %vm323_vm2, %v5726_v0 }
 0x192   : > { %616 = vst.msk [vmem:[#allocation3 + $0x299] sm:$0x1] %vm323_vm2, %v5726_v0 }
 0x193   : > { %617 = vst.msk [vmem:[#allocation3 + $0x2a9] sm:$0x1] %vm323_vm2, %v5726_v0 }
 0x194   : > { %618 = vst.msk [vmem:[#allocation3 + $0x2b9] sm:$0x1] %vm323_vm2, %v5726_v0 }
 0x195   : > { %619 = vst.msk [vmem:[#allocation3 + $0x2c9] sm:$0x1] %vm323_vm2, %v5726_v0 }
 0x196   : > { %620 = vst.msk [vmem:[#allocation3 + $0x2d9] sm:$0x1] %vm323_vm2, %v5726_v0 }
 0x197   : > { %621 = vst.msk [vmem:[#allocation3 + $0x2e9] sm:$0x1] %vm323_vm2, %v5726_v0 }
 0x198   : > { %622 = vst.msk [vmem:[#allocation3 + $0x2f9] sm:$0x1] %vm323_vm2, %v5726_v0 }
 0x199   : > { %623 = vst.msk [vmem:[#allocation3 + $0x309] sm:$0x1] %vm323_vm2, %v5726_v0 }
 0x19a   : > { %624 = vst.msk [vmem:[#allocation3 + $0x339] sm:$0x1] %vm323_vm2, %v5726_v0 }
 0x19b   : > { %625 = vst.msk [vmem:[#allocation3 + $0x349] sm:$0x1] %vm323_vm2, %v5726_v0 }
 0x19c   : > { %626 = vst.msk [vmem:[#allocation3 + $0x359] sm:$0x1] %vm323_vm2, %v5726_v0 }
 0x19d   : > { %627 = vst.msk [vmem:[#allocation3 + $0x369] sm:$0x1] %vm323_vm2, %v5726_v0 }
 0x19e   : > { %628 = vst.msk [vmem:[#allocation3 + $0x379] sm:$0x1] %vm323_vm2, %v5726_v0 }
 0x19f   : > { %629 = vst.msk [vmem:[#allocation3 + $0x389] sm:$0x1] %vm323_vm2, %v5726_v0 }
 0x1a0   : > { %630 = vst.msk [vmem:[#allocation3 + $0x399] sm:$0x1] %vm323_vm2, %v5726_v0 }
 0x1a1   : > { %631 = vst.msk [vmem:[#allocation3 + $0x3a9] sm:$0x1] %vm323_vm2, %v5726_v0 }
 0x1a2   : > { %632 = vst.msk [vmem:[#allocation3 + $0x3d9] sm:$0x1] %vm323_vm2, %v5726_v0 }
 0x1a3   : > { %633 = vst.msk [vmem:[#allocation3 + $0x3e9] sm:$0x1] %vm323_vm2, %v5726_v0 }
 0x1a4   : > { %634 = vst.msk [vmem:[#allocation3 + $0x3f9] sm:$0x1] %vm323_vm2, %v5726_v0 }
 0x1a5   : > { %635 = vst.msk [vmem:[#allocation3 + $0x409] sm:$0x1] %vm323_vm2, %v5726_v0 }
 0x1a6   : > { %636 = vst.msk [vmem:[#allocation3 + $0x419] sm:$0x1] %vm323_vm2, %v5726_v0 }
 0x1a7   : > { %637 = vst.msk [vmem:[#allocation3 + $0x429] sm:$0x1] %vm323_vm2, %v5726_v0 }
 0x1a8   : > { %638 = vst.msk [vmem:[#allocation3 + $0x439] sm:$0x1] %vm323_vm2, %v5726_v0 }
 0x1a9   : > { %639 = vst.msk [vmem:[#allocation3 + $0x449] sm:$0x1] %vm323_vm2, %v5726_v0 }
 0x1aa   : > { %640 = vst.msk [vmem:[#allocation3 + $0x479] sm:$0x1] %vm323_vm2, %v5726_v0 }
 0x1ab   : > { %641 = vst.msk [vmem:[#allocation3 + $0x489] sm:$0x1] %vm323_vm2, %v5726_v0 }
 0x1ac   : > { %642 = vst.msk [vmem:[#allocation3 + $0x499] sm:$0x1] %vm323_vm2, %v5726_v0 }
 0x1ad   : > { %643 = vst.msk [vmem:[#allocation3 + $0x4a9] sm:$0x1] %vm323_vm2, %v5726_v0 }
 0x1ae   : > { %644 = vst.msk [vmem:[#allocation3 + $0x4b9] sm:$0x1] %vm323_vm2, %v5726_v0 }
 0x1af   : > { %645 = vst.msk [vmem:[#allocation3 + $0x4c9] sm:$0x1] %vm323_vm2, %v5726_v0 }
 0x1b0   : > { %646 = vst.msk [vmem:[#allocation3 + $0x4d9] sm:$0x1] %vm323_vm2, %v5726_v0 }
 0x1b1   : > { %647 = vst.msk [vmem:[#allocation3 + $0x4e9] sm:$0x1] %vm323_vm2, %v5726_v0 }
 0x1b2   : > { %648 = vst.msk [vmem:[#allocation3 + $0x519] sm:$0x1] %vm323_vm2, %v5726_v0 }
 0x1b3   : > { %649 = vst.msk [vmem:[#allocation3 + $0x529] sm:$0x1] %vm323_vm2, %v5726_v0 }
 0x1b4   : > { %650 = vst.msk [vmem:[#allocation3 + $0x539] sm:$0x1] %vm323_vm2, %v5726_v0 }
 0x1b5   : > { %651 = vst.msk [vmem:[#allocation3 + $0x549] sm:$0x1] %vm323_vm2, %v5726_v0 }
 0x1b6   : > { %652 = vst.msk [vmem:[#allocation3 + $0x559] sm:$0x1] %vm323_vm2, %v5726_v0 }
 0x1b7   : > { %653 = vst.msk [vmem:[#allocation3 + $0x569] sm:$0x1] %vm323_vm2, %v5726_v0 }
 0x1b8   : > { %654 = vst.msk [vmem:[#allocation3 + $0x579] sm:$0x1] %vm323_vm2, %v5726_v0 }
 0x1b9   : > { %655 = vst.msk [vmem:[#allocation3 + $0x589] sm:$0x1] %vm323_vm2, %v5726_v0  ;;  %v717_v0 = vld [vmem:[%s5855_s25 + $0x1e8] sm:$0xff] }
 0x1ba   : > { %720 = vst.msk [vmem:[#allocation2 + $0xb1] sm:$0xff] %vm245_vm0, %v656_v3  ;;  %v718_v3 = vld [vmem:[%s5855_s25 + $0x1f0] sm:$0xff] }
 0x1bb   : > { %721 = vst.msk [vmem:[#allocation2 + $0xc1] sm:$0xff] %vm245_vm0, %v657_v4  ;;  %v719_v4 = vld [vmem:[%s5855_s25 + $0x1f8] sm:$0xff] }
 0x1bc   : > { %722 = vst.msk [vmem:[#allocation2 + $0xd1] sm:$0xff] %vm245_vm0, %v658_v5 }
 0x1bd   : > { %723 = vst.msk [vmem:[#allocation2 + $0xe1] sm:$0xff] %vm245_vm0, %v659_v6 }
 0x1be   : > { %724 = vst.msk [vmem:[#allocation2 + $0xf1] sm:$0xff] %vm245_vm0, %v660_v7 }
 0x1bf   : > { %725 = vst.msk [vmem:[#allocation2 + $0x101] sm:$0xff] %vm245_vm0, %v661_v8 }
 0x1c0   : > { %726 = vst.msk [vmem:[#allocation2 + $0x111] sm:$0xff] %vm245_vm0, %v662_v9 }
 0x1c1   : > { %727 = vst.msk [vmem:[#allocation2 + $0x121] sm:$0xff] %vm245_vm0, %v663_v10 }
 0x1c2   : > { %728 = vst.msk [vmem:[#allocation2 + $0x151] sm:$0xff] %vm245_vm0, %v664_v11 }
 0x1c3   : > { %729 = vst.msk [vmem:[#allocation2 + $0x161] sm:$0xff] %vm245_vm0, %v665_v12 }
 0x1c4   : > { %730 = vst.msk [vmem:[#allocation2 + $0x171] sm:$0xff] %vm245_vm0, %v666_v13 }
 0x1c5   : > { %731 = vst.msk [vmem:[#allocation2 + $0x181] sm:$0xff] %vm245_vm0, %v667_v14 }
 0x1c6   : > { %732 = vst.msk [vmem:[#allocation2 + $0x191] sm:$0xff] %vm245_vm0, %v668_v15 }
 0x1c7   : > { %733 = vst.msk [vmem:[#allocation2 + $0x1a1] sm:$0xff] %vm245_vm0, %v669_v16 }
 0x1c8   : > { %734 = vst.msk [vmem:[#allocation2 + $0x1b1] sm:$0xff] %vm245_vm0, %v670_v17 }
 0x1c9   : > { %735 = vst.msk [vmem:[#allocation2 + $0x1c1] sm:$0xff] %vm245_vm0, %v671_v18 }
 0x1ca   : > { %736 = vst.msk [vmem:[#allocation2 + $0x1f1] sm:$0xff] %vm245_vm0, %v672_v19 }
 0x1cb   : > { %737 = vst.msk [vmem:[#allocation2 + $0x201] sm:$0xff] %vm245_vm0, %v673_v20 }
 0x1cc   : > { %738 = vst.msk [vmem:[#allocation2 + $0x211] sm:$0xff] %vm245_vm0, %v674_v21 }
 0x1cd   : > { %739 = vst.msk [vmem:[#allocation2 + $0x221] sm:$0xff] %vm245_vm0, %v675_v22 }
 0x1ce   : > { %740 = vst.msk [vmem:[#allocation2 + $0x231] sm:$0xff] %vm245_vm0, %v676_v23 }
 0x1cf   : > { %741 = vst.msk [vmem:[#allocation2 + $0x241] sm:$0xff] %vm245_vm0, %v677_v24 }
 0x1d0   : > { %742 = vst.msk [vmem:[#allocation2 + $0x251] sm:$0xff] %vm245_vm0, %v678_v25 }
 0x1d1   : > { %743 = vst.msk [vmem:[#allocation2 + $0x261] sm:$0xff] %vm245_vm0, %v679_v26 }
 0x1d2   : > { %744 = vst.msk [vmem:[#allocation2 + $0x291] sm:$0xff] %vm245_vm0, %v680_v27 }
 0x1d3   : > { %745 = vst.msk [vmem:[#allocation2 + $0x2a1] sm:$0xff] %vm245_vm0, %v681_v28 }
 0x1d4   : > { %746 = vst.msk [vmem:[#allocation2 + $0x2b1] sm:$0xff] %vm245_vm0, %v682_v29 }
 0x1d5   : > { %747 = vst.msk [vmem:[#allocation2 + $0x2c1] sm:$0xff] %vm245_vm0, %v683_v30 }
 0x1d6   : > { %748 = vst.msk [vmem:[#allocation2 + $0x2d1] sm:$0xff] %vm245_vm0, %v684_v31 }
 0x1d7   : > { %749 = vst.msk [vmem:[#allocation2 + $0x2e1] sm:$0xff] %vm245_vm0, %v685_v32 }
 0x1d8   : > { %750 = vst.msk [vmem:[#allocation2 + $0x2f1] sm:$0xff] %vm245_vm0, %v686_v33 }
 0x1d9   : > { %751 = vst.msk [vmem:[#allocation2 + $0x301] sm:$0xff] %vm245_vm0, %v687_v34 }
 0x1da   : > { %752 = vst.msk [vmem:[#allocation2 + $0x331] sm:$0xff] %vm245_vm0, %v688_v35 }
 0x1db   : > { %753 = vst.msk [vmem:[#allocation2 + $0x341] sm:$0xff] %vm245_vm0, %v689_v36 }
 0x1dc   : > { %754 = vst.msk [vmem:[#allocation2 + $0x351] sm:$0xff] %vm245_vm0, %v690_v37 }
 0x1dd   : > { %755 = vst.msk [vmem:[#allocation2 + $0x361] sm:$0xff] %vm245_vm0, %v691_v38 }
 0x1de   : > { %756 = vst.msk [vmem:[#allocation2 + $0x371] sm:$0xff] %vm245_vm0, %v692_v39 }
 0x1df   : > { %757 = vst.msk [vmem:[#allocation2 + $0x381] sm:$0xff] %vm245_vm0, %v693_v40 }
 0x1e0   : > { %758 = vst.msk [vmem:[#allocation2 + $0x391] sm:$0xff] %vm245_vm0, %v694_v41 }
 0x1e1   : > { %759 = vst.msk [vmem:[#allocation2 + $0x3a1] sm:$0xff] %vm245_vm0, %v695_v42 }
 0x1e2   : > { %760 = vst.msk [vmem:[#allocation2 + $0x3d1] sm:$0xff] %vm245_vm0, %v696_v43 }
 0x1e3   : > { %761 = vst.msk [vmem:[#allocation2 + $0x3e1] sm:$0xff] %vm245_vm0, %v697_v44 }
 0x1e4   : > { %762 = vst.msk [vmem:[#allocation2 + $0x3f1] sm:$0xff] %vm245_vm0, %v698_v45 }
 0x1e5   : > { %763 = vst.msk [vmem:[#allocation2 + $0x401] sm:$0xff] %vm245_vm0, %v699_v46 }
 0x1e6   : > { %764 = vst.msk [vmem:[#allocation2 + $0x411] sm:$0xff] %vm245_vm0, %v700_v47 }
 0x1e7   : > { %765 = vst.msk [vmem:[#allocation2 + $0x421] sm:$0xff] %vm245_vm0, %v701_v48 }
 0x1e8   : > { %766 = vst.msk [vmem:[#allocation2 + $0x431] sm:$0xff] %vm245_vm0, %v702_v49 }
 0x1e9   : > { %767 = vst.msk [vmem:[#allocation2 + $0x441] sm:$0xff] %vm245_vm0, %v703_v50 }
 0x1ea   : > { %768 = vst.msk [vmem:[#allocation2 + $0x471] sm:$0xff] %vm245_vm0, %v704_v51 }
 0x1eb   : > { %769 = vst.msk [vmem:[#allocation2 + $0x481] sm:$0xff] %vm245_vm0, %v705_v52 }
 0x1ec   : > { %770 = vst.msk [vmem:[#allocation2 + $0x491] sm:$0xff] %vm245_vm0, %v706_v53 }
 0x1ed   : > { %771 = vst.msk [vmem:[#allocation2 + $0x4a1] sm:$0xff] %vm245_vm0, %v707_v54 }
 0x1ee   : > { %772 = vst.msk [vmem:[#allocation2 + $0x4b1] sm:$0xff] %vm245_vm0, %v708_v55 }
 0x1ef   : > { %773 = vst.msk [vmem:[#allocation2 + $0x4c1] sm:$0xff] %vm245_vm0, %v709_v56 }
 0x1f0   : > { %774 = vst.msk [vmem:[#allocation2 + $0x4d1] sm:$0xff] %vm245_vm0, %v710_v57 }
 0x1f1   : > { %775 = vst.msk [vmem:[#allocation2 + $0x4e1] sm:$0xff] %vm245_vm0, %v711_v58 }
 0x1f2   : > { %776 = vst.msk [vmem:[#allocation2 + $0x511] sm:$0xff] %vm245_vm0, %v712_v59 }
 0x1f3   : > { %777 = vst.msk [vmem:[#allocation2 + $0x521] sm:$0xff] %vm245_vm0, %v713_v60 }
 0x1f4   : > { %778 = vst.msk [vmem:[#allocation2 + $0x531] sm:$0xff] %vm245_vm0, %v714_v61 }
 0x1f5   : > { %779 = vst.msk [vmem:[#allocation2 + $0x541] sm:$0xff] %vm245_vm0, %v715_v62 }
 0x1f6   : > { %780 = vst.msk [vmem:[#allocation2 + $0x551] sm:$0xff] %vm245_vm0, %v716_v63 }
 0x1f7   : > { %781 = vst.msk [vmem:[#allocation2 + $0x561] sm:$0xff] %vm245_vm0, %v717_v0 }
 0x1f8   : > { %782 = vst.msk [vmem:[#allocation2 + $0x571] sm:$0xff] %vm245_vm0, %v718_v3 }
 0x1f9   : > { %783 = vst.msk [vmem:[#allocation2 + $0x581] sm:$0xff] %vm245_vm0, %v719_v4 }
 0x1fa LB: >> { %s792_s8 = smul.u32 160, %s5718_s26  ;;  %vm826_vm3 = vcmask 1046528   ;;  %s5727_s9 = smov 8   ;;  %vm875_vm4 = vcmask 1045504   ;;  %vm932_vm5 = vcmask 130048   ;;  %vm1094_vm6 = vcmask 195584   ;;  %s5718_s26 = sphi %s6803_s26, %s791_s26  }
 0x1fb   : >> { %s5728_s10 = smov 16   ;;  %s791_s26 = sadd.s32 1, %s5718_s26  }
 0x1fc   : >> { %s6811_s28 = scalar_lea.vmem [#allocation2], %s792_s8  ;;  %p788_p6 = scmp.ge.s32.totalorder %s791_s26, 8  }
 0x200   : >> { %v6814_v5 = vld [vmem:[%s6811_s28 + $0x40] sm:$0xff]  ;;  %v6817_v6 = vld [vmem:[%s6811_s28 + $0x48] sm:$0x3]  ;;  %v6836_v16 = vld [vmem:[%s6811_s28 + $0x50] sm:$0xff] }
 0x201   : >> { %v6820_v7 = vld [vmem:[%s6811_s28 + $0x20] sm:$0xff]  ;;  %v6823_v8 = vrot.slane %v6814_v5, 1  ;;  %v840_v9 = vrot.slane %v6817_v6, 1  ;;  %v799_v10 = vld [vmem:[%s6811_s28 + $0x28] sm:$0x3]  ;;  %v6842_v20 = vld [vmem:[%s6811_s28 + $0x30] sm:$0xff] }
 0x202   : >> { %v6828_v11 = vrot.slane %v6820_v7, 1  ;;  %v6831_v12 = vld [vmem:[%s6811_s28] sm:$0xff]  ;;  %v834_v13 = vrot.slane %v799_v10, 1  ;;  %v795_v14 = vld [vmem:[%s6811_s28 + $0x8] sm:$0x3]  ;;  %v6849_v23 = vld [vmem:[%s6811_s28 + $0x10] sm:$0xff] }
 0x203   : >> { %v827_v15 = vrot.slane %v6831_v12, 1  ;;  %v841_v17 = vsel %vm826_vm3, %v6823_v8, %v840_v9  ;;  %v828_v18 = vrot.slane %v795_v14, 1  ;;  %v805_v19 = vld [vmem:[%s6811_s28 + $0x58] sm:$0x3]  ;;  %v6855_v26 = vrot.slane %v6836_v16, 1  ;;  %v6868_v35 = vld [vmem:[%s6811_s28 + $0x70] sm:$0xff] }
 0x204   : >> { %v801_v21 = vld [vmem:[%s6811_s28 + $0x38] sm:$0x3]  ;;  %859 = vrot.lane.b32.xlu2 %v841_v17, %s5727_s9  ;;  %v835_v22 = vsel %vm826_vm3, %v6828_v11, %v834_v13  ;;  %v843_v27 = vrot.slane %v805_v19, 1  ;;  %v6859_v28 = vrot.slane %v6842_v20, 1  ;;  %v830_v30 = vrot.slane %v6849_v23, 1  ;;  %v6873_v37 = vld [vmem:[%s6811_s28 + $0x60] sm:$0xff] }
 0x205   : >> { %v797_v24 = vld [vmem:[%s6811_s28 + $0x18] sm:$0x3]  ;;  %855 = vrot.lane.b32.xlu1 %v835_v22, %s5727_s9  ;;  %v829_v25 = vsel %vm826_vm3, %v827_v15, %v828_v18  ;;  %v837_v29 = vrot.slane %v801_v21, 1  ;;  %v807_v38 = vld [vmem:[%s6811_s28 + $0x68] sm:$0x3]  ;;  %v876_v39 = vrot.slane %v6831_v12, 2 }
 0x206   : >> { %851 = vrot.lane.b32.xlu0 %v829_v25, %s5727_s9  ;;  %v831_v31 = vrot.slane %v797_v24, 1  ;;  %v844_v32 = vsel %vm826_vm3, %v6855_v26, %v843_v27  ;;  %v809_v36 = vld [vmem:[%s6811_s28 + $0x78] sm:$0x3]  ;;  %v877_v40 = vrot.slane %v795_v14, 2  ;;  %v6880_v41 = vrot.slane %v6868_v35, 1 }
 0x207   : >> { %v838_v33 = vsel %vm826_vm3, %v6859_v28, %v837_v29  ;;  %v849_v42 = vrot.slane %v809_v36, 1  ;;  %v6883_v43 = vrot.slane %v6873_v37, 1  ;;  %v846_v44 = vrot.slane %v807_v38, 1  ;;  %v5034_v3 = vld [vmem:[%s6811_s28 + $0x28] sm:$0x3] }
 0x208   : >> { %v832_v34 = vsel %vm826_vm3, %v830_v30, %v831_v31  ;;  %v878_v45 = vsel %vm875_vm4, %v876_v39, %v877_v40  ;;  %v6893_v48 = vrot.slane %v6842_v20, 2  ;;  %v886_v49 = vrot.slane %v801_v21, 2  ;;  %v5032_v9 = vld [vmem:[%s6811_s28 + $0x18] sm:$0x3]  ;;  %v5038_v21 = vld [vmem:[%s6811_s28 + $0x48] sm:$0x3] }
 0x209   : >> { %v850_v46 = vsel %vm826_vm3, %v6880_v41, %v849_v42  ;;  %v847_v47 = vsel %vm826_vm3, %v6883_v43, %v846_v44  ;;  %v6897_v50 = vrot.slane %v6820_v7, 2  ;;  %v883_v51 = vrot.slane %v799_v10, 2  ;;  %v5040_v18 = vld [vmem:[%s6811_s28 + $0x58] sm:$0x3]  ;;  %v6950_v31 = vld [vmem:[%s6811_s28 + $0x80] sm:$0xff] }
 0x20a   : >> { %v879_v52 = vrot.slane %v6849_v23, 2  ;;  %v880_v53 = vrot.slane %v797_v24, 2  ;;  %v887_v54 = vsel %vm875_vm4, %v6893_v48, %v886_v49  ;;  %v6910_v57 = vrot.slane %v6873_v37, 2  ;;  %v5036_v22 = vld [vmem:[%s6811_s28 + $0x38] sm:$0x3] }
 0x20b   : >> { %v884_v55 = vsel %vm875_vm4, %v6897_v50, %v883_v51  ;;  %v895_v58 = vrot.slane %v807_v38, 2  ;;  %v6914_v59 = vrot.slane %v6836_v16, 2  ;;  %v892_v60 = vrot.slane %v805_v19, 2 }
 0x20c   : >> { %861 = vrot.lane.b32.xlu2 %v844_v32, %s5727_s9  ;;  %v881_v56 = vsel %vm875_vm4, %v879_v52, %v880_v53  ;;  %v6917_v61 = vrot.slane %v6814_v5, 2  ;;  %v889_v62 = vrot.slane %v6817_v6, 2  ;;  %v982_v10 = vrot.slane %v5034_v3, 1  ;;  %v5046_v32 = vld [vmem:[%s6811_s28 + $0x88] sm:$0x3] }
 0x20d   : >> { %857 = vrot.lane.b32.xlu1 %v838_v33, %s5727_s9  ;;  %v896_v63 = vsel %vm875_vm4, %v6910_v57, %v895_v58  ;;  %v893_v0 = vsel %vm875_vm4, %v6914_v59, %v892_v60  ;;  %v979_v6 = vrot.slane %v5032_v9, 1  ;;  %v6932_v13 = vrot.slane %v6868_v35, 2 }
 0x20e   : >> { %853 = vrot.lane.b32.xlu0 %v832_v34, %s5727_s9  ;;  %v890_v4 = vsel %vm875_vm4, %v6917_v61, %v889_v62  ;;  %v898_v14 = vrot.slane %v809_v36, 2  ;;  %v983_v15 = vsel %vm826_vm3, %v6828_v11, %v982_v10  ;;  %v991_v24 = vrot.slane %v5040_v18, 1  ;;  %v5044_v34 = vld [vmem:[%s6811_s28 + $0x78] sm:$0x3]  ;;  %v5042_v36 = vld [vmem:[%s6811_s28 + $0x68] sm:$0x3] }
 0x20f   : >> { %v980_v17 = vsel %vm826_vm3, %v830_v30, %v979_v6  ;;  %v988_v25 = vrot.slane %v5038_v21, 1  ;;  %v985_v27 = vrot.slane %v5036_v22, 1  ;;  %v999_v38 = vrot.slane %v6950_v31, 1 }
 0x210   : >> { %v899_v19 = vsel %vm875_vm4, %v6932_v13, %v898_v14  ;;  %v992_v29 = vsel %vm826_vm3, %v6855_v26, %v991_v24  ;;  %v1000_v39 = vrot.slane %v5046_v32, 1  ;;  %v997_v40 = vrot.slane %v5044_v34, 1 }
 0x211   : >> { %v989_v30 = vsel %vm826_vm3, %v6823_v8, %v988_v25  ;;  %v986_v33 = vsel %vm826_vm3, %v6859_v28, %v985_v27  ;;  %v994_v42 = vrot.slane %v5042_v36, 1  ;;  %v1030_v49 = vrot.slane %v5034_v3, 2  ;;  %v7008_v27 = vld [vmem:[%s6811_s28 + $0x88] sm:$0x3] }
 0x212   : >> { %v1001_v44 = vsel %vm826_vm3, %v999_v38, %v1000_v39  ;;  %v1027_v51 = vrot.slane %v5032_v9, 2  ;;  %v1039_v58 = vrot.slane %v5040_v18, 2  ;;  %v1036_v60 = vrot.slane %v5038_v21, 2  ;;  %v5071_v18 = vld [vmem:[%s6811_s28 + $0x48] sm:$0x3] }
 0x213   : >> { %v1048_v9 = vrot.slane %v5046_v32, 2  ;;  %v1045_v10 = vrot.slane %v5044_v34, 2  ;;  %v5075_v32 = vld [vmem:[%s6811_s28 + $0x68] sm:$0x3] }
 0x214   : >> { %900 = vrot.lane.b32.xlu2 %v878_v45, %s5728_s10  ;;  %v998_v45 = vsel %vm826_vm3, %v6880_v41, %v997_v40  ;;  %v1272_v34 = vrot.slane %v5075_v32, 1  ;;  %v7030_v40 = vld [vmem:[%s6811_s28 + $0x90] sm:$0xff] }
 0x215   : >> { %865 = vrot.lane.b32.xlu1 %v850_v46, %s5727_s9  ;;  %v995_v46 = vsel %vm826_vm3, %v6883_v43, %v994_v42  ;;  %v7033_v42 = vld [vmem:[%s6811_s28 + $0x98] sm:$0x3] }
 0x216   : >> { %863 = vrot.lane.b32.xlu0 %v847_v47, %s5727_s9  ;;  %v1033_v47 = vrot.slane %v5036_v22, 2  ;;  %v1273_v39 = vsel %vm826_vm3, %v6883_v43, %v1272_v34 }
 0x218   : >> { %v1034_v53 = vsel %vm875_vm4, %v6893_v48, %v1033_v47 }
 0x21c   : >> { %906 = vrot.lane.b32.xlu2 %v887_v54, %s5728_s10  ;;  %v1031_v54 = vsel %vm875_vm4, %v6897_v50, %v1030_v49  ;;  %v7046_v49 = vld [vmem:[%s6811_s28 + $0xa0] sm:$0xff] }
 0x21d   : >> { %904 = vrot.lane.b32.xlu1 %v884_v55, %s5728_s10  ;;  %v1028_v55 = vsel %vm875_vm4, %v879_v52, %v1027_v51  ;;  %v1037_v52 = vsel %vm875_vm4, %v6917_v61, %v1036_v60  ;;  %v5094_v51 = vld [vmem:[%s6811_s28 + $0xa8] sm:$0x3] }
 0x21e   : >> { %902 = vrot.lane.b32.xlu0 %v881_v56, %s5728_s10  ;;  %v1042_v56 = vrot.slane %v5042_v36, 2 }
 0x220   : >> { %v1043_v62 = vsel %vm875_vm4, %v6910_v57, %v1042_v56 }
 0x224   : >> { %912 = vrot.lane.b32.xlu2 %v896_v63, %s5728_s10  ;;  %v1040_v63 = vsel %vm875_vm4, %v6914_v59, %v1039_v58  ;;  %v1314_v58 = vrot.slane %v5071_v18, 2 }
 0x225   : >> { %910 = vrot.lane.b32.xlu1 %v893_v0, %s5728_s10  ;;  %v5067_v0 = vld [vmem:[%s6811_s28 + $0x28] sm:$0x3] }
 0x226   : >> { %908 = vrot.lane.b32.xlu0 %v890_v4, %s5728_s10  ;;  %v1260_v3 = vrot.slane %v5067_v0, 1  ;;  %v1047_v4 = vrot.slane %v6950_v31, 2 }
 0x228   : >> { %v1261_v6 = vsel %vm826_vm3, %v6828_v11, %v1260_v3  ;;  %v1049_v14 = vsel %vm875_vm4, %v1047_v4, %v1048_v9  ;;  %v1266_v11 = vrot.slane %v5071_v18, 1 }
 0x22a   : >> { %v1267_v25 = vsel %vm826_vm3, %v6823_v8, %v1266_v11 }
 0x22c   : >> { %1004 = vrot.lane.b32.xlu2 %v983_v15, %s5727_s9  ;;  %v5073_v15 = vld [vmem:[%s6811_s28 + $0x58] sm:$0x3] }
 0x22d   : >> { %1002 = vrot.lane.b32.xlu1 %v980_v17, %s5727_s9  ;;  %v1046_v17 = vsel %vm875_vm4, %v6932_v13, %v1045_v10  ;;  %v1269_v21 = vrot.slane %v5073_v15, 1  ;;  %v1320_v10 = vrot.slane %v5075_v32, 2 }
 0x22e   : >> { %914 = vrot.lane.b32.xlu0 %v899_v19, %s5728_s10  ;;  %v5069_v19 = vld [vmem:[%s6811_s28 + $0x38] sm:$0x3] }
 0x22f   : >> { %v1263_v22 = vrot.slane %v5069_v19, 1  ;;  %v1270_v24 = vsel %vm826_vm3, %v6855_v26, %v1269_v21  ;;  %v5121_v21 = vld [vmem:[%s6811_s28 + $0xb8] sm:$0x3] }
 0x230   : >> { %v1707_v32 = vrot.slane %v5121_v21, 1 }
 0x234   : >> { %1010 = vrot.lane.b32.xlu2 %v992_v29, %s5727_s9  ;;  %v1264_v29 = vsel %vm826_vm3, %v6859_v28, %v1263_v22 }
 0x235   : >> { %1008 = vrot.lane.b32.xlu1 %v989_v30, %s5727_s9  ;;  %v7013_v30 = vld [vmem:[%s6811_s28 + $0x78] sm:$0x3] }
 0x236   : >> { %1006 = vrot.lane.b32.xlu0 %v986_v33, %s5727_s9  ;;  %v1278_v33 = vrot.slane %v7008_v27, 1  ;;  %v1275_v8 = vrot.slane %v7013_v30, 1 }
 0x238   : >> { %v1279_v36 = vsel %vm826_vm3, %v999_v38, %v1278_v33  ;;  %v1276_v28 = vsel %vm826_vm3, %v6880_v41, %v1275_v8  ;;  %v1308_v38 = vrot.slane %v5067_v0, 2  ;;  %v1281_v41 = vrot.slane %v7033_v42, 1  ;;  %v5049_v8 = vld [vmem:[%s9449_s1 + $0x28] sm:$0xff] }
 0x239   : >> { %v1315_v0 = vsel %vm875_vm4, %v6917_v61, %v1314_v58  ;;  %5495 = vmatpush.msra.mxu1 %v5049_v8  ;;  %1132 = vmatpush.msra.mxu0 %v5049_v8 }
 0x23a   : >> { %v1309_v47 = vsel %vm875_vm4, %v6897_v50, %v1308_v38  ;;  %5496 = vmatpush.msra.mxu2 %v5049_v8  ;;  %5497 = vmatpush.msra.mxu3 %v5049_v8 }
 0x23c   : >> { %1016 = vrot.lane.b32.xlu2 %v1001_v44, %s5727_s9  ;;  %v1311_v44 = vrot.slane %v5069_v19, 2  ;;  %v1321_v19 = vsel %vm875_vm4, %v6910_v57, %v1320_v10  ;;  %v5100_v10 = vld [vmem:[%s6811_s28 + $0xd8] sm:$0x3] }
 0x23d   : >> { %1014 = vrot.lane.b32.xlu1 %v998_v45, %s5727_s9 }
 0x23e   : >> { %1012 = vrot.lane.b32.xlu0 %v995_v46, %s5727_s9  ;;  %v1280_v46 = vrot.slane %v7030_v40, 1  ;;  %v1312_v43 = vsel %vm875_vm4, %v6893_v48, %v1311_v44  ;;  %v1317_v48 = vrot.slane %v5073_v15, 2  ;;  %v5098_v44 = vld [vmem:[%s6811_s28 + $0xc8] sm:$0x3] }
 0x240   : >> { %v1318_v50 = vsel %vm875_vm4, %v6914_v59, %v1317_v48  ;;  %v1531_v59 = vrot.slane %v7046_v49, 2 }
 0x244   : >> { %1054 = vrot.lane.b32.xlu2 %v1034_v53, %s5728_s10  ;;  %v1282_v53 = vsel %vm826_vm3, %v1280_v46, %v1281_v41  ;;  %v5123_v46 = vld [vmem:[%s6811_s28 + $0xc8] sm:$0x3] }
 0x245   : >> { %1052 = vrot.lane.b32.xlu1 %v1031_v54, %s5728_s10  ;;  %v1483_v54 = vrot.slane %v7046_v49, 1 }
 0x246   : >> { %1050 = vrot.lane.b32.xlu0 %v1028_v55, %s5728_s10  ;;  %v1484_v55 = vrot.slane %v5094_v51, 1 }
 0x248   : >> { %v1485_v60 = vsel %vm826_vm3, %v1483_v54, %v1484_v55  ;;  %v5048_v54 = vld [vmem:[%s9449_s1 + $0x20] sm:$0xff] }
 0x249   : >> { %5498 = vmatpush.msra.mxu1 %v5048_v54  ;;  %1133 = vmatpush.msra.mxu0 %v5048_v54 }
 0x24a   : >> { %5499 = vmatpush.msra.mxu2 %v5048_v54  ;;  %5500 = vmatpush.msra.mxu3 %v5048_v54 }
 0x24c   : >> { %1060 = vrot.lane.b32.xlu2 %v1043_v62, %s5728_s10  ;;  %v7058_v62 = vld [vmem:[%s6811_s28 + $0xb0] sm:$0xff] }
 0x24d   : >> { %1058 = vrot.lane.b32.xlu1 %v1040_v63, %s5728_s10  ;;  %v5096_v63 = vld [vmem:[%s6811_s28 + $0xb8] sm:$0x3]  ;;  %v1534_v22 = vrot.slane %v7058_v62, 2 }
 0x24e   : >> { %1056 = vrot.lane.b32.xlu0 %v1037_v52, %s5728_s10  ;;  %v1486_v52 = vrot.slane %v7058_v62, 1  ;;  %v1487_v3 = vrot.slane %v5096_v63, 1 }
 0x250   : >> { %v1708_v38 = vsel %vm826_vm3, %v1486_v52, %v1707_v32  ;;  %v7159_v32 = vld [vmem:[%s6811_s28 + $0xe0] sm:$0xff] }
 0x254   : >> { %1283 = vrot.lane.b32.xlu2 %v1261_v6, %s5727_s9 }
 0x255   : >> { %1064 = vrot.lane.b32.xlu1 %v1049_v14, %s5728_s10  ;;  %v1532_v14 = vrot.slane %v5094_v51, 2 }
 0x256   : >> { %1062 = vrot.lane.b32.xlu0 %v1046_v17, %s5728_s10  ;;  %v1488_v17 = vsel %vm826_vm3, %v1486_v52, %v1487_v3  ;;  %v5125_v52 = vld [vmem:[%s6811_s28 + $0xd8] sm:$0x3] }
 0x257   : >> { %v1533_v11 = vsel %vm875_vm4, %v1531_v59, %v1532_v14  ;;  %v1713_v14 = vrot.slane %v5125_v52, 1 }
 0x25c   : >> { %1289 = vrot.lane.b32.xlu2 %v1270_v24, %s5727_s9 }
 0x25d   : >> { %1287 = vrot.lane.b32.xlu1 %v1267_v25, %s5727_s9  ;;  %v1535_v25 = vrot.slane %v5096_v63, 2 }
 0x25e   : >> { %1285 = vrot.lane.b32.xlu0 %v1264_v29, %s5727_s9  ;;  %v7020_v26 = vpop.permute.xlu2 %859 }
 0x264   : >> { %1295 = vrot.lane.b32.xlu2 %v1279_v36, %s5727_s9 }
 0x265   : >> { %1293 = vrot.lane.b32.xlu1 %v1276_v28, %s5727_s9  ;;  %v1536_v28 = vsel %vm875_vm4, %v1534_v22, %v1535_v25 }
 0x266   : >> { %1291 = vrot.lane.b32.xlu0 %v1273_v39, %s5727_s9  ;;  %v7037_v45 = vpop.permute.xlu2 %861  ;;  %v7095_v39 = vld [vmem:[%s6811_s28 + $0xc0] sm:$0xff] }
 0x267   : >> { %v7103_v41 = vrot.slane %v7095_v39, 2  ;;  %v7109_v51 = vrot.slane %v7095_v39, 1 }
 0x26c   : >> { %1333 = vrot.lane.b32.xlu2 %v1312_v43, %s5728_s10  ;;  %v1538_v43 = vrot.slane %v5098_v44, 2 }
 0x26d   : >> { %1331 = vrot.lane.b32.xlu1 %v1309_v47, %s5728_s10 }
 0x26e   : >> { %1297 = vrot.lane.b32.xlu0 %v1282_v53, %s5727_s9  ;;  %v901_v56 = vpop.permute.xlu2 %900  ;;  %v1710_v53 = vrot.slane %v5123_v46, 1 }
 0x270   : >> { %v1711_v63 = vsel %vm826_vm3, %v7109_v51, %v1710_v53  ;;  %v928_v53 = vsel %vm245_vm0, %v6814_v5, %v7020_v26  ;;  %v7197_v26 = vrot.slane %v7159_v32, 2 }
 0x274   : >> { %1507 = vrot.lane.b32.xlu2 %v1485_v60, %s5727_s9  ;;  %v1539_v60 = vsel %vm875_vm4, %v7103_v41, %v1538_v43  ;;  %v1541_v43 = vrot.slane %v5100_v10, 2 }
 0x275   : >> { %1337 = vrot.lane.b32.xlu1 %v1318_v50, %s5728_s10  ;;  %v5047_v50 = vld [vmem:[%s9449_s1 + $0x18] sm:$0xff] }
 0x276   : >> { %1335 = vrot.lane.b32.xlu0 %v1315_v0, %s5728_s10  ;;  %v907_v9 = vpop.permute.xlu2 %906  ;;  %v7126_v0 = vld [vmem:[%s6811_s28 + $0xd0] sm:$0xff]  ;;  %5501 = vmatpush.msra.mxu1 %v5047_v50 }
 0x277   : >> { %v7067_v6 = vpop.permute.xlu1 %855  ;;  %1134 = vmatpush.msra.mxu0 %v5047_v50  ;;  %5502 = vmatpush.msra.mxu2 %v5047_v50  ;;  %v7138_v59 = vrot.slane %v7126_v0, 1 }
 0x278   : >> { %v852_v15 = vpop.permute.xlu0 %851  ;;  %5503 = vmatpush.msra.mxu3 %v5047_v50 }
 0x279   : >> { %v924_v61 = vsel %vm245_vm0, %v6831_v12, %v852_v15  ;;  %v1755_v12 = vrot.slane %v5121_v21, 2  ;;  %v1758_v21 = vrot.slane %v5123_v46, 2 }
 0x27a   : >> { %v7074_v18 = vsel %vm932_vm5, %v924_v61, %v901_v56  ;;  %v1490_v56 = vrot.slane %v5098_v44, 1  ;;  %v1493_v61 = vrot.slane %v5100_v10, 1  ;;  %v1761_v44 = vrot.slane %v5125_v52, 2 }
 0x27b   : >> { %v1756_v34 = vsel %vm875_vm4, %v1534_v22, %v1755_v12 }
 0x27c   : >> { %1509 = vrot.lane.b32.xlu2 %v1488_v17, %s5727_s9  ;;  %v926_v17 = vsel %vm245_vm0, %v6820_v7, %v7067_v6  ;;  %v5102_v6 = vld [vmem:[%s6811_s28 + $0xe8] sm:$0x3] }
 0x27d   : >> { %1339 = vrot.lane.b32.xlu1 %v1321_v19, %s5728_s10  ;;  %v1496_v8 = vrot.slane %v5102_v6, 1 }
 0x27e   : >> { %1555 = vrot.lane.b32.xlu0 %v1533_v11, %s5728_s10  ;;  %v913_v24 = vpop.permute.xlu2 %912 }
 0x27f   : >> { %v858_v29 = vpop.permute.xlu1 %857 }
 0x280   : >> { %v927_v57 = vsel %vm245_vm0, %v6842_v20, %v858_v29  ;;  %v854_v33 = vpop.permute.xlu0 %853  ;;  %v1494_v29 = vsel %vm826_vm3, %v7138_v59, %v1493_v61 }
 0x281   : >> { %v7091_v36 = vsel %vm932_vm5, %v927_v57, %v907_v9  ;;  %v1491_v9 = vsel %vm826_vm3, %v7109_v51, %v1490_v56  ;;  %v925_v11 = vsel %vm245_vm0, %v6849_v23, %v854_v33  ;;  %v1759_v57 = vsel %vm875_vm4, %v7103_v41, %v1758_v21 }
 0x282   : >> { %v7167_v33 = vrot.slane %v7159_v32, 1 }
 0x284   : >> { %1778 = vrot.lane.b32.xlu2 %v1756_v34, %s5728_s10 }
 0x285   : >> { %1557 = vrot.lane.b32.xlu1 %v1536_v28, %s5728_s10  ;;  %v7173_v28 = vrot.slane %v7126_v0, 2 }
 0x286   : >> { %1730 = vrot.lane.b32.xlu0 %v1708_v38, %s5727_s9  ;;  %v7106_v47 = vpop.permute.xlu2 %1004  ;;  %v929_v38 = vsel %vm245_vm0, %v6836_v16, %v7037_v45  ;;  %v5127_v45 = vld [vmem:[%s6811_s28 + $0xe8] sm:$0x3] }
 0x287   : >> { %v7114_v55 = vpop.permute.xlu1 %865  ;;  %v1542_v50 = vsel %vm875_vm4, %v7173_v28, %v1541_v43 }
 0x288   : >> { %v864_v48 = vpop.permute.xlu0 %863  ;;  %v931_v61 = vsel %vm245_vm0, %v6868_v35, %v7114_v55 }
 0x289   : >> { %v930_v58 = vsel %vm245_vm0, %v6873_v37, %v864_v48  ;;  %v1497_v48 = vsel %vm826_vm3, %v7167_v33, %v1496_v8 }
 0x28a   : >> { %v7130_v3 = vsel %vm932_vm5, %v930_v58, %v913_v24  ;;  %v1714_v24 = vsel %vm826_vm3, %v7138_v59, %v1713_v14  ;;  %v1716_v14 = vrot.slane %v5127_v45, 1 }
 0x28c   : >> { %1559 = vrot.lane.b32.xlu2 %v1539_v60, %s5728_s10  ;;  %v1762_v60 = vsel %vm875_vm4, %v7173_v28, %v1761_v44  ;;  %v1717_v55 = vsel %vm826_vm3, %v7167_v33, %v1716_v14 }
 0x28d   : >> { %1732 = vrot.lane.b32.xlu1 %v1711_v63, %s5727_s9  ;;  %v1764_v63 = vrot.slane %v5127_v45, 2 }
 0x28e   : >> { %1511 = vrot.lane.b32.xlu0 %v1491_v9, %s5727_s9  ;;  %v7141_v15 = vpop.permute.xlu2 %1010  ;;  %v1544_v9 = vrot.slane %v5102_v6, 2  ;;  %v5104_v6 = vld [vmem:[%s6811_s28 + $0xf8] sm:$0x3] }
 0x28f   : >> { %v905_v19 = vpop.permute.xlu1 %904 }
 0x290   : >> { %v903_v22 = vpop.permute.xlu0 %902  ;;  %v7149_v12 = vsel %vm932_vm5, %v926_v17, %v905_v19  ;;  %v1765_v19 = vsel %vm875_vm4, %v7197_v26, %v1764_v63 }
 0x291   : >> { %v7154_v25 = vsel %vm932_vm5, %v925_v11, %v903_v22  ;;  %v1545_v11 = vsel %vm875_vm4, %v7197_v26, %v1544_v9  ;;  %v7211_v22 = vld [vmem:[%s6811_s28 + $0xf0] sm:$0xff]  ;;  %v1326_v9 = vrot.slane %v7008_v27, 2 }
 0x292   : >> { %v7254_v14 = vrot.slane %v7211_v22, 2 }
 0x294   : >> { %1734 = vrot.lane.b32.xlu2 %v1714_v24, %s5727_s9  ;;  %v5129_v24 = vld [vmem:[%s6811_s28 + $0xf8] sm:$0x3] }
 0x295   : >> { %1513 = vrot.lane.b32.xlu1 %v1494_v29, %s5727_s9  ;;  %v943_v29 = vld [vmem:[%s9449_s1 + $0x10] sm:$0xff]  ;;  %v1719_v8 = vrot.slane %v5129_v24, 1 }
 0x296   : >> { %1780 = vrot.lane.b32.xlu0 %v1759_v57, %s5728_s10  ;;  %v7170_v34 = vpop.permute.xlu2 %1016  ;;  %1197 = vmatpush.msrb.mxu1 %v943_v29  ;;  %v7223_v57 = vrot.slane %v7211_v22, 1 }
 0x297   : >> { %v911_v46 = vpop.permute.xlu1 %910 }
 0x298   : >> { %v909_v54 = vpop.permute.xlu0 %908  ;;  %v7182_v56 = vsel %vm932_vm5, %v929_v38, %v911_v46  ;;  %v1499_v38 = vrot.slane %v5104_v6, 1  ;;  %v942_v46 = vld [vmem:[%s9449_s1 + $0x8] sm:$0xff]  ;;  %v1720_v45 = vsel %vm826_vm3, %v7223_v57, %v1719_v8 }
 0x299   : >> { %v7187_v58 = vsel %vm932_vm5, %v928_v53, %v909_v54  ;;  %v1323_v53 = vrot.slane %v7013_v30, 2  ;;  %1198 = vmatpush.msrb.mxu1 %v942_v46  ;;  %v5131_v8 = vld [vmem:[%s6811_s28 + $0x108] sm:$0x3] }
 0x29a   : >> { %v1500_v63 = vsel %vm826_vm3, %v7223_v57, %v1499_v38  ;;  %v1722_v46 = vrot.slane %v5131_v8, 1 }
 0x29b   : >> { %v1324_v30 = vsel %vm875_vm4, %v6932_v13, %v1323_v53  ;;  %v1327_v13 = vsel %vm875_vm4, %v1047_v4, %v1326_v9  ;;  %v5084_v9 = vld [vmem:[%s9449_s1 + $0x40] sm:$0xff] }
 0x29c   : >> { %1515 = vrot.lane.b32.xlu2 %v1497_v48, %s5727_s9  ;;  %v941_v48 = vld [vmem:[%s9449_s1] sm:$0xff]  ;;  %1412 = vmatpush.msrb.mxu2 %v5084_v9 }
 0x29d   : >> { %1782 = vrot.lane.b32.xlu1 %v1762_v60, %s5728_s10  ;;  %1199 = vmatpush.msrb.mxu1 %v941_v48 }
 0x29e   : >> { %1561 = vrot.lane.b32.xlu0 %v1542_v50, %s5728_s10  ;;  %v1055_v52 = vpop.permute.xlu2 %1054 }
 0x29f   : >> { %v1003_v10 = vpop.permute.xlu1 %1002 }
 0x2a0   : >> { %v915_v17 = vpop.permute.xlu0 %914 }
 0x2a1   : >> { %v7206_v21 = vsel %vm932_vm5, %v931_v61, %v915_v17  ;;  %v1767_v61 = vrot.slane %v5129_v24, 2  ;;  %v5106_v24 = vld [vmem:[%s6811_s28 + $0x108] sm:$0x3] }
 0x2a3   : >> { %v1768_v29 = vsel %vm875_vm4, %v7254_v14, %v1767_v61 }
 0x2a4   : >> { %1784 = vrot.lane.b32.xlu2 %v1765_v19, %s5728_s10  ;;  %v1547_v19 = vrot.slane %v5104_v6, 2  ;;  %v1550_v6 = vrot.slane %v5106_v24, 2 }
 0x2a5   : >> { %1563 = vrot.lane.b32.xlu1 %v1545_v11, %s5728_s10 }
 0x2a6   : >> { %1736 = vrot.lane.b32.xlu0 %v1717_v55, %s5727_s9  ;;  %v7226_v44 = vpop.permute.xlu2 %1060  ;;  %v1548_v27 = vsel %vm875_vm4, %v7254_v14, %v1547_v19  ;;  %v7266_v55 = vld [vmem:[%s6811_s28 + $0x100] sm:$0xff] }
 0x2a7   : >> { %v7231_v43 = vpop.permute.xlu1 %1008  ;;  %v7276_v4 = vrot.slane %v7266_v55, 1  ;;  %v7279_v48 = vrot.slane %v7266_v55, 2 }
 0x2a8   : >> { %v1007_v54 = vpop.permute.xlu0 %1006 }
 0x2a9   : >> { %v1076_v60 = vsel %vm245_vm0, %v6842_v20, %v1007_v54  ;;  %v1502_v54 = vrot.slane %v5106_v24, 1  ;;  %v5083_v24 = vld [vmem:[%s9449_s1 + $0x38] sm:$0xff] }
 0x2aa   : >> { %v1084_v50 = vsel %vm932_vm5, %v1076_v60, %v1055_v52  ;;  %v1074_v60 = vsel %vm245_vm0, %v6849_v23, %v1003_v10  ;;  %v7295_v23 = vld [vmem:[%s6811_s28 + $0x110] sm:$0xff]  ;;  %v5108_v10 = vld [vmem:[%s6811_s28 + $0x118] sm:$0x3]  ;;  %1413 = vmatpush.msrb.mxu2 %v5083_v24 }
 0x2ab   : >> { %5052 = vmatmul.msk.f32.vlgmr.msra.gmra.mxu1 %vm1094_vm6, %v1084_v50  ;;  %v1503_v61 = vsel %vm826_vm3, %v7276_v4, %v1502_v54  ;;  %v1505_v19 = vrot.slane %v5108_v10, 1  ;;  %v1770_v54 = vrot.slane %v5131_v8, 2 }
 0x2ac   : >> { %1738 = vrot.lane.b32.xlu2 %v1720_v45, %s5727_s9 }
 0x2ad   : >> { %1517 = vrot.lane.b32.xlu1 %v1500_v63, %s5727_s9  ;;  %v1551_v63 = vsel %vm875_vm4, %v7279_v48, %v1550_v6  ;;  %v1078_v6 = vsel %vm245_vm0, %v6836_v16, %v7141_v15  ;;  %v5082_v16 = vld [vmem:[%s9449_s1 + $0x30] sm:$0xff] }
 0x2ae   : >> { %1341 = vrot.lane.b32.xlu0 %v1324_v30, %s5728_s10  ;;  %v7251_v52 = vpop.permute.xlu2 %1283  ;;  %v1723_v30 = vsel %vm826_vm3, %v7276_v4, %v1722_v46  ;;  %1414 = vmatpush.msrb.mxu2 %v5082_v16 }
 0x2af   : >> { %v7256_v17 = vpop.permute.xlu1 %1014 }
 0x2b0   : >> { %v1013_v11 = vpop.permute.xlu0 %1012 }
 0x2b4   : >> { %1343 = vrot.lane.b32.xlu2 %v1327_v13, %s5728_s10 }
 0x2b5   : >> { %1786 = vrot.lane.b32.xlu1 %v1768_v29, %s5728_s10  ;;  %v1328_v29 = vrot.slane %v7030_v40, 2  ;;  %v1075_v40 = vsel %vm245_vm0, %v6820_v7, %v7106_v47 }
 0x2b6   : >> { %1565 = vrot.lane.b32.xlu0 %v1548_v27, %s5728_s10  ;;  %v7273_v38 = vpop.permute.xlu2 %1289  ;;  %v1329_v27 = vrot.slane %v7033_v42, 2  ;;  %v1077_v42 = vsel %vm245_vm0, %v6814_v5, %v7231_v43  ;;  %v1771_v43 = vsel %vm875_vm4, %v7279_v48, %v1770_v54  ;;  %v5175_v54 = vld [vmem:[%s6811_s28 + $0x148] sm:$0x3] }
 0x2b7   : >> { %v1053_v53 = vpop.permute.xlu1 %1052 }
 0x2b8   : >> { %v1051_v45 = vpop.permute.xlu0 %1050  ;;  %v1083_v15 = vsel %vm932_vm5, %v1075_v40, %v1053_v53  ;;  %v1330_v5 = vsel %vm875_vm4, %v1328_v29, %v1329_v27  ;;  %v1079_v53 = vsel %vm245_vm0, %v6873_v37, %v1013_v11  ;;  %v1080_v37 = vsel %vm245_vm0, %v6868_v35, %v7256_v17  ;;  %v5111_v35 = vld [vmem:[%s9449_s1 + $0x58] sm:$0xff]  ;;  %v7365_v17 = vld [vmem:[%s6811_s28 + $0x140] sm:$0xff] }
 0x2b9   : >> { %v1082_v50 = vsel %vm932_vm5, %v1074_v60, %v1051_v45  ;;  %v7312_v60 = vrot.slane %v7295_v23, 1  ;;  %v1087_v24 = vsel %vm932_vm5, %v1079_v53, %v7226_v44  ;;  %1636 = vmatpush.msrb.mxu3 %v5111_v35  ;;  %v7369_v40 = vld [vmem:[%s6811_s28 + $0x120] sm:$0xff]  ;;  %v2201_v16 = vrot.slane %v7365_v17, 2 }
 0x2ba   : >> { %5050 = vmatmul.msk.f32.vlgmr.msra.gmra.mxu0 %vm1094_vm6, %v1082_v50 }
 0x2bb   : >> { %v1506_v47 = vsel %vm826_vm3, %v7312_v60, %v1505_v19  ;;  %v1553_v19 = vrot.slane %v5108_v10, 2 }
 0x2bc   : >> { %1567 = vrot.lane.b32.xlu2 %v1551_v63, %s5728_s10  ;;  %v5133_v63 = vld [vmem:[%s6811_s28 + $0x118] sm:$0x3] }
 0x2bd   : >> { %1740 = vrot.lane.b32.xlu1 %v1723_v30, %s5727_s9  ;;  %v1773_v30 = vrot.slane %v5133_v63, 2  ;;  %v1725_v27 = vrot.slane %v5133_v63, 1  ;;  %v1081_v63 = vsel %vm245_vm0, %v6950_v31, %v7170_v34  ;;  %v5138_v31 = vld [vmem:[%s9449_s1 + $0x70] sm:$0xff] }
 0x2be   : >> { %1519 = vrot.lane.b32.xlu0 %v1503_v61, %s5727_s9  ;;  %v7301_v13 = vpop.permute.xlu2 %1295  ;;  %v7343_v61 = vrot.slane %v7295_v23, 2  ;;  %1859 = vmatpush.msrb.mxu0 %v5138_v31 }
 0x2bf   : >> { %v1059_v46 = vpop.permute.xlu1 %1058  ;;  %v1726_v44 = vsel %vm826_vm3, %v7312_v60, %v1725_v27 }
 0x2c0   : >> { %v1057_v45 = vpop.permute.xlu0 %1056  ;;  %v1086_v50 = vsel %vm932_vm5, %v1078_v6, %v1059_v46  ;;  %v1774_v46 = vsel %vm875_vm4, %v7343_v61, %v1773_v30  ;;  %v1554_v10 = vsel %vm875_vm4, %v7343_v61, %v1553_v19  ;;  %v5109_v30 = vld [vmem:[%s9449_s1 + $0x48] sm:$0xff] }
 0x2c1   : >> { %v1085_v8 = vsel %vm932_vm5, %v1077_v42, %v1057_v45  ;;  %5054 = vmatmul.msk.f32.vlgmr.msra.gmra.mxu2 %vm1094_vm6, %v1086_v50  ;;  %v5135_v42 = vld [vmem:[%s6811_s28 + $0x128] sm:$0x3] }
 0x2c2   : >> { %5051 = vmatmul.msk.f32.gmra.mxu0 %vm1094_vm6, %v1083_v15  ;;  %5053 = vmatmul.msk.f32.gmra.mxu1 %vm1094_vm6, %v1085_v8  ;;  %v1728_v45 = vrot.slane %v5135_v42, 1  ;;  %v2202_v15 = vrot.slane %v5175_v54, 2  ;;  %v5110_v8 = vld [vmem:[%s9449_s1 + $0x50] sm:$0xff] }
 0x2c3   : >> { %1637 = vmatpush.msrb.mxu3 %v5110_v8 }
 0x2c4   : >> { %1521 = vrot.lane.b32.xlu2 %v1506_v47, %s5727_s9 }
 0x2c5   : >> { %1345 = vrot.lane.b32.xlu1 %v1330_v5, %s5728_s10  ;;  %v2153_v5 = vrot.slane %v7365_v17, 1  ;;  %1638 = vmatpush.msrb.mxu3 %v5109_v30 }
 0x2c6   : >> { %1788 = vrot.lane.b32.xlu0 %v1771_v43, %s5728_s10  ;;  %v7340_v9 = vpop.permute.xlu2 %1333  ;;  %v2154_v43 = vrot.slane %v5175_v54, 1 }
 0x2c7   : >> { %v1065_v29 = vpop.permute.xlu1 %1064 }
 0x2c8   : >> { %v1063_v11 = vpop.permute.xlu0 %1062  ;;  %v1089_v19 = vsel %vm932_vm5, %v1081_v63, %v1065_v29  ;;  %v2155_v34 = vsel %vm826_vm3, %v2153_v5, %v2154_v43  ;;  %v7404_v29 = vld [vmem:[%s6811_s28 + $0x150] sm:$0xff]  ;;  %v5148_v43 = vld [vmem:[%s6811_s28 + $0xc8] sm:$0x3]  ;;  %v5177_v63 = vld [vmem:[%s6811_s28 + $0x158] sm:$0x3] }
 0x2c9   : >> { %5055 = vmatmul.msk.f32.gmra.mxu2 %vm1094_vm6, %v1087_v24  ;;  %v1088_v6 = vsel %vm932_vm5, %v1080_v37, %v1063_v11  ;;  %v2203_v37 = vsel %vm875_vm4, %v2201_v16, %v2202_v15  ;;  %v5202_v11 = vld [vmem:[%s6811_s28 + $0x158] sm:$0x3]  ;;  %v2157_v30 = vrot.slane %v5177_v63, 1  ;;  %v1930_v31 = vrot.slane %v5148_v43, 1 }
 0x2ca   : >> { %5056 = vmatmul.msk.f32.vlgmr.msra.gmra.mxu3 %vm1094_vm6, %v1088_v6  ;;  %5058 = vmatmul.msk.f32.vlgmr.msrb.gmra.mxu1 %vm1094_vm6, %v7074_v18  ;;  %v1727_v18 = vrot.slane %v7369_v40, 1  ;;  %v2425_v24 = vrot.slane %v5202_v11, 2  ;;  %v1775_v6 = vrot.slane %v7369_v40, 2  ;;  %v2377_v54 = vrot.slane %v5202_v11, 1 }
 0x2cc   : >> { %1790 = vrot.lane.b32.xlu2 %v1774_v46, %s5728_s10  ;;  %v1729_v27 = vsel %vm826_vm3, %v1727_v18, %v1728_v45  ;;  %v1776_v46 = vrot.slane %v5135_v42, 2  ;;  %v2204_v45 = vrot.slane %v7404_v29, 2  ;;  %v5136_v42 = vld [vmem:[%s9449_s1 + $0x60] sm:$0xff] }
 0x2cd   : >> { %1569 = vrot.lane.b32.xlu1 %v1554_v10, %s5728_s10  ;;  %v5137_v10 = vld [vmem:[%s9449_s1 + $0x68] sm:$0xff] }
 0x2ce   : >> { %1742 = vrot.lane.b32.xlu0 %v1726_v44, %s5727_s9  ;;  %v7376_v50 = vpop.permute.xlu2 %1507  ;;  %v2376_v44 = vrot.slane %v7404_v29, 1  ;;  %1860 = vmatpush.msrb.mxu0 %v5137_v10  ;;  %v2426_v15 = vsel %vm875_vm4, %v2204_v45, %v2425_v24  ;;  %v1777_v8 = vsel %vm875_vm4, %v1775_v6, %v1776_v46  ;;  %v1931_v10 = vsel %vm826_vm3, %v7109_v51, %v1930_v31  ;;  %v5584_v31 = vld [vmem:[%s6811_s28 + $0x40] sm:$0xff] }
 0x2cf   : >> { %v7382_v47 = vpop.permute.xlu1 %1287 }
 0x2d0   : >> { %v1286_v53 = vpop.permute.xlu0 %1285  ;;  %1861 = vmatpush.msrb.mxu0 %v5136_v42  ;;  %v2378_v5 = vsel %vm826_vm3, %v2376_v44, %v2377_v54  ;;  %v2158_v24 = vsel %vm826_vm3, %v2376_v44, %v2157_v30  ;;  %v5229_v54 = vld [vmem:[%s6811_s28 + $0x168] sm:$0x3] }
 0x2d1   : >> { %v2600_v44 = vrot.slane %v5229_v54, 1 }
 0x2d2   : >> { %5057 = vmatmul.msk.f32.gmra.mxu3 %vm1094_vm6, %v1089_v19  ;;  %5059 = vmatmul.msk.f32.gmra.mxu1 %vm1094_vm6, %v7154_v25  ;;  %v1978_v19 = vrot.slane %v5148_v43, 2 }
 0x2d4   : >> { %1744 = vrot.lane.b32.xlu2 %v1729_v27, %s5727_s9  ;;  %v1355_v27 = vsel %vm245_vm0, %v6820_v7, %v7251_v52  ;;  %v1979_v46 = vsel %vm875_vm4, %v7103_v41, %v1978_v19  ;;  %v7454_v7 = vld [vmem:[%s6811_s28 + $0x160] sm:$0xff]  ;;  %v5204_v52 = vld [vmem:[%s6811_s28 + $0x168] sm:$0x3]  ;;  %v5150_v19 = vld [vmem:[%s6811_s28 + $0xd8] sm:$0x3] }
 0x2d5   : >> { %2225 = vrot.lane.b32.xlu1 %v2203_v37, %s5728_s10  ;;  %v2379_v41 = vrot.slane %v7454_v7, 1  ;;  %v2380_v51 = vrot.slane %v5204_v52, 1 }
 0x2d6   : >> { %2177 = vrot.lane.b32.xlu0 %v2155_v34, %s5727_s9  ;;  %v7410_v25 = vpop.permute.xlu2 %1509 }
 0x2d7   : >> { %v7416_v35 = vpop.permute.xlu1 %1293 }
 0x2d8   : >> { %v7420_v16 = vpop.permute.xlu0 %1291 }
 0x2da   : >> { %5060 = vmatmul.msk.f32.gmra.mxu1 %vm1094_vm6, %v7149_v12 }
 0x2dc   : >> { %2448 = vrot.lane.b32.xlu2 %v2426_v15, %s5728_s10  ;;  %v1356_v15 = vsel %vm245_vm0, %v6842_v20, %v1286_v53  ;;  %v2601_v20 = vsel %vm826_vm3, %v2379_v41, %v2600_v44  ;;  %v2381_v53 = vsel %vm826_vm3, %v2379_v41, %v2380_v51  ;;  %v5585_v51 = vld [vmem:[%s6811_s28 + $0x50] sm:$0xff] }
 0x2dd   : >> { %1792 = vrot.lane.b32.xlu1 %v1777_v8, %s5728_s10  ;;  %v2205_v8 = vrot.slane %v5177_v63, 2  ;;  %v1364_v43 = vsel %vm932_vm5, %v1356_v15, %v7340_v9  ;;  %v1933_v63 = vrot.slane %v5150_v19, 1  ;;  %v1579_v9 = vsel %vm245_vm0, %v7046_v49, %v7376_v50 }
 0x2de   : >> { %2400 = vrot.lane.b32.xlu0 %v2378_v5, %s5727_s9  ;;  %v7437_v12 = vpop.permute.xlu2 %1778  ;;  %v1580_v15 = vsel %vm245_vm0, %v7058_v62, %v7410_v25 }
 0x2df   : >> { %v1332_v37 = vpop.permute.xlu1 %1331  ;;  %v2206_v30 = vsel %vm875_vm4, %v2204_v45, %v2205_v8  ;;  %v1357_v45 = vsel %vm245_vm0, %v5584_v31, %v7382_v47  ;;  %v1934_v50 = vsel %vm826_vm3, %v7138_v59, %v1933_v63  ;;  %v1358_v8 = vsel %vm245_vm0, %v5585_v51, %v7273_v38  ;;  %v5586_v31 = vld [vmem:[%s6811_s28 + $0x60] sm:$0xff] }
 0x2e0   : >> { %v1363_v34 = vsel %vm932_vm5, %v1355_v27, %v1332_v37  ;;  %v7443_v11 = vpop.permute.xlu0 %1297  ;;  %v2648_v37 = vrot.slane %v5229_v54, 2  ;;  %v5179_v54 = vld [vmem:[%s6811_s28 + $0x168] sm:$0x3] }
 0x2e1   : >> { %5085 = vmatmul.msk.f32.vlgmr.msrb.gmra.mxu2 %vm1094_vm6, %v1363_v34  ;;  %v2208_v44 = vrot.slane %v5179_v54, 2 }
 0x2e2   : >> { %5061 = vmatmul.msk.f32.gmra.mxu1 %vm1094_vm6, %v7091_v36 }
 0x2e4   : >> { %2179 = vrot.lane.b32.xlu2 %v2158_v24, %s5727_s9  ;;  %v2428_v24 = vrot.slane %v5204_v52, 2 }
 0x2e5   : >> { %2001 = vrot.lane.b32.xlu1 %v1979_v46, %s5728_s10 }
 0x2e6   : >> { %1953 = vrot.lane.b32.xlu0 %v1931_v10, %s5727_s9  ;;  %v7463_v36 = vpop.permute.xlu2 %1559 }
 0x2e7   : >> { %v1338_v42 = vpop.permute.xlu1 %1337 }
 0x2e8   : >> { %v1336_v5 = vpop.permute.xlu0 %1335  ;;  %v1366_v25 = vsel %vm932_vm5, %v1358_v8, %v1338_v42  ;;  %v7525_v42 = vld [vmem:[%s6811_s28 + $0x170] sm:$0xff] }
 0x2e9   : >> { %5086 = vmatmul.msk.f32.gmra.mxu2 %vm1094_vm6, %v1364_v43  ;;  %v1365_v10 = vsel %vm932_vm5, %v1357_v45, %v1336_v5  ;;  %v1981_v43 = vrot.slane %v5150_v19, 2  ;;  %v5231_v19 = vld [vmem:[%s6811_s28 + $0x178] sm:$0x3] }
 0x2ea   : >> { %5062 = vmatmul.msk.f32.gmra.mxu1 %vm1094_vm6, %v7187_v58  ;;  %v2647_v58 = vrot.slane %v7454_v7, 2 }
 0x2ec   : >> { %2623 = vrot.lane.b32.xlu2 %v2601_v20, %s5727_s9  ;;  %v2649_v47 = vsel %vm875_vm4, %v2647_v58, %v2648_v37  ;;  %v2429_v52 = vsel %vm875_vm4, %v2647_v58, %v2428_v24  ;;  %v2209_v63 = vsel %vm875_vm4, %v2647_v58, %v2208_v44  ;;  %v5206_v58 = vld [vmem:[%s6811_s28 + $0x178] sm:$0x3]  ;;  %v2603_v37 = vrot.slane %v5231_v19, 1 }
 0x2ed   : >> { %2402 = vrot.lane.b32.xlu1 %v2381_v53, %s5727_s9  ;;  %v2383_v24 = vrot.slane %v5206_v58, 1 }
 0x2ee   : >> { %2227 = vrot.lane.b32.xlu0 %v2206_v30, %s5728_s10  ;;  %v7481_v27 = vpop.permute.xlu2 %1734 }
 0x2ef   : >> { %v1340_v34 = vpop.permute.xlu1 %1339 }
 0x2f0   : >> { %v1556_v46 = vpop.permute.xlu0 %1555 }
 0x2f1   : >> { %v1587_v49 = vsel %vm932_vm5, %v1579_v9, %v1556_v46  ;;  %5087 = vmatmul.msk.f32.gmra.mxu2 %vm1094_vm6, %v1365_v10  ;;  %v2650_v46 = vrot.slane %v7525_v42, 2 }
 0x2f2   : >> { %5063 = vmatmul.msk.f32.gmra.mxu1 %vm1094_vm6, %v7182_v56  ;;  %5112 = vmatmul.msk.f32.vlgmr.msrb.gmra.mxu3 %vm1094_vm6, %v1587_v49  ;;  %v2160_v56 = vrot.slane %v5179_v54, 1 }
 0x2f4   : >> { %1955 = vrot.lane.b32.xlu2 %v1934_v50, %s5727_s9  ;;  %v2161_v38 = vsel %vm826_vm3, %v2379_v41, %v2160_v56  ;;  %v2602_v41 = vrot.slane %v7525_v42, 1  ;;  %v2651_v56 = vrot.slane %v5231_v19, 2 }
 0x2f5   : >> { %2671 = vrot.lane.b32.xlu1 %v2649_v47, %s5728_s10 }
 0x2f6   : >> { %2450 = vrot.lane.b32.xlu0 %v2429_v52, %s5728_s10  ;;  %v7504_v59 = vpop.permute.xlu2 %1515  ;;  %v2604_v52 = vsel %vm826_vm3, %v2602_v41, %v2603_v37  ;;  %v2384_v54 = vsel %vm826_vm3, %v2602_v41, %v2383_v24  ;;  %v5233_v24 = vld [vmem:[%s6811_s28 + $0x188] sm:$0x3] }
 0x2f7   : >> { %v1558_v5 = vpop.permute.xlu1 %1557 }
 0x2f8   : >> { %v1731_v20 = vpop.permute.xlu0 %1730  ;;  %v1588_v53 = vsel %vm932_vm5, %v1580_v15, %v1558_v5 }
 0x2f9   : >> { %v1802_v30 = vsel %vm245_vm0, %v7058_v62, %v1731_v20  ;;  %5088 = vmatmul.msk.f32.gmra.mxu2 %vm1094_vm6, %v1366_v25  ;;  %v1982_v62 = vsel %vm875_vm4, %v7173_v28, %v1981_v43  ;;  %v1359_v28 = vsel %vm245_vm0, %v5586_v31, %v7420_v16  ;;  %v2652_v25 = vsel %vm875_vm4, %v2650_v46, %v2651_v56  ;;  %v5183_v56 = vld [vmem:[%s6811_s28 + $0x188] sm:$0x3] }
 0x2fa   : >> { %v1810_v9 = vsel %vm932_vm5, %v1802_v30, %v7437_v12  ;;  %5064 = vmatmul.msk.f32.gmra.mxu1 %vm1094_vm6, %v7130_v3  ;;  %5113 = vmatmul.msk.f32.gmra.mxu3 %vm1094_vm6, %v1588_v53  ;;  %v2431_v12 = vrot.slane %v5206_v58, 2  ;;  %v1367_v49 = vsel %vm932_vm5, %v1359_v28, %v1340_v34  ;;  %v5152_v34 = vld [vmem:[%s6811_s28 + $0xe8] sm:$0x3]  ;;  %v5181_v53 = vld [vmem:[%s6811_s28 + $0x178] sm:$0x3]  ;;  %v7568_v30 = vld [vmem:[%s6811_s28 + $0x180] sm:$0xff] }
 0x2fb   : >> { %5139 = vmatmul.msk.f32.vlgmr.msrb.gmra.mxu0 %vm1094_vm6, %v1810_v9  ;;  %v1984_v15 = vrot.slane %v5152_v34, 2  ;;  %v2605_v19 = vrot.slane %v7568_v30, 1 }
 0x2fc   : >> { %2229 = vrot.lane.b32.xlu2 %v2209_v63, %s5728_s10  ;;  %v2432_v47 = vsel %vm875_vm4, %v2650_v46, %v2431_v12  ;;  %v5208_v63 = vld [vmem:[%s6811_s28 + $0x188] sm:$0x3] }
 0x2fd   : >> { %2181 = vrot.lane.b32.xlu1 %v2161_v38, %s5727_s9  ;;  %v1985_v43 = vsel %vm875_vm4, %v7197_v26, %v1984_v15  ;;  %v2386_v26 = vrot.slane %v5208_v63, 1 }
 0x2fe   : >> { %2003 = vrot.lane.b32.xlu0 %v1982_v62, %s5728_s10  ;;  %v7532_v3 = vpop.permute.xlu2 %1784  ;;  %v2163_v62 = vrot.slane %v5181_v53, 1 }
 0x2ff   : >> { %v1733_v45 = vpop.permute.xlu1 %1732  ;;  %v2387_v31 = vsel %vm826_vm3, %v2605_v19, %v2386_v26 }
 0x300   : >> { %v1512_v10 = vpop.permute.xlu0 %1511  ;;  %v1803_v51 = vsel %vm245_vm0, %v7095_v39, %v1733_v45  ;;  %v2164_v45 = vsel %vm826_vm3, %v2602_v41, %v2163_v62  ;;  %v5235_v62 = vld [vmem:[%s6811_s28 + $0x198] sm:$0x3] }
 0x301   : >> { %v1581_v50 = vsel %vm245_vm0, %v7095_v39, %v1512_v10  ;;  %5089 = vmatmul.msk.f32.gmra.mxu2 %vm1094_vm6, %v1367_v49  ;;  %v1804_v39 = vsel %vm245_vm0, %v7126_v0, %v7481_v27  ;;  %v2654_v10 = vrot.slane %v5233_v24, 2  ;;  %v7597_v49 = vrot.slane %v7568_v30, 2 }
 0x302   : >> { %5065 = vmatmul.msk.f32.gmra.mxu1 %vm1094_vm6, %v7206_v21  ;;  %v1589_v16 = vsel %vm932_vm5, %v1581_v50, %v7463_v36  ;;  %v1936_v36 = vrot.slane %v5152_v34, 1 }
 0x303   : >> { %5114 = vmatmul.msk.f32.gmra.mxu3 %vm1094_vm6, %v1589_v16 }
 0x304   : >> { %2452 = vrot.lane.b32.xlu2 %v2432_v47, %s5728_s10  ;;  %v1937_v20 = vsel %vm826_vm3, %v7167_v33, %v1936_v36  ;;  %v2211_v33 = vrot.slane %v5181_v53, 2  ;;  %v2606_v47 = vrot.slane %v5233_v24, 1 }
 0x305   : >> { %2625 = vrot.lane.b32.xlu1 %v2604_v52, %s5727_s9 }
 0x306   : >> { %2404 = vrot.lane.b32.xlu0 %v2384_v54, %s5727_s9  ;;  %v7555_v21 = vpop.permute.xlu2 %1738  ;;  %v2212_v28 = vsel %vm875_vm4, %v2650_v46, %v2211_v33  ;;  %v2434_v46 = vrot.slane %v5208_v63, 2  ;;  %v2655_v54 = vsel %vm875_vm4, %v7597_v49, %v2654_v10  ;;  %v2607_v36 = vsel %vm826_vm3, %v2605_v19, %v2606_v47  ;;  %v7631_v33 = vld [vmem:[%s6811_s28 + $0x190] sm:$0xff]  ;;  %v5156_v47 = vld [vmem:[%s6811_s28 + $0x108] sm:$0x3] }
 0x307   : >> { %v1514_v44 = vpop.permute.xlu1 %1513 }
 0x308   : >> { %v1781_v8 = vpop.permute.xlu0 %1780  ;;  %v1582_v58 = vsel %vm245_vm0, %v7126_v0, %v1514_v44  ;;  %v1583_v0 = vsel %vm245_vm0, %v7159_v32, %v7504_v59  ;;  %v2435_v15 = vsel %vm875_vm4, %v7597_v49, %v2434_v46  ;;  %v5154_v44 = vld [vmem:[%s6811_s28 + $0xf8] sm:$0x3] }
 0x309   : >> { %v1811_v5 = vsel %vm932_vm5, %v1803_v51, %v1781_v8 }
 0x30a   : >> { %5140 = vmatmul.msk.f32.gmra.mxu0 %vm1094_vm6, %v1811_v5  ;;  %v1939_v5 = vrot.slane %v5154_v44, 1 }
 0x30c   : >> { %2005 = vrot.lane.b32.xlu2 %v1985_v43, %s5728_s10  ;;  %v5587_v43 = vld [vmem:[%s6811_s28 + $0x70] sm:$0xff]  ;;  %v1940_v26 = vsel %vm826_vm3, %v7223_v57, %v1939_v5  ;;  %v7645_v57 = vrot.slane %v7631_v33, 1 }
 0x30d   : >> { %1957 = vrot.lane.b32.xlu1 %v1937_v20, %s5727_s9  ;;  %v1360_v20 = vsel %vm245_vm0, %v5587_v43, %v7416_v35  ;;  %v1806_v35 = vsel %vm245_vm0, %v7211_v22, %v7555_v21  ;;  %v5191_v21 = vld [vmem:[%s9449_s1 + $0x98] sm:$0xff] }
 0x30e   : >> { %2673 = vrot.lane.b32.xlu0 %v2652_v25, %s5728_s10  ;;  %v7577_v9 = vpop.permute.xlu2 %1343 }
 0x30f   : >> { %v1783_v38 = vpop.permute.xlu1 %1782 }
 0x310   : >> { %v1562_v12 = vpop.permute.xlu0 %1561  ;;  %v1812_v37 = vsel %vm932_vm5, %v1804_v39, %v1783_v38  ;;  %v5210_v38 = vld [vmem:[%s6811_s28 + $0x198] sm:$0x3] }
 0x311   : >> { %v1590_v27 = vsel %vm932_vm5, %v1582_v58, %v1562_v12  ;;  %v2389_v58 = vrot.slane %v5210_v38, 1 }
 0x312   : >> { %5115 = vmatmul.msk.f32.gmra.mxu3 %vm1094_vm6, %v1590_v27  ;;  %5141 = vmatmul.msk.f32.gmra.mxu0 %vm1094_vm6, %v1812_v37  ;;  %v2214_v27 = vrot.slane %v5183_v56, 2 }
 0x314   : >> { %2406 = vrot.lane.b32.xlu2 %v2387_v31, %s5727_s9  ;;  %v5588_v31 = vld [vmem:[%s6811_s28 + $0x80] sm:$0xff] }
 0x315   : >> { %2231 = vrot.lane.b32.xlu1 %v2212_v28, %s5728_s10  ;;  %v1361_v28 = vsel %vm245_vm0, %v5588_v31, %v7301_v13  ;;  %v5190_v13 = vld [vmem:[%s9449_s1 + $0x90] sm:$0xff]  ;;  %v7730_v31 = vld [vmem:[%s6811_s28 + $0x1a0] sm:$0xff] }
 0x316   : >> { %2183 = vrot.lane.b32.xlu0 %v2164_v45, %s5727_s9  ;;  %v7599_v50 = vpop.permute.xlu2 %1567  ;;  %v1369_v10 = vsel %vm932_vm5, %v1361_v28, %v7577_v9  ;;  %v2215_v9 = vsel %vm875_vm4, %v7597_v49, %v2214_v27  ;;  %v5163_v27 = vld [vmem:[%s9449_s1 + $0x78] sm:$0xff]  ;;  %v5237_v28 = vld [vmem:[%s6811_s28 + $0x1a8] sm:$0x3] }
 0x317   : >> { %v1564_v41 = vpop.permute.xlu1 %1563 }
 0x318   : >> { %v1737_v16 = vpop.permute.xlu0 %1736  ;;  %v1591_v52 = vsel %vm932_vm5, %v1583_v0, %v1564_v41 }
 0x319   : >> { %v1805_v59 = vsel %vm245_vm0, %v7159_v32, %v1737_v16  ;;  %v2166_v32 = vrot.slane %v5183_v56, 1  ;;  %v5219_v16 = vld [vmem:[%s9449_s1 + $0xb8] sm:$0xff] }
 0x31a   : >> { %5116 = vmatmul.msk.f32.gmra.mxu3 %vm1094_vm6, %v1591_v52  ;;  %v1813_v34 = vsel %vm932_vm5, %v1805_v59, %v7532_v3  ;;  %v1987_v3 = vrot.slane %v5154_v44, 2  ;;  %v1942_v52 = vrot.slane %v5156_v47, 1  ;;  %v2656_v59 = vrot.slane %v7631_v33, 2 }
 0x31b   : >> { %5142 = vmatmul.msk.f32.gmra.mxu0 %vm1094_vm6, %v1813_v34  ;;  %v2167_v63 = vsel %vm826_vm3, %v2605_v19, %v2166_v32  ;;  %v2609_v19 = vrot.slane %v5235_v62, 1  ;;  %2529 = vmatpush.msra.mxu3 %v5219_v16 }
 0x31c   : >> { %2675 = vrot.lane.b32.xlu2 %v2655_v54, %s5728_s10  ;;  %v1988_v39 = vsel %vm875_vm4, %v7254_v14, %v1987_v3  ;;  %v5192_v14 = vld [vmem:[%s9449_s1 + $0xa0] sm:$0xff]  ;;  %v2657_v54 = vrot.slane %v5235_v62, 2  ;;  %v1943_v32 = vsel %vm826_vm3, %v7276_v4, %v1942_v52  ;;  %v5217_v3 = vld [vmem:[%s9449_s1 + $0xa8] sm:$0xff]  ;;  %v1990_v62 = vrot.slane %v5156_v47, 2 }
 0x31d   : >> { %2454 = vrot.lane.b32.xlu1 %v2435_v15, %s5728_s10  ;;  %2306 = vmatpush.msra.mxu2 %v5192_v14  ;;  %v2610_v41 = vsel %vm826_vm3, %v7645_v57, %v2609_v19  ;;  %v2437_v15 = vrot.slane %v5210_v38, 2  ;;  %v5165_v4 = vld [vmem:[%s9449_s1 + $0x88] sm:$0xff] }
 0x31e   : >> { %2627 = vrot.lane.b32.xlu0 %v2607_v36, %s5727_s9  ;;  %v7618_v51 = vpop.permute.xlu2 %1521  ;;  %v5218_v36 = vld [vmem:[%s9449_s1 + $0xb0] sm:$0xff]  ;;  %v2658_v5 = vsel %vm875_vm4, %v2656_v59, %v2657_v54  ;;  %2082 = vmatpush.msra.mxu1 %v5165_v4 }
 0x31f   : >> { %v1518_v8 = vpop.permute.xlu1 %1517  ;;  %2307 = vmatpush.msra.mxu2 %v5191_v21  ;;  %2530 = vmatpush.msra.mxu3 %v5218_v36  ;;  %v2438_v43 = vsel %vm875_vm4, %v2656_v59, %v2437_v15 }
 0x320   : >> { %v1342_v25 = vpop.permute.xlu0 %1341  ;;  %v1584_v45 = vsel %vm245_vm0, %v7211_v22, %v1518_v8  ;;  %v2390_v22 = vsel %vm826_vm3, %v7645_v57, %v2389_v58 }
 0x321   : >> { %v1368_v53 = vsel %vm932_vm5, %v1360_v20, %v1342_v25  ;;  %2308 = vmatpush.msra.mxu2 %v5190_v13  ;;  %2531 = vmatpush.msra.mxu3 %v5217_v3  ;;  %v5185_v20 = vld [vmem:[%s6811_s28 + $0x198] sm:$0x3]  ;;  %v2659_v13 = vrot.slane %v7730_v31, 2  ;;  %v2660_v3 = vrot.slane %v5237_v28, 2 }
 0x322   : >> { %5090 = vmatmul.msk.f32.gmra.mxu2 %vm1094_vm6, %v1368_v53  ;;  %v2217_v25 = vrot.slane %v5185_v20, 2 }
 0x324   : >> { %2185 = vrot.lane.b32.xlu2 %v2167_v63, %s5727_s9  ;;  %v5589_v63 = vld [vmem:[%s6811_s28 + $0x90] sm:$0xff] }
 0x325   : >> { %2007 = vrot.lane.b32.xlu1 %v1988_v39, %s5728_s10  ;;  %v1362_v39 = vsel %vm245_vm0, %v5589_v63, %v7443_v11  ;;  %v2661_v63 = vsel %vm875_vm4, %v2659_v13, %v2660_v3 }
 0x326   : >> { %1959 = vrot.lane.b32.xlu0 %v1940_v26, %s5727_s9  ;;  %v7647_v12 = vpop.permute.xlu2 %1790 }
 0x327   : >> { %v1787_v37 = vpop.permute.xlu1 %1786 }
 0x328   : >> { %v1566_v24 = vpop.permute.xlu0 %1565  ;;  %v1814_v0 = vsel %vm932_vm5, %v1806_v35, %v1787_v37  ;;  %v7710_v26 = vpop.f32.mrf.mxu1  ;;  %v5164_v35 = vld [vmem:[%s9449_s1 + $0x80] sm:$0xff]  ;;  %v2218_v37 = vsel %vm875_vm4, %v2656_v59, %v2217_v25 }
 0x329   : >> { %v1592_v46 = vsel %vm932_vm5, %v1584_v45, %v1566_v24  ;;  %5143 = vmatmul.msk.f32.gmra.mxu0 %vm1094_vm6, %v1814_v0  ;;  %2083 = vmatpush.msra.mxu1 %v5164_v35  ;;  %v5212_v45 = vld [vmem:[%s6811_s28 + $0x1a8] sm:$0x3]  ;;  %v1586_v0 = vsel %vm245_vm0, %v7295_v23, %v7618_v51 }
 0x32a   : >> { %5091 = vmatmul.msk.f32.gmra.mxu2 %vm1094_vm6, %v1369_v10  ;;  %5117 = vmatmul.msk.f32.gmra.mxu3 %vm1094_vm6, %v1592_v46  ;;  %v2440_v24 = vrot.slane %v5212_v45, 2 }
 0x32b   : >> { %2084 = vmatpush.msra.mxu1 %v5163_v27 }
 0x32c   : >> { %2629 = vrot.lane.b32.xlu2 %v2610_v41, %s5727_s9  ;;  %v2392_v41 = vrot.slane %v5212_v45, 1  ;;  %v2441_v16 = vsel %vm875_vm4, %v2659_v13, %v2440_v24 }
 0x32d   : >> { %2408 = vrot.lane.b32.xlu1 %v2390_v22, %s5727_s9 }
 0x32e   : >> { %2233 = vrot.lane.b32.xlu0 %v2215_v9, %s5728_s10  ;;  %v7681_v34 = vpop.permute.xlu2 %1744 }
 0x32f   : >> { %v1741_v49 = vpop.permute.xlu1 %1740 }
 0x330   : >> { %v1520_v44 = vpop.permute.xlu0 %1519  ;;  %v1807_v14 = vsel %vm245_vm0, %v7266_v55, %v1741_v49  ;;  %v5158_v49 = vld [vmem:[%s6811_s28 + $0x118] sm:$0x3] }
 0x331   : >> { %v1585_v56 = vsel %vm245_vm0, %v7266_v55, %v1520_v44  ;;  %v1991_v55 = vsel %vm875_vm4, %v7279_v48, %v1990_v62  ;;  %v2612_v48 = vrot.slane %v5237_v28, 1  ;;  %v1945_v36 = vrot.slane %v5158_v49, 1  ;;  %v5214_v62 = vld [vmem:[%s6811_s28 + $0x1b8] sm:$0x3] }
 0x332   : >> { %v1593_v8 = vsel %vm932_vm5, %v1585_v56, %v7599_v50  ;;  %v2169_v50 = vrot.slane %v5185_v20, 1  ;;  %v5245_v56 = vld [vmem:[%s9449_s1 + $0xc8] sm:$0xff] }
 0x333   : >> { %5118 = vmatmul.msk.f32.gmra.mxu3 %vm1094_vm6, %v1593_v8 }
 0x334   : >> { %1961 = vrot.lane.b32.xlu2 %v1943_v32, %s5727_s9  ;;  %v2170_v21 = vsel %vm826_vm3, %v7645_v57, %v2169_v50  ;;  %v7741_v57 = vrot.slane %v7730_v31, 1  ;;  %v1946_v50 = vsel %vm826_vm3, %v7312_v60, %v1945_v36 }
 0x335   : >> { %2677 = vrot.lane.b32.xlu1 %v2658_v5, %s5728_s10 }
 0x336   : >> { %2456 = vrot.lane.b32.xlu0 %v2438_v43, %s5728_s10  ;;  %v7705_v53 = vpop.permute.xlu2 %2448  ;;  %v2613_v59 = vsel %vm826_vm3, %v7741_v57, %v2612_v48  ;;  %v2393_v54 = vsel %vm826_vm3, %v7741_v57, %v2392_v41  ;;  %v5244_v43 = vld [vmem:[%s9449_s1 + $0xc0] sm:$0xff]  ;;  %v5239_v41 = vld [vmem:[%s6811_s28 + $0x1b8] sm:$0x3] }
 0x337   : >> { %v1346_v38 = vpop.permute.xlu1 %1345  ;;  %v7765_v15 = vpop.f32.mrf.mxu0 }
 0x338   : >> { %v1789_v19 = vpop.permute.xlu0 %1788  ;;  %v1370_v58 = vsel %vm932_vm5, %v1362_v39, %v1346_v38  ;;  %v5187_v39 = vld [vmem:[%s6811_s28 + $0x1a8] sm:$0x3]  ;;  %v7790_v38 = vld [vmem:[%s6811_s28 + $0x1b0] sm:$0xff] }
 0x339   : >> { %5092 = vmatmul.msk.f32.gmra.mxu2 %vm1094_vm6, %v1370_v58  ;;  %v1815_v11 = vsel %vm932_vm5, %v1807_v14, %v1789_v19  ;;  %v2220_v60 = vrot.slane %v5187_v39, 2  ;;  %v2172_v58 = vrot.slane %v5187_v39, 1  ;;  %v5189_v39 = vld [vmem:[%s6811_s28 + $0x1b8] sm:$0x3] }
 0x33a   : >> { %5144 = vmatmul.msk.f32.gmra.mxu0 %vm1094_vm6, %v1815_v11  ;;  %v2614_v11 = vrot.slane %v7790_v38, 1 }
 0x33b   : >> { %v2173_v48 = vsel %vm826_vm3, %v7741_v57, %v2172_v58 }
 0x33c   : >> { %2235 = vrot.lane.b32.xlu2 %v2218_v37, %s5728_s10 }
 0x33d   : >> { %2187 = vrot.lane.b32.xlu1 %v2170_v21, %s5727_s9 }
 0x33e   : >> { %2009 = vrot.lane.b32.xlu0 %v1991_v55, %s5728_s10  ;;  %v7743_v10 = vpop.permute.xlu2 %2179 }
 0x33f   : >> { %v7745_v46 = vpop.f32.mrf.mxu1  ;;  %v1570_v22 = vpop.permute.xlu1 %1569 }
 0x340   : >> { %v1743_v9 = vpop.permute.xlu0 %1742  ;;  %v1594_v51 = vsel %vm932_vm5, %v1586_v0, %v1570_v22  ;;  %v1139_v14 = vpop.f32.mrf.mxu0  ;;  %v2221_v0 = vsel %vm875_vm4, %v2659_v13, %v2220_v60  ;;  %v2663_v22 = vrot.slane %v5239_v41, 2 }
 0x341   : >> { %v1808_v47 = vsel %vm245_vm0, %v7295_v23, %v1743_v9  ;;  %5119 = vmatmul.msk.f32.gmra.mxu3 %vm1094_vm6, %v1594_v51  ;;  %v5246_v23 = vld [vmem:[%s9449_s1 + $0xd0] sm:$0xff]  ;;  %v2443_v9 = vrot.slane %v5214_v62, 2  ;;  %v2615_v51 = vrot.slane %v5239_v41, 1 }
 0x342   : >> { %v1816_v52 = vsel %vm932_vm5, %v1808_v47, %v7647_v12  ;;  %2752 = vmatpush.msra.mxu0 %v5246_v23  ;;  %v1993_v12 = vrot.slane %v5158_v49, 2 }
 0x343   : >> { %5145 = vmatmul.msk.f32.gmra.mxu0 %vm1094_vm6, %v1816_v52  ;;  %v2616_v36 = vsel %vm826_vm3, %v2614_v11, %v2615_v51  ;;  %v5591_v51 = vld [vmem:[%s6811_s28 + $0xd0] sm:$0xff] }
 0x344   : >> { %2458 = vrot.lane.b32.xlu2 %v2441_v16, %s5728_s10  ;;  %2753 = vmatpush.msra.mxu0 %v5245_v56  ;;  %v1994_v4 = vsel %vm875_vm4, %v7343_v61, %v1993_v12  ;;  %v1809_v61 = vsel %vm245_vm0, %v7369_v40, %v7681_v34  ;;  %v1148_v45 = vpop.f32.mrf.mxu2  ;;  %v5160_v56 = vld [vmem:[%s6811_s28 + $0x128] sm:$0x3] }
 0x345   : >> { %2631 = vrot.lane.b32.xlu1 %v2613_v59, %s5727_s9  ;;  %v5590_v59 = vld [vmem:[%s6811_s28 + $0xc0] sm:$0xff] }
 0x346   : >> { %2410 = vrot.lane.b32.xlu0 %v2393_v54, %s5727_s9  ;;  %v7769_v44 = vpop.permute.xlu2 %2623  ;;  %2754 = vmatpush.msra.mxu0 %v5244_v43 }
 0x347   : >> { %v7774_v32 = vpop.f32.mrf.mxu1  ;;  %v2226_v8 = vpop.permute.xlu1 %2225 }
 0x348   : >> { %v2178_v5 = vpop.permute.xlu0 %2177 }
 0x349   : >> { %v2249_v20 = vsel %vm245_vm0, %v7365_v17, %v2178_v5  ;;  %v2395_v17 = vrot.slane %v5214_v62, 1 }
 0x34a   : >> { %v2257_v25 = vsel %vm932_vm5, %v2249_v20, %v2226_v8  ;;  %v1996_v8 = vrot.slane %v5160_v56, 2  ;;  %v1948_v20 = vrot.slane %v5160_v56, 1  ;;  %v7901_v56 = vld [vmem:[%s6811_s28 + $0x130] sm:$0xff] }
 0x34b   : >> { %5193 = vmatmul.msk.f32.vlgmr.msra.gmra.mxu2 %vm1094_vm6, %v2257_v25  ;;  %v2396_v28 = vsel %vm826_vm3, %v2614_v11, %v2395_v17 }
 0x34c   : >> { %2011 = vrot.lane.b32.xlu2 %v1994_v4, %s5728_s10  ;;  %v1151_v3 = vpop.f32.mrf.mxu2  ;;  %v1949_v17 = vsel %vm826_vm3, %v1727_v18, %v1948_v20 }
 0x34d   : >> { %1963 = vrot.lane.b32.xlu1 %v1946_v50, %s5727_s9  ;;  %v7850_v62 = vpop.f32.mrf.mxu3 }
 0x34e   : >> { %2679 = vrot.lane.b32.xlu0 %v2661_v63, %s5728_s10  ;;  %v7799_v35 = vpop.permute.xlu2 %1955 }
 0x34f   : >> { %v1204_v19 = vpop.f32.mrf.mxu1  ;;  %v1793_v27 = vpop.permute.xlu1 %1792 }
 0x350   : >> { %v7802_v37 = vadd.f32 %v1204_v19, %v1139_v14  ;;  %v2401_v21 = vpop.permute.xlu0 %2400  ;;  %v1817_v34 = vsel %vm932_vm5, %v1809_v61, %v1793_v27  ;;  %v5216_v61 = vld [vmem:[%s6811_s28 + $0x1c8] sm:$0x3]  ;;  %v2223_v27 = vrot.slane %v5189_v39, 2 }
 0x351   : >> { %v2472_v55 = vsel %vm245_vm0, %v7404_v29, %v2401_v21  ;;  %5146 = vmatmul.msk.f32.gmra.mxu0 %vm1094_vm6, %v1817_v34  ;;  %v2398_v18 = vrot.slane %v5216_v61, 1 }
 0x352   : >> { %v2480_v24 = vsel %vm932_vm5, %v2472_v55, %v7705_v53  ;;  %v2442_v53 = vrot.slane %v7790_v38, 2 }
 0x353   : >> { %5220 = vmatmul.msk.f32.vlgmr.msra.gmra.mxu3 %vm1094_vm6, %v2480_v24  ;;  %v5241_v24 = vld [vmem:[%s6811_s28 + $0x1c8] sm:$0x3] }
 0x354   : >> { %2412 = vrot.lane.b32.xlu2 %v2396_v28, %s5727_s9  ;;  %v2664_v49 = vsel %vm875_vm4, %v2442_v53, %v2663_v22  ;;  %v2444_v12 = vsel %vm875_vm4, %v2442_v53, %v2443_v9  ;;  %v2224_v41 = vsel %vm875_vm4, %v2442_v53, %v2223_v27 }
 0x355   : >> { %2237 = vrot.lane.b32.xlu1 %v2221_v0, %s5728_s10  ;;  %v7883_v9 = vpop.f32.mrf.mxu3 }
 0x356   : >> { %2189 = vrot.lane.b32.xlu0 %v2173_v48, %s5727_s9  ;;  %v7820_v47 = vpop.permute.xlu2 %2229  ;;  %v2618_v48 = vrot.slane %v5241_v24, 1 }
 0x357   : >> { %v1207_v13 = vpop.f32.mrf.mxu1  ;;  %v2002_v57 = vpop.permute.xlu1 %2001 }
 0x358   : >> { %v7823_v16 = vadd.f32 %v1207_v13, %v7710_v26  ;;  %v1954_v52 = vpop.permute.xlu0 %1953  ;;  %v2250_v26 = vsel %vm245_vm0, %v7404_v29, %v7743_v10  ;;  %v1997_v29 = vsel %vm875_vm4, %v1775_v6, %v1996_v8  ;;  %v2175_v10 = vrot.slane %v5189_v39, 1 }
 0x359   : >> { %v2025_v54 = vsel %vm245_vm0, %v5590_v59, %v1954_v52  ;;  %v2695_v6 = vsel %vm245_vm0, %v7454_v7, %v7769_v44  ;;  %v2666_v52 = vrot.slane %v5241_v24, 2 }
 0x35a   : >> { %v2033_v23 = vsel %vm932_vm5, %v2025_v54, %v2002_v57  ;;  %v2176_v14 = vsel %vm826_vm3, %v2614_v11, %v2175_v10  ;;  %v2026_v57 = vsel %vm245_vm0, %v5591_v51, %v7799_v35  ;;  %v2446_v54 = vrot.slane %v5216_v61, 2  ;;  %v5592_v51 = vld [vmem:[%s6811_s28 + $0xe0] sm:$0xff] }
 0x35b   : >> { %5166 = vmatmul.msk.f32.vlgmr.msra.gmra.mxu1 %vm1094_vm6, %v2033_v23 }
 0x35c   : >> { %2681 = vrot.lane.b32.xlu2 %v2664_v49, %s5728_s10 }
 0x35d   : >> { %2460 = vrot.lane.b32.xlu1 %v2444_v12, %s5728_s10 }
 0x35e   : >> { %2633 = vrot.lane.b32.xlu0 %v2616_v36, %s5727_s9  ;;  %v7839_v5 = vpop.permute.xlu2 %2452 }
 0x35f   : >> { %v1210_v43 = vpop.f32.mrf.mxu1  ;;  %v2403_v25 = vpop.permute.xlu1 %2402 }
 0x360   : >> { %v7842_v4 = vadd.f32 %v1210_v43, %v7745_v46  ;;  %v2228_v50 = vpop.permute.xlu0 %2227  ;;  %v7856_v46 = vld [vmem:[%s6811_s28 + $0x1c0] sm:$0xff]  ;;  %v2473_v11 = vsel %vm245_vm0, %v7454_v7, %v2403_v25 }
 0x361   : >> { %v2258_v63 = vsel %vm932_vm5, %v2250_v26, %v2228_v50  ;;  %v2397_v40 = vrot.slane %v7856_v46, 1  ;;  %v2665_v53 = vrot.slane %v7856_v46, 2  ;;  %v5162_v26 = vld [vmem:[%s6811_s28 + $0x138] sm:$0x3] }
 0x362   : >> { %5194 = vmatmul.msk.f32.gmra.mxu2 %vm1094_vm6, %v2258_v63  ;;  %v1951_v20 = vrot.slane %v5162_v26, 1  ;;  %v5243_v50 = vld [vmem:[%s6811_s28 + $0x1d8] sm:$0x3] }
 0x363   : >> { %v2399_v0 = vsel %vm826_vm3, %v2397_v40, %v2398_v18  ;;  %v2667_v8 = vsel %vm875_vm4, %v2665_v53, %v2666_v52  ;;  %v2447_v25 = vsel %vm875_vm4, %v2665_v53, %v2446_v54 }
 0x364   : >> { %v7859_v60 = vpop.f32.mrf.mxu2  ;;  %2191 = vrot.lane.b32.xlu2 %v2176_v14, %s5727_s9  ;;  %v1998_v14 = vrot.slane %v7901_v56, 2 }
 0x365   : >> { %2013 = vrot.lane.b32.xlu1 %v1997_v29, %s5728_s10 }
 0x366   : >> { %1965 = vrot.lane.b32.xlu0 %v1949_v17, %s5727_s9  ;;  %v7869_v19 = vpop.permute.xlu2 %2005  ;;  %v2621_v17 = vrot.slane %v5243_v50, 1 }
 0x367   : >> { %v1213_v58 = vpop.f32.mrf.mxu1  ;;  %v2672_v55 = vpop.permute.xlu1 %2671 }
 0x368   : >> { %v7873_v21 = vadd.f32 %v1213_v58, %v1148_v45  ;;  %v2451_v34 = vpop.permute.xlu0 %2450  ;;  %v2703_v28 = vsel %vm932_vm5, %v2695_v6, %v2672_v55  ;;  %v2619_v45 = vsel %vm826_vm3, %v2397_v40, %v2618_v48  ;;  %v1999_v6 = vrot.slane %v5162_v26, 2 }
 0x369   : >> { %v2481_v44 = vsel %vm932_vm5, %v2473_v11, %v2451_v34  ;;  %5247 = vmatmul.msk.f32.vlgmr.msra.gmra.mxu0 %vm1094_vm6, %v2703_v28  ;;  %v2669_v34 = vrot.slane %v5243_v50, 2 }
 0x36a   : >> { %5221 = vmatmul.msk.f32.gmra.mxu3 %vm1094_vm6, %v2481_v44  ;;  %v2000_v44 = vsel %vm875_vm4, %v1998_v14, %v1999_v6 }
 0x36c   : >> { %v1419_v22 = vpop.f32.mrf.mxu2  ;;  %2635 = vrot.lane.b32.xlu2 %v2619_v45, %s5727_s9 }
 0x36d   : >> { %v1441_v13 = vadd.f32 %v1419_v22, %v7802_v37  ;;  %2414 = vrot.lane.b32.xlu1 %v2399_v0, %s5727_s9 }
 0x36e   : >> { %2239 = vrot.lane.b32.xlu0 %v2224_v41, %s5728_s10  ;;  %v7893_v49 = vpop.permute.xlu2 %2406 }
 0x36f   : >> { %v1216_v59 = vpop.f32.mrf.mxu1  ;;  %v2182_v23 = vpop.permute.xlu1 %2181 }
 0x370   : >> { %v7895_v37 = vadd.f32 %v1216_v59, %v1151_v3  ;;  %v2004_v12 = vpop.permute.xlu0 %2003  ;;  %v2251_v36 = vsel %vm245_vm0, %v7454_v7, %v2182_v23  ;;  %v1950_v3 = vrot.slane %v7901_v56, 1  ;;  %v7912_v7 = vld [vmem:[%s6811_s28 + $0x1d0] sm:$0xff] }
 0x371   : >> { %v2034_v35 = vsel %vm932_vm5, %v2026_v57, %v2004_v12  ;;  %v2259_v43 = vsel %vm932_vm5, %v2251_v36, %v7820_v47  ;;  %v2620_v47 = vrot.slane %v7912_v7, 1  ;;  %v2668_v55 = vrot.slane %v7912_v7, 2 }
 0x372   : >> { %5167 = vmatmul.msk.f32.gmra.mxu1 %vm1094_vm6, %v2034_v35  ;;  %5195 = vmatmul.msk.f32.gmra.mxu2 %vm1094_vm6, %v2259_v43  ;;  %v1952_v39 = vsel %vm826_vm3, %v1950_v3, %v1951_v20  ;;  %v2475_v20 = vsel %vm245_vm0, %v7568_v30, %v7893_v49 }
 0x373   : >> { %v2622_v11 = vsel %vm826_vm3, %v2620_v47, %v2621_v17  ;;  %v2670_v24 = vsel %vm875_vm4, %v2668_v55, %v2669_v34 }
 0x374   : >> { %v1422_v63 = vpop.f32.mrf.mxu2  ;;  %1967 = vrot.lane.b32.xlu2 %v1952_v39, %s5727_s9 }
 0x375   : >> { %v1442_v29 = vadd.f32 %v1422_v63, %v7823_v16  ;;  %v7917_v10 = vpop.f32.mrf.mxu3  ;;  %2683 = vrot.lane.b32.xlu1 %v2667_v8, %s5728_s10 }
 0x376   : >> { %2462 = vrot.lane.b32.xlu0 %v2447_v25, %s5728_s10  ;;  %v2676_v58 = vpop.permute.xlu2 %2675 }
 0x377   : >> { %v1219_v61 = vpop.f32.mrf.mxu1  ;;  %v2626_v18 = vpop.permute.xlu1 %2625 }
 0x378   : >> { %v7925_v40 = vadd.f32 %v1219_v61, %v7850_v62  ;;  %v2405_v16 = vpop.permute.xlu0 %2404  ;;  %v7940_v22 = vpop.f32.mrf.mxu0  ;;  %v2696_v45 = vsel %vm245_vm0, %v7525_v42, %v2626_v18 }
 0x379   : >> { %v2474_v27 = vsel %vm245_vm0, %v7525_v42, %v2405_v16  ;;  %v5593_v16 = vld [vmem:[%s6811_s28 + $0xf0] sm:$0xff] }
 0x37a   : >> { %v2482_v28 = vsel %vm932_vm5, %v2474_v27, %v7839_v5 }
 0x37b   : >> { %5222 = vmatmul.msk.f32.gmra.mxu3 %vm1094_vm6, %v2482_v28 }
 0x37c   : >> { %v1425_v62 = vpop.f32.mrf.mxu2  ;;  %2685 = vrot.lane.b32.xlu2 %v2670_v24, %s5728_s10 }
 0x37d   : >> { %v1443_v0 = vadd.f32 %v1425_v62, %v7842_v4  ;;  %v1643_v48 = vpop.f32.mrf.mxu3  ;;  %2637 = vrot.lane.b32.xlu1 %v2622_v11, %s5727_s9 }
 0x37e   : >> { %v1665_v41 = vadd.f32 %v1643_v48, %v1441_v13  ;;  %2015 = vrot.lane.b32.xlu0 %v2000_v44, %s5728_s10  ;;  %v2186_v13 = vpop.permute.xlu2 %2185 }
 0x37f   : >> { %v1958_v5 = vpop.permute.xlu1 %1957 }
 0x380   : >> { %v2027_v57 = vsel %vm245_vm0, %v5592_v51, %v1958_v5  ;;  %v2674_v53 = vpop.permute.xlu0 %2673 }
 0x381   : >> { %v2704_v4 = vsel %vm932_vm5, %v2696_v45, %v2674_v53  ;;  %v2035_v52 = vsel %vm932_vm5, %v2027_v57, %v7869_v19 }
 0x382   : >> { %5248 = vmatmul.msk.f32.gmra.mxu0 %vm1094_vm6, %v2704_v4  ;;  %5168 = vmatmul.msk.f32.gmra.mxu1 %vm1094_vm6, %v2035_v52 }
 0x384   : >> { %v1428_v59 = vpop.f32.mrf.mxu2 }
 0x385   : >> { %v1444_v54 = vadd.f32 %v1428_v59, %v7873_v21 }
 0x386   : >> { %v1646_v23 = vpop.f32.mrf.mxu3  ;;  %v2630_v3 = vpop.permute.xlu2 %2629 }
 0x387   : >> { %v1666_v12 = vadd.f32 %v1646_v23, %v1442_v29  ;;  %v1866_v36 = vpop.f32.mrf.mxu0  ;;  %v2232_v26 = vpop.permute.xlu1 %2231  ;;  %v2698_v48 = vsel %vm245_vm0, %v7631_v33, %v2630_v3  ;;  %v5594_v23 = vld [vmem:[%s6811_s28 + $0x100] sm:$0xff] }
 0x388   : >> { %v7952_v35 = vadd.f32 %v1866_v36, %v1665_v41  ;;  %v2184_v8 = vpop.permute.xlu0 %2183 }
 0x389   : >> { %v2252_v43 = vsel %vm245_vm0, %v7525_v42, %v2184_v8 }
 0x38a   : >> { %v2260_v19 = vsel %vm932_vm5, %v2252_v43, %v2232_v26 }
 0x38b   : >> { %5196 = vmatmul.msk.f32.gmra.mxu2 %vm1094_vm6, %v2260_v19 }
 0x38e   : >> { %v1962_v49 = vpop.permute.xlu2 %1961 }
 0x38f   : >> { %v1869_v21 = vpop.f32.mrf.mxu0  ;;  %v2455_v50 = vpop.permute.xlu1 %2454 }
 0x390   : >> { %v7961_v25 = vadd.f32 %v1869_v21, %v1666_v12  ;;  %v2628_v63 = vpop.permute.xlu0 %2627  ;;  %v2483_v39 = vsel %vm932_vm5, %v2475_v20, %v2455_v50  ;;  %v2029_v12 = vsel %vm245_vm0, %v5594_v23, %v1962_v49  ;;  %v1222_v50 = vpop.f32.mrf.mxu1 }
 0x391   : >> { %v2697_v42 = vsel %vm245_vm0, %v7568_v30, %v2628_v63  ;;  %5223 = vmatmul.msk.f32.gmra.mxu3 %vm1094_vm6, %v2483_v39 }
 0x392   : >> { %v2705_v29 = vsel %vm932_vm5, %v2697_v42, %v2676_v58  ;;  %v2253_v58 = vsel %vm245_vm0, %v7568_v30, %v2186_v13 }
 0x393   : >> { %5249 = vmatmul.msk.f32.gmra.mxu0 %vm1094_vm6, %v2705_v29  ;;  %v1223_v29 = vadd.f32 %v1222_v50, %v7883_v9 }
 0x395   : >> { %v1649_v47 = vpop.f32.mrf.mxu3 }
 0x396   : >> { %v1667_v17 = vadd.f32 %v1649_v47, %v1443_v0  ;;  %v2236_v62 = vpop.permute.xlu2 %2235 }
 0x397   : >> { %v2008_v61 = vpop.permute.xlu1 %2007 }
 0x398   : >> { %v1872_v14 = vpop.f32.mrf.mxu0  ;;  %v1960_v18 = vpop.permute.xlu0 %1959 }
 0x399   : >> { %v7969_v6 = vadd.f32 %v1872_v14, %v1667_v17  ;;  %v2028_v27 = vsel %vm245_vm0, %v5593_v16, %v1960_v18 }
 0x39a   : >> { %v2036_v11 = vsel %vm932_vm5, %v2028_v27, %v2008_v61  ;;  %v5595_v27 = vld [vmem:[%s6811_s28 + $0x110] sm:$0xff] }
 0x39b   : >> { %5169 = vmatmul.msk.f32.gmra.mxu1 %vm1094_vm6, %v2036_v11 }
 0x39d   : >> { %v1652_v55 = vpop.f32.mrf.mxu3 }
 0x39e   : >> { %v1668_v34 = vadd.f32 %v1652_v55, %v1444_v54  ;;  %v2459_v52 = vpop.permute.xlu2 %2458 }
 0x39f   : >> { %v2409_v28 = vpop.permute.xlu1 %2408 }
 0x3a0   : >> { %v2234_v44 = vpop.permute.xlu0 %2233  ;;  %v2476_v30 = vsel %vm245_vm0, %v7631_v33, %v2409_v28 }
 0x3a1   : >> { %v2261_v24 = vsel %vm932_vm5, %v2253_v58, %v2234_v44 }
 0x3a2   : >> { %5197 = vmatmul.msk.f32.gmra.mxu2 %vm1094_vm6, %v2261_v24 }
 0x3a5   : >> { %v1431_v0 = vpop.f32.mrf.mxu2 }
 0x3a6   : >> { %v1445_v41 = vadd.f32 %v1431_v0, %v7895_v37  ;;  %v1875_v5 = vpop.f32.mrf.mxu0  ;;  %v2012_v3 = vpop.permute.xlu2 %2011 }
 0x3a7   : >> { %v7982_v45 = vadd.f32 %v1875_v5, %v1668_v34  ;;  %v2678_v51 = vpop.permute.xlu1 %2677 }
 0x3a8   : >> { %v2457_v57 = vpop.permute.xlu0 %2456  ;;  %v2706_v53 = vsel %vm932_vm5, %v2698_v48, %v2678_v51 }
 0x3a9   : >> { %v2484_v4 = vsel %vm932_vm5, %v2476_v30, %v2457_v57  ;;  %5250 = vmatmul.msk.f32.gmra.mxu0 %vm1094_vm6, %v2706_v53 }
 0x3aa   : >> { %5224 = vmatmul.msk.f32.gmra.mxu3 %vm1094_vm6, %v2484_v4 }
 0x3ad   : >> { %v1434_v13 = vpop.f32.mrf.mxu2  ;;  %v1655_v59 = vpop.f32.mrf.mxu3 }
 0x3ae   : >> { %v1446_v37 = vadd.f32 %v1434_v13, %v7925_v40  ;;  %v1669_v54 = vadd.f32 %v1655_v59, %v1445_v41  ;;  %v2413_v61 = vpop.permute.xlu2 %2412  ;;  %v1202_v59 = vadd.f32 %v7774_v32, %v7765_v15 }
 0x3af   : >> { %v2188_v36 = vpop.permute.xlu1 %2187  ;;  %v2478_v5 = vsel %vm245_vm0, %v7790_v38, %v2413_v61 }
 0x3b0   : >> { %v2254_v26 = vsel %vm245_vm0, %v7631_v33, %v2188_v36  ;;  %v2010_v8 = vpop.permute.xlu0 %2009  ;;  %v5596_v36 = vld [vmem:[%s6811_s28 + $0x120] sm:$0xff]  ;;  %s8057_s28 = scalar_lea.vmem [#allocation3], %s792_s8  ;;  %s8100_s8 = smov (%p788_p6), 0  }
 0x3b1   : >> { %v2037_v43 = vsel %vm932_vm5, %v2029_v12, %v2010_v8  ;;  %v2262_v19 = vsel %vm932_vm5, %v2254_v26, %v2236_v62 }
 0x3b2   : >> { %5170 = vmatmul.msk.f32.gmra.mxu1 %vm1094_vm6, %v2037_v43  ;;  %5198 = vmatmul.msk.f32.gmra.mxu2 %vm1094_vm6, %v2262_v19 }
 0x3b6   : >> { %v1658_v20 = vpop.f32.mrf.mxu3  ;;  %v2682_v0 = vpop.permute.xlu2 %2681 }
 0x3b7   : >> { %v1670_v40 = vadd.f32 %v1658_v20, %v1446_v37  ;;  %v1878_v21 = vpop.f32.mrf.mxu0  ;;  %v2632_v39 = vpop.permute.xlu1 %2631  ;;  %v1440_v37 = vadd.f32 %v7859_v60, %v1202_v59 }
 0x3b8   : >> { %v7999_v63 = vadd.f32 %v1878_v21, %v1669_v54  ;;  %v2411_v42 = vpop.permute.xlu0 %2410  ;;  %v2699_v16 = vsel %vm245_vm0, %v7730_v31, %v2632_v39 }
 0x3b9   : >> { %v2477_v33 = vsel %vm245_vm0, %v7730_v31, %v2411_v42  ;;  %v1664_v54 = vadd.f32 %v7917_v10, %v1440_v37 }
 0x3ba   : >> { %v2485_v47 = vsel %vm932_vm5, %v2477_v33, %v2459_v52  ;;  %v8046_v33 = vperm.slane %v5876_v1, 0 }
 0x3bb   : >> { %5225 = vmatmul.msk.f32.gmra.mxu3 %vm1094_vm6, %v2485_v47 }
 0x3bc   : >> { %v1437_v17 = vpop.f32.mrf.mxu2 }
 0x3bd   : >> { %v1447_v49 = vadd.f32 %v1437_v17, %v1223_v29 }
 0x3be   : >> { %v2192_v52 = vpop.permute.xlu2 %2191 }
 0x3bf   : >> { %v1964_v14 = vpop.permute.xlu1 %1963  ;;  %v2256_v32 = vsel %vm245_vm0, %v7790_v38, %v2192_v52 }
 0x3c0   : >> { %v1881_v18 = vpop.f32.mrf.mxu0  ;;  %v2030_v11 = vsel %vm245_vm0, %v5595_v27, %v1964_v14  ;;  %v2680_v34 = vpop.permute.xlu0 %2679 }
 0x3c1   : >> { %v8010_v55 = vadd.f32 %v1881_v18, %v1670_v40  ;;  %v2707_v9 = vsel %vm932_vm5, %v2699_v16, %v2680_v34  ;;  %v2038_v58 = vsel %vm932_vm5, %v2030_v11, %v2012_v3  ;;  %v1887_v3 = vadd.f32 %v7940_v22, %v1664_v54 }
 0x3c2   : >> { %5251 = vmatmul.msk.f32.gmra.mxu0 %vm1094_vm6, %v2707_v9  ;;  %5171 = vmatmul.msk.f32.gmra.mxu1 %vm1094_vm6, %v2038_v58 }
 0x3c4   : >> { %v1661_v28 = vpop.f32.mrf.mxu3 }
 0x3c5   : >> { %v1671_v44 = vadd.f32 %v1661_v28, %v1447_v49 }
 0x3c6   : >> { %v2636_v19 = vpop.permute.xlu2 %2635 }
 0x3c7   : >> { %v2238_v62 = vpop.permute.xlu1 %2237  ;;  %v2701_v22 = vsel %vm245_vm0, %v7856_v46, %v2636_v19 }
 0x3c8   : >> { %v2190_v24 = vpop.permute.xlu0 %2189 }
 0x3c9   : >> { %v2255_v48 = vsel %vm245_vm0, %v7730_v31, %v2190_v24 }
 0x3ca   : >> { %v2263_v41 = vsel %vm932_vm5, %v2255_v48, %v2238_v62 }
 0x3cb   : >> { %5199 = vmatmul.msk.f32.gmra.mxu2 %vm1094_vm6, %v2263_v41 }
 0x3ce   : >> { %v1884_v51 = vpop.f32.mrf.mxu0  ;;  %v2310_v20 = vpop.f32.mrf.mxu2 }
 0x3cf   : >> { %v8022_v30 = vadd.f32 %v1884_v51, %v1671_v44  ;;  %v2461_v57 = vpop.permute.xlu1 %2460  ;;  %v1968_v39 = vpop.permute.xlu2 %1967 }
 0x3d0   : >> { %v2634_v53 = vpop.permute.xlu0 %2633  ;;  %v2486_v4 = vsel %vm932_vm5, %v2478_v5, %v2461_v57 }
 0x3d1   : >> { %v2700_v13 = vsel %vm245_vm0, %v7790_v38, %v2634_v53  ;;  %5226 = vmatmul.msk.f32.gmra.mxu3 %vm1094_vm6, %v2486_v4 }
 0x3d2   : >> { %v2708_v31 = vsel %vm932_vm5, %v2700_v13, %v2682_v0 }
 0x3d3   : >> { %5252 = vmatmul.msk.f32.gmra.mxu0 %vm1094_vm6, %v2708_v31 }
 0x3d6   : >> { %v2533_v50 = vpop.f32.mrf.mxu3 }
 0x3d7   : >> { %v2014_v23 = vpop.permute.xlu1 %2013  ;;  %v2686_v27 = vpop.permute.xlu2 %2685 }
 0x3d8   : >> { %v1966_v12 = vpop.permute.xlu0 %1965  ;;  %v2086_v8 = vpop.f32.mrf.mxu1 }
 0x3d9   : >> { %v2031_v26 = vsel %vm245_vm0, %v5596_v36, %v1966_v12  ;;  %v2110_v15 = vadd.f32 %v2086_v8, %v1887_v3 }
 0x3da   : >> { %v2039_v43 = vsel %vm932_vm5, %v2031_v26, %v2014_v23 }
 0x3db   : >> { %5172 = vmatmul.msk.f32.gmra.mxu1 %vm1094_vm6, %v2039_v43  ;;  %v2334_v40 = vadd.f32 %v2310_v20, %v2110_v15 }
 0x3dd   : >> { %v2557_v42 = vadd.f32 %v2533_v50, %v2334_v40 }
 0x3df   : >> { %v2415_v60 = vpop.permute.xlu1 %2414 }
 0x3e0   : >> { %v2240_v10 = vpop.permute.xlu0 %2239  ;;  %v2479_v17 = vsel %vm245_vm0, %v7856_v46, %v2415_v60  ;;  %v2032_v46 = vsel %vm245_vm0, %v7901_v56, %v1968_v39 }
 0x3e1   : >> { %v2264_v21 = vsel %vm932_vm5, %v2256_v32, %v2240_v10 }
 0x3e2   : >> { %5200 = vmatmul.msk.f32.gmra.mxu2 %vm1094_vm6, %v2264_v21 }
 0x3e5   : >> { %v2313_v24 = vpop.f32.mrf.mxu2 }
 0x3e6   : >> { %v2756_v29 = vpop.f32.mrf.mxu0 }
 0x3e7   : >> { %v2780_v38 = vadd.f32 %v2756_v29, %v2557_v42  ;;  %v2684_v47 = vpop.permute.xlu1 %2683 }
 0x3e8   : >> { %v2463_v49 = vpop.permute.xlu0 %2462  ;;  %v2709_v61 = vsel %vm932_vm5, %v2701_v22, %v2684_v47 }
 0x3e9   : >> { %v2791_v14 = vadd.f32 %v8046_v33, %v2780_v38  ;;  %v2487_v18 = vsel %vm932_vm5, %v2479_v17, %v2463_v49  ;;  %5253 = vmatmul.msk.f32.gmra.mxu0 %vm1094_vm6, %v2709_v61 }
 0x3ea   : >> { %5227 = vmatmul.msk.f32.gmra.mxu3 %vm1094_vm6, %v2487_v18 }
 0x3eb   : >> { %v2799_v16 = vmax.f32 %v2791_v14, 0.0 }
 0x3ed   : >> { %5255 = vst.msk [vmem:[%s8057_s28 + $0xb1] sm:$0xff] %vm245_vm0, %v2799_v16  ;;  %v2536_v0 = vpop.f32.mrf.mxu3 }
 0x3ef   : >> { %v2638_v11 = vpop.permute.xlu1 %2637  ;;  %v2089_v44 = vpop.f32.mrf.mxu1 }
 0x3f0   : >> { %v2016_v34 = vpop.permute.xlu0 %2015  ;;  %v2702_v9 = vsel %vm245_vm0, %v7912_v7, %v2638_v11  ;;  %v2111_v62 = vadd.f32 %v2089_v44, %v7952_v35 }
 0x3f1   : >> { %v2040_v58 = vsel %vm932_vm5, %v2032_v46, %v2016_v34  ;;  %v2710_v28 = vsel %vm932_vm5, %v2702_v9, %v2686_v27 }
 0x3f2   : >> { %5173 = vmatmul.msk.f32.gmra.mxu1 %vm1094_vm6, %v2040_v58  ;;  %5254 = vmatmul.msk.f32.gmra.mxu0 %vm1094_vm6, %v2710_v28  ;;  %v2335_v56 = vadd.f32 %v2313_v24, %v2111_v62 }
 0x3f4   : >> { %v2558_v48 = vadd.f32 %v2536_v0, %v2335_v56 }
 0x3f5   : >> { %v2316_v4 = vpop.f32.mrf.mxu2 }
 0x3fe   : >> { %v2539_v13 = vpop.f32.mrf.mxu3 }
 0x3ff   : >> { %v2759_v41 = vpop.f32.mrf.mxu0  ;;  %v2092_v57 = vpop.f32.mrf.mxu1 }
 0x400   : >> { %v2781_v5 = vadd.f32 %v2759_v41, %v2558_v48  ;;  %v2112_v53 = vadd.f32 %v2092_v57, %v7961_v25 }
 0x402   : >> { %v2792_v7 = vadd.f32 %v8046_v33, %v2781_v5  ;;  %v2336_v52 = vadd.f32 %v2316_v4, %v2112_v53 }
 0x404   : >> { %v2800_v51 = vmax.f32 %v2792_v7, 0.0  ;;  %v2559_v31 = vadd.f32 %v2539_v13, %v2336_v52 }
 0x406   : >> { %5256 = vst.msk [vmem:[%s8057_s28 + $0xc1] sm:$0xff] %vm245_vm0, %v2800_v51 }
 0x40e   : >> { %v2319_v36 = vpop.f32.mrf.mxu2 }
 0x410   : >> { %v2762_v35 = vpop.f32.mrf.mxu0 }
 0x411   : >> { %v2782_v59 = vadd.f32 %v2762_v35, %v2559_v31 }
 0x413   : >> { %v2793_v37 = vadd.f32 %v8046_v33, %v2782_v59 }
 0x414   : >> { %v2542_v8 = vpop.f32.mrf.mxu3 }
 0x415   : >> { %v2801_v54 = vmax.f32 %v2793_v37, 0.0 }
 0x417   : >> { %5257 = vst.msk [vmem:[%s8057_s28 + $0xd1] sm:$0xff] %vm245_vm0, %v2801_v54 }
 0x418   : >> { %v2095_v23 = vpop.f32.mrf.mxu1 }
 0x419   : >> { %v2113_v12 = vadd.f32 %v2095_v23, %v7969_v6 }
 0x41b   : >> { %v2337_v26 = vadd.f32 %v2319_v36, %v2113_v12 }
 0x41d   : >> { %v2560_v43 = vadd.f32 %v2542_v8, %v2337_v26 }
 0x425   : >> { %v2322_v20 = vpop.f32.mrf.mxu2 }
 0x426   : >> { %v2765_v25 = vpop.f32.mrf.mxu0 }
 0x427   : >> { %v2783_v19 = vadd.f32 %v2765_v25, %v2560_v43 }
 0x429   : >> { %v2794_v3 = vadd.f32 %v8046_v33, %v2783_v19 }
 0x42b   : >> { %v2802_v15 = vmax.f32 %v2794_v3, 0.0 }
 0x42d   : >> { %5258 = vst.msk [vmem:[%s8057_s28 + $0xe1] sm:$0xff] %vm245_vm0, %v2802_v15  ;;  %v2545_v40 = vpop.f32.mrf.mxu3 }
 0x42f   : >> { %v2098_v32 = vpop.f32.mrf.mxu1 }
 0x430   : >> { %v2114_v60 = vadd.f32 %v2098_v32, %v7982_v45 }
 0x432   : >> { %v2338_v10 = vadd.f32 %v2322_v20, %v2114_v60 }
 0x434   : >> { %v2561_v21 = vadd.f32 %v2545_v40, %v2338_v10 }
 0x435   : >> { %v2325_v38 = vpop.f32.mrf.mxu2 }
 0x43e   : >> { %v2548_v17 = vpop.f32.mrf.mxu3 }
 0x43f   : >> { %v2768_v6 = vpop.f32.mrf.mxu0  ;;  %v2101_v42 = vpop.f32.mrf.mxu1 }
 0x440   : >> { %v2784_v50 = vadd.f32 %v2768_v6, %v2561_v21  ;;  %v2115_v29 = vadd.f32 %v2101_v42, %v7999_v63 }
 0x442   : >> { %v2795_v39 = vadd.f32 %v8046_v33, %v2784_v50  ;;  %v2339_v47 = vadd.f32 %v2325_v38, %v2115_v29 }
 0x444   : >> { %v2803_v22 = vmax.f32 %v2795_v39, 0.0  ;;  %v2562_v49 = vadd.f32 %v2548_v17, %v2339_v47 }
 0x446   : >> { %5259 = vst.msk [vmem:[%s8057_s28 + $0xf1] sm:$0xff] %vm245_vm0, %v2803_v22 }
 0x44e   : >> { %v2328_v27 = vpop.f32.mrf.mxu2 }
 0x450   : >> { %v2771_v45 = vpop.f32.mrf.mxu0 }
 0x451   : >> { %v2785_v61 = vadd.f32 %v2771_v45, %v2562_v49 }
 0x453   : >> { %v2796_v14 = vadd.f32 %v8046_v33, %v2785_v61 }
 0x454   : >> { %v2551_v34 = vpop.f32.mrf.mxu3 }
 0x455   : >> { %v2804_v18 = vmax.f32 %v2796_v14, 0.0 }
 0x457   : >> { %5260 = vst.msk [vmem:[%s8057_s28 + $0x101] sm:$0xff] %vm245_vm0, %v2804_v18 }
 0x458   : >> { %v2104_v16 = vpop.f32.mrf.mxu1 }
 0x459   : >> { %v2116_v46 = vadd.f32 %v2104_v16, %v8010_v55 }
 0x45b   : >> { %v2340_v11 = vadd.f32 %v2328_v27, %v2116_v46 }
 0x45d   : >> { %v2563_v9 = vadd.f32 %v2551_v34, %v2340_v11 }
 0x465   : >> { %v2331_v56 = vpop.f32.mrf.mxu2 }
 0x466   : >> { %v2774_v63 = vpop.f32.mrf.mxu0 }
 0x467   : >> { %v2786_v58 = vadd.f32 %v2774_v63, %v2563_v9 }
 0x469   : >> { %v2797_v28 = vadd.f32 %v8046_v33, %v2786_v58 }
 0x46b   : >> { %v2805_v44 = vmax.f32 %v2797_v28, 0.0 }
 0x46d   : >> { %5261 = vst.msk [vmem:[%s8057_s28 + $0x111] sm:$0xff] %vm245_vm0, %v2805_v44  ;;  %v2554_v48 = vpop.f32.mrf.mxu3 }
 0x46f   : >> { %v2107_v62 = vpop.f32.mrf.mxu1  ;;  %v2777_v41 = vpop.f32.mrf.mxu0 }
 0x470   : >> { %v2117_v24 = vadd.f32 %v2107_v62, %v8022_v30 }
 0x472   : >> { %v2341_v0 = vadd.f32 %v2331_v56, %v2117_v24 }
 0x474   : >> { %v2564_v55 = vadd.f32 %v2554_v48, %v2341_v0 }
 0x476   : >> { %v2787_v5 = vadd.f32 %v2777_v41, %v2564_v55 }
 0x478   : >> { %v2798_v7 = vadd.f32 %v8046_v33, %v2787_v5  ;;  %790 = sbr.rel (!%p788_p6) target bundleno = 506 (0x1fa), region = 144 }
 0x47a   : >> { %v2806_v51 = vmax.f32 %v2798_v7, 0.0 }
 0x47c   : >> { %5262 = vst.msk [vmem:[%s8057_s28 + $0x121] sm:$0xff] %vm245_vm0, %v2806_v51 }
 0x47d LB: >> { %s2822_s9 = smul.u32 160, %s5722_s8  ;;  %s5729_s26 = smov 8   ;;  %s5722_s8 = sphi %s8100_s8, %s2821_s8  }
 0x47e   : >> { %s5730_s15 = smov 16  }
 0x47f   : >> { %s8106_s10 = scalar_lea.vmem [#allocation3], %s2822_s9 }
 0x483   : >> { %v8109_v1 = vld [vmem:[%s8106_s10 + $0x40] sm:$0xff]  ;;  %v8112_v30 = vld [vmem:[%s8106_s10 + $0x48] sm:$0x3]  ;;  %v8131_v37 = vld [vmem:[%s8106_s10 + $0x50] sm:$0xff] }
 0x484   : >> { %v8115_v33 = vld [vmem:[%s8106_s10 + $0x20] sm:$0xff]  ;;  %v8118_v57 = vrot.slane %v8109_v1, 1  ;;  %v2870_v53 = vrot.slane %v8112_v30, 1  ;;  %v2829_v4 = vld [vmem:[%s8106_s10 + $0x28] sm:$0x3]  ;;  %v8137_v36 = vld [vmem:[%s8106_s10 + $0x30] sm:$0xff] }
 0x485   : >> { %v8123_v52 = vrot.slane %v8115_v33, 1  ;;  %v8126_v13 = vld [vmem:[%s8106_s10] sm:$0xff]  ;;  %v2864_v31 = vrot.slane %v2829_v4, 1  ;;  %v2825_v35 = vld [vmem:[%s8106_s10 + $0x8] sm:$0x3]  ;;  %v8144_v43 = vld [vmem:[%s8106_s10 + $0x10] sm:$0xff] }
 0x486   : >> { %v2857_v59 = vrot.slane %v8126_v13, 1  ;;  %v2871_v54 = vsel %vm826_vm3, %v8118_v57, %v2870_v53  ;;  %v2858_v23 = vrot.slane %v2825_v35, 1  ;;  %v2835_v12 = vld [vmem:[%s8106_s10 + $0x58] sm:$0x3]  ;;  %v8150_v3 = vrot.slane %v8131_v37, 1  ;;  %v8163_v50 = vld [vmem:[%s8106_s10 + $0x70] sm:$0xff] }
 0x487   : >> { %v2831_v26 = vld [vmem:[%s8106_s10 + $0x38] sm:$0x3]  ;;  %2889 = vrot.lane.b32.xlu2 %v2871_v54, %s5729_s26  ;;  %v2865_v8 = vsel %vm826_vm3, %v8123_v52, %v2864_v31  ;;  %v2873_v15 = vrot.slane %v2835_v12, 1  ;;  %v8154_v32 = vrot.slane %v8137_v36, 1  ;;  %v2860_v20 = vrot.slane %v8144_v43, 1  ;;  %v8168_v22 = vld [vmem:[%s8106_s10 + $0x60] sm:$0xff] }
 0x488   : >> { %v2827_v25 = vld [vmem:[%s8106_s10 + $0x18] sm:$0x3]  ;;  %2885 = vrot.lane.b32.xlu1 %v2865_v8, %s5729_s26  ;;  %v2859_v19 = vsel %vm826_vm3, %v2857_v59, %v2858_v23  ;;  %v2867_v60 = vrot.slane %v2831_v26, 1  ;;  %v2837_v42 = vld [vmem:[%s8106_s10 + $0x68] sm:$0x3]  ;;  %v2906_v29 = vrot.slane %v8126_v13, 2 }
 0x489   : >> { %2881 = vrot.lane.b32.xlu0 %v2859_v19, %s5729_s26  ;;  %v2861_v10 = vrot.slane %v2827_v25, 1  ;;  %v2874_v40 = vsel %vm826_vm3, %v8150_v3, %v2873_v15  ;;  %v2839_v39 = vld [vmem:[%s8106_s10 + $0x78] sm:$0x3]  ;;  %v2907_v38 = vrot.slane %v2825_v35, 2  ;;  %v8175_v47 = vrot.slane %v8163_v50, 1 }
 0x48a   : >> { %v2868_v21 = vsel %vm826_vm3, %v8154_v32, %v2867_v60  ;;  %v2879_v17 = vrot.slane %v2839_v39, 1  ;;  %v8178_v49 = vrot.slane %v8168_v22, 1  ;;  %v2876_v45 = vrot.slane %v2837_v42, 1  ;;  %v5266_v5 = vld [vmem:[%s8106_s10 + $0x28] sm:$0x3] }
 0x48b   : >> { %v2862_v6 = vsel %vm826_vm3, %v2860_v20, %v2861_v10  ;;  %v2908_v61 = vsel %vm875_vm4, %v2906_v29, %v2907_v38  ;;  %v8188_v16 = vrot.slane %v8137_v36, 2  ;;  %v2916_v46 = vrot.slane %v2831_v26, 2  ;;  %v5264_v51 = vld [vmem:[%s8106_s10 + $0x18] sm:$0x3]  ;;  %v5278_v10 = vld [vmem:[%s8106_s10 + $0x88] sm:$0x3] }
 0x48c   : >> { %v2880_v14 = vsel %vm826_vm3, %v8175_v47, %v2879_v17  ;;  %v2877_v18 = vsel %vm826_vm3, %v8178_v49, %v2876_v45  ;;  %v8192_v27 = vrot.slane %v8115_v33, 2  ;;  %v2913_v11 = vrot.slane %v2829_v4, 2  ;;  %v5272_v54 = vld [vmem:[%s8106_s10 + $0x58] sm:$0x3] }
 0x48d   : >> { %v2909_v34 = vrot.slane %v8144_v43, 2  ;;  %v2910_v9 = vrot.slane %v2827_v25, 2  ;;  %v2917_v63 = vsel %vm875_vm4, %v8188_v16, %v2916_v46  ;;  %v8205_v44 = vrot.slane %v8168_v22, 2  ;;  %v5268_v26 = vld [vmem:[%s8106_s10 + $0x38] sm:$0x3] }
 0x48e   : >> { %v2914_v58 = vsel %vm875_vm4, %v8192_v27, %v2913_v11  ;;  %v2925_v62 = vrot.slane %v2837_v42, 2  ;;  %v8209_v24 = vrot.slane %v8131_v37, 2  ;;  %v2922_v56 = vrot.slane %v2835_v12, 2  ;;  %v5270_v12 = vld [vmem:[%s8106_s10 + $0x48] sm:$0x3] }
 0x48f   : >> { %2891 = vrot.lane.b32.xlu2 %v2874_v40, %s5729_s26  ;;  %v2911_v28 = vsel %vm875_vm4, %v2909_v34, %v2910_v9  ;;  %v8212_v0 = vrot.slane %v8109_v1, 2  ;;  %v2919_v48 = vrot.slane %v8112_v30, 2  ;;  %v3012_v53 = vrot.slane %v5266_v5, 1 }
 0x490   : >> { %2887 = vrot.lane.b32.xlu1 %v2868_v21, %s5729_s26  ;;  %v2926_v41 = vsel %vm875_vm4, %v8205_v44, %v2925_v62  ;;  %v2923_v55 = vsel %vm875_vm4, %v8209_v24, %v2922_v56  ;;  %v3009_v30 = vrot.slane %v5264_v51, 1  ;;  %v8227_v4 = vrot.slane %v8163_v50, 2  ;;  %v5276_v21 = vld [vmem:[%s8106_s10 + $0x78] sm:$0x3] }
 0x491   : >> { %2883 = vrot.lane.b32.xlu0 %v2862_v6, %s5729_s26  ;;  %v2920_v7 = vsel %vm875_vm4, %v8212_v0, %v2919_v48  ;;  %v2928_v31 = vrot.slane %v2839_v39, 2  ;;  %v3013_v35 = vsel %vm826_vm3, %v8123_v52, %v3012_v53  ;;  %v3021_v8 = vrot.slane %v5272_v54, 1  ;;  %v5274_v6 = vld [vmem:[%s8106_s10 + $0x68] sm:$0x3] }
 0x492   : >> { %v3010_v59 = vsel %vm826_vm3, %v2860_v20, %v3009_v30  ;;  %v3018_v25 = vrot.slane %v5270_v12, 1  ;;  %v3015_v19 = vrot.slane %v5268_v26, 1  ;;  %v8245_v20 = vld [vmem:[%s8106_s10 + $0x80] sm:$0xff]  ;;  %v3030_v42 = vrot.slane %v5278_v10, 1 }
 0x493   : >> { %v2929_v23 = vsel %vm875_vm4, %v8227_v4, %v2928_v31  ;;  %v3022_v15 = vsel %vm826_vm3, %v8150_v3, %v3021_v8  ;;  %v3029_v39 = vrot.slane %v8245_v20, 1  ;;  %v3027_v29 = vrot.slane %v5276_v21, 1  ;;  %v8291_v31 = vld [vmem:[%s8106_s10 + $0x58] sm:$0x3] }
 0x494   : >> { %v3019_v60 = vsel %vm826_vm3, %v8118_v57, %v3018_v25  ;;  %v3016_v40 = vsel %vm826_vm3, %v8154_v32, %v3015_v19  ;;  %v3024_v38 = vrot.slane %v5274_v6, 1  ;;  %v3057_v46 = vrot.slane %v5264_v51, 2  ;;  %v8306_v25 = vld [vmem:[%s8106_s10 + $0x88] sm:$0x3] }
 0x495   : >> { %v3031_v17 = vsel %vm826_vm3, %v3029_v39, %v3030_v42  ;;  %v3028_v45 = vsel %vm826_vm3, %v8175_v47, %v3027_v29  ;;  %v3066_v62 = vrot.slane %v5270_v12, 2  ;;  %v3075_v51 = vrot.slane %v5276_v21, 2  ;;  %v8331_v42 = vld [vmem:[%s8106_s10 + $0x90] sm:$0xff]  ;;  %v8334_v29 = vld [vmem:[%s8106_s10 + $0x98] sm:$0x3] }
 0x497   : >> { %2930 = vrot.lane.b32.xlu2 %v2908_v61, %s5730_s15  ;;  %v3025_v61 = vsel %vm826_vm3, %v8178_v49, %v3024_v38 }
 0x498   : >> { %2895 = vrot.lane.b32.xlu1 %v2880_v14, %s5729_s26  ;;  %v3063_v14 = vrot.slane %v5268_v26, 2 }
 0x499   : >> { %2893 = vrot.lane.b32.xlu0 %v2877_v18, %s5729_s26  ;;  %v3060_v18 = vrot.slane %v5266_v5, 2  ;;  %v3077_v5 = vrot.slane %v8245_v20, 2 }
 0x49a   : >> { %v3064_v11 = vsel %vm875_vm4, %v8188_v16, %v3063_v14  ;;  %v8347_v14 = vld [vmem:[%s8106_s10 + $0xa0] sm:$0xff] }
 0x49b   : >> { %v3061_v9 = vsel %vm875_vm4, %v8192_v27, %v3060_v18  ;;  %v5326_v18 = vld [vmem:[%s8106_s10 + $0xa8] sm:$0x3] }
 0x49f   : >> { %2936 = vrot.lane.b32.xlu2 %v2917_v63, %s5730_s15  ;;  %v3058_v63 = vsel %vm875_vm4, %v2909_v34, %v3057_v46  ;;  %v3067_v34 = vsel %vm875_vm4, %v8212_v0, %v3066_v62 }
 0x4a0   : >> { %2934 = vrot.lane.b32.xlu1 %v2914_v58, %s5730_s15  ;;  %v3072_v58 = vrot.slane %v5274_v6, 2 }
 0x4a1   : >> { %2932 = vrot.lane.b32.xlu0 %v2911_v28, %s5730_s15  ;;  %v3069_v28 = vrot.slane %v5272_v54, 2  ;;  %v5301_v54 = vld [vmem:[%s8106_s10 + $0x38] sm:$0x3] }
 0x4a2   : >> { %v3073_v56 = vsel %vm875_vm4, %v8205_v44, %v3072_v58  ;;  %v3293_v12 = vrot.slane %v5301_v54, 1  ;;  %v3341_v38 = vrot.slane %v5301_v54, 2 }
 0x4a3   : >> { %v3070_v48 = vsel %vm875_vm4, %v8209_v24, %v3069_v28 }
 0x4a4   : >> { %v3294_v19 = vsel %vm826_vm3, %v8154_v32, %v3293_v12  ;;  %v8380_v12 = vld [vmem:[%s8106_s10 + $0xc0] sm:$0xff] }
 0x4a7   : >> { %2942 = vrot.lane.b32.xlu2 %v2926_v41, %s5730_s15  ;;  %v5299_v41 = vld [vmem:[%s8106_s10 + $0x28] sm:$0x3] }
 0x4a8   : >> { %2940 = vrot.lane.b32.xlu1 %v2923_v55, %s5730_s15  ;;  %v3290_v55 = vrot.slane %v5299_v41, 1 }
 0x4a9   : >> { %2938 = vrot.lane.b32.xlu0 %v2920_v7, %s5730_s15  ;;  %v3078_v7 = vrot.slane %v5278_v10, 2 }
 0x4aa   : >> { %v3291_v53 = vsel %vm826_vm3, %v8123_v52, %v3290_v55 }
 0x4ab   : >> { %v3079_v30 = vsel %vm875_vm4, %v3077_v5, %v3078_v7 }
 0x4af   : >> { %3034 = vrot.lane.b32.xlu2 %v3013_v35, %s5729_s26  ;;  %v3076_v35 = vsel %vm875_vm4, %v8227_v4, %v3075_v51 }
 0x4b0   : >> { %3032 = vrot.lane.b32.xlu1 %v3010_v59, %s5729_s26  ;;  %v5303_v59 = vld [vmem:[%s8106_s10 + $0x48] sm:$0x3] }
 0x4b1   : >> { %2944 = vrot.lane.b32.xlu0 %v2929_v23, %s5730_s15  ;;  %v3299_v23 = vrot.slane %v8291_v31, 1  ;;  %v3296_v52 = vrot.slane %v5303_v59, 1  ;;  %v3344_v58 = vrot.slane %v5303_v59, 2 }
 0x4b3   : >> { %v3300_v26 = vsel %vm826_vm3, %v8150_v3, %v3299_v23  ;;  %v3297_v8 = vsel %vm826_vm3, %v8118_v57, %v3296_v52  ;;  %v3308_v3 = vrot.slane %v8306_v25, 1 }
 0x4b5   : >> { %v3309_v32 = vsel %vm826_vm3, %v3029_v39, %v3308_v3  ;;  %v3338_v39 = vrot.slane %v5299_v41, 2  ;;  %v3345_v41 = vsel %vm875_vm4, %v8212_v0, %v3344_v58 }
 0x4b7   : >> { %3040 = vrot.lane.b32.xlu2 %v3022_v15, %s5729_s26  ;;  %v8311_v15 = vld [vmem:[%s8106_s10 + $0x78] sm:$0x3] }
 0x4b8   : >> { %3038 = vrot.lane.b32.xlu1 %v3019_v60, %s5729_s26  ;;  %v8315_v60 = vld [vmem:[%s8106_s10 + $0x68] sm:$0x3]  ;;  %v3305_v10 = vrot.slane %v8311_v15, 1 }
 0x4b9   : >> { %3036 = vrot.lane.b32.xlu0 %v3016_v40, %s5729_s26  ;;  %v3302_v40 = vrot.slane %v8315_v60, 1 }
 0x4ba   : >> { %v3306_v21 = vsel %vm826_vm3, %v8175_v47, %v3305_v10  ;;  %v3311_v47 = vrot.slane %v8334_v29, 1 }
 0x4bb   : >> { %v3303_v6 = vsel %vm826_vm3, %v8178_v49, %v3302_v40  ;;  %v3342_v49 = vsel %vm875_vm4, %v8188_v16, %v3341_v38 }
 0x4bf   : >> { %3046 = vrot.lane.b32.xlu2 %v3031_v17, %s5729_s26 }
 0x4c0   : >> { %3044 = vrot.lane.b32.xlu1 %v3028_v45, %s5729_s26  ;;  %v3310_v45 = vrot.slane %v8331_v42, 1 }
 0x4c1   : >> { %3042 = vrot.lane.b32.xlu0 %v3025_v61, %s5729_s26  ;;  %v3339_v61 = vsel %vm875_vm4, %v8192_v27, %v3338_v39  ;;  %v3514_v27 = vrot.slane %v5326_v18, 1 }
 0x4c2   : >> { %v3312_v46 = vsel %vm826_vm3, %v3310_v45, %v3311_v47  ;;  %v5355_v47 = vld [vmem:[%s8106_s10 + $0xc8] sm:$0x3] }
 0x4c7   : >> { %3084 = vrot.lane.b32.xlu2 %v3064_v11, %s5730_s15  ;;  %v3561_v11 = vrot.slane %v8347_v14, 2 }
 0x4c8   : >> { %3082 = vrot.lane.b32.xlu1 %v3061_v9, %s5730_s15  ;;  %v3562_v9 = vrot.slane %v5326_v18, 2  ;;  %v3788_v18 = vrot.slane %v5355_v47, 2 }
 0x4c9   : >> { %3080 = vrot.lane.b32.xlu0 %v3058_v63, %s5730_s15  ;;  %v3513_v63 = vrot.slane %v8347_v14, 1 }
 0x4ca   : >> { %v3563_v28 = vsel %vm875_vm4, %v3561_v11, %v3562_v9  ;;  %v5280_v9 = vld [vmem:[%s9451_s3 + $0x20] sm:$0xff] }
 0x4cb   : >> { %v3515_v62 = vsel %vm826_vm3, %v3513_v63, %v3514_v27  ;;  %v3740_v63 = vrot.slane %v5355_v47, 1  ;;  %v3350_v47 = vrot.slane %v8315_v60, 2 }
 0x4cd   : >> { %v3351_v60 = vsel %vm875_vm4, %v8205_v44, %v3350_v47 }
 0x4cf   : >> { %3090 = vrot.lane.b32.xlu2 %v3073_v56, %s5730_s15  ;;  %v8359_v56 = vld [vmem:[%s8106_s10 + $0xb0] sm:$0xff] }
 0x4d0   : >> { %3088 = vrot.lane.b32.xlu1 %v3070_v48, %s5730_s15  ;;  %v5353_v48 = vld [vmem:[%s8106_s10 + $0xb8] sm:$0x3]  ;;  %v3516_v55 = vrot.slane %v8359_v56, 1  ;;  %v3784_v3 = vrot.slane %v8359_v56, 2 }
 0x4d1   : >> { %3086 = vrot.lane.b32.xlu0 %v3067_v34, %s5730_s15  ;;  %v5328_v34 = vld [vmem:[%s8106_s10 + $0xb8] sm:$0x3]  ;;  %v3737_v7 = vrot.slane %v5353_v48, 1  ;;  %v3785_v10 = vrot.slane %v5353_v48, 2 }
 0x4d3   : >> { %v3738_v54 = vsel %vm826_vm3, %v3516_v55, %v3737_v7  ;;  %v3786_v45 = vsel %vm875_vm4, %v3784_v3, %v3785_v10 }
 0x4d7   : >> { %3313 = vrot.lane.b32.xlu2 %v3291_v53, %s5729_s26  ;;  %v3517_v53 = vrot.slane %v5328_v34, 1 }
 0x4d8   : >> { %3094 = vrot.lane.b32.xlu1 %v3079_v30, %s5730_s15 }
 0x4d9   : >> { %3092 = vrot.lane.b32.xlu0 %v3076_v35, %s5730_s15  ;;  %v3347_v35 = vrot.slane %v8291_v31, 2  ;;  %v3518_v52 = vsel %vm826_vm3, %v3516_v55, %v3517_v53  ;;  %v8388_v31 = vrot.slane %v8380_v12, 1 }
 0x4db   : >> { %v3741_v7 = vsel %vm826_vm3, %v8388_v31, %v3740_v63 }
 0x4df   : >> { %3319 = vrot.lane.b32.xlu2 %v3300_v26, %s5729_s26  ;;  %v5330_v26 = vld [vmem:[%s8106_s10 + $0xc8] sm:$0x3] }
 0x4e0   : >> { %3317 = vrot.lane.b32.xlu1 %v3297_v8, %s5729_s26  ;;  %v3348_v8 = vsel %vm875_vm4, %v8209_v24, %v3347_v35  ;;  %v3568_v11 = vrot.slane %v5330_v26, 2 }
 0x4e1   : >> { %3315 = vrot.lane.b32.xlu0 %v3294_v19, %s5729_s26  ;;  %v8320_v57 = vpop.permute.xlu2 %2889 }
 0x4e7   : >> { %3325 = vrot.lane.b32.xlu2 %v3309_v32, %s5729_s26  ;;  %v3565_v32 = vrot.slane %v5328_v34, 2  ;;  %v5332_v34 = vld [vmem:[%s8106_s10 + $0xd8] sm:$0x3] }
 0x4e8   : >> { %3323 = vrot.lane.b32.xlu1 %v3306_v21, %s5729_s26  ;;  %v3571_v35 = vrot.slane %v5332_v34, 2 }
 0x4e9   : >> { %3321 = vrot.lane.b32.xlu0 %v3303_v6, %s5729_s26  ;;  %v8338_v17 = vpop.permute.xlu2 %2891  ;;  %v5281_v6 = vld [vmem:[%s9451_s3 + $0x28] sm:$0xff] }
 0x4ea   : >> { %5504 = vmatpush.msra.mxu1 %v5281_v6  ;;  %3162 = vmatpush.msra.mxu0 %v5281_v6 }
 0x4eb   : >> { %5505 = vmatpush.msra.mxu2 %v5281_v6  ;;  %5506 = vmatpush.msra.mxu3 %v5281_v6 }
 0x4ec   : >> { %5507 = vmatpush.msra.mxu1 %v5280_v9  ;;  %3163 = vmatpush.msra.mxu0 %v5280_v9 }
 0x4ed   : >> { %5508 = vmatpush.msra.mxu2 %v5280_v9  ;;  %5509 = vmatpush.msra.mxu3 %v5280_v9  ;;  %v2958_v9 = vsel %vm245_vm0, %v8109_v1, %v8320_v57 }
 0x4ef   : >> { %3363 = vrot.lane.b32.xlu2 %v3342_v49, %s5730_s15  ;;  %v3566_v49 = vsel %vm875_vm4, %v3784_v3, %v3565_v32 }
 0x4f0   : >> { %3361 = vrot.lane.b32.xlu1 %v3339_v61, %s5730_s15  ;;  %v8408_v61 = vrot.slane %v8380_v12, 2 }
 0x4f1   : >> { %3327 = vrot.lane.b32.xlu0 %v3312_v46, %s5729_s26  ;;  %v2931_v16 = vpop.permute.xlu2 %2930 }
 0x4f2   : >> { %v3569_v48 = vsel %vm875_vm4, %v8408_v61, %v3568_v11 }
 0x4f7   : >> { %3585 = vrot.lane.b32.xlu2 %v3563_v28, %s5730_s15  ;;  %v3789_v28 = vsel %vm875_vm4, %v8408_v61, %v3788_v18 }
 0x4f8   : >> { %3537 = vrot.lane.b32.xlu1 %v3515_v62, %s5729_s26  ;;  %v5279_v62 = vld [vmem:[%s9451_s3 + $0x18] sm:$0xff] }
 0x4f9   : >> { %3365 = vrot.lane.b32.xlu0 %v3345_v41, %s5730_s15  ;;  %v2937_v51 = vpop.permute.xlu2 %2936  ;;  %v8428_v41 = vld [vmem:[%s8106_s10 + $0xd0] sm:$0xff]  ;;  %5510 = vmatpush.msra.mxu1 %v5279_v62 }
 0x4fa   : >> { %v8369_v30 = vpop.permute.xlu1 %2885  ;;  %3164 = vmatpush.msra.mxu0 %v5279_v62  ;;  %5511 = vmatpush.msra.mxu2 %v5279_v62  ;;  %v8440_v53 = vrot.slane %v8428_v41, 2 }
 0x4fb   : >> { %v2882_v59 = vpop.permute.xlu0 %2881  ;;  %5512 = vmatpush.msra.mxu3 %v5279_v62 }
 0x4fc   : >> { %v2954_v0 = vsel %vm245_vm0, %v8126_v13, %v2882_v59  ;;  %v3520_v13 = vrot.slane %v5330_v26, 1  ;;  %v3572_v10 = vsel %vm875_vm4, %v8440_v53, %v3571_v35 }
 0x4fd   : >> { %v8376_v23 = vsel %vm932_vm5, %v2954_v0, %v2931_v16  ;;  %v8446_v0 = vrot.slane %v8428_v41, 1 }
 0x4fe   : >> { %v3521_v38 = vsel %vm826_vm3, %v8388_v31, %v3520_v13 }
 0x4ff   : >> { %3760 = vrot.lane.b32.xlu2 %v3738_v54, %s5729_s26 }
 0x500   : >> { %3539 = vrot.lane.b32.xlu1 %v3518_v52, %s5729_s26  ;;  %v2956_v52 = vsel %vm245_vm0, %v8115_v33, %v8369_v30  ;;  %v5334_v30 = vld [vmem:[%s8106_s10 + $0xe8] sm:$0x3] }
 0x501   : >> { %3367 = vrot.lane.b32.xlu0 %v3348_v8, %s5730_s15  ;;  %v2943_v19 = vpop.permute.xlu2 %2942  ;;  %v3523_v8 = vrot.slane %v5332_v34, 1 }
 0x502   : >> { %v2888_v40 = vpop.permute.xlu1 %2887 }
 0x503   : >> { %v2957_v24 = vsel %vm245_vm0, %v8137_v36, %v2888_v40  ;;  %v2884_v21 = vpop.permute.xlu0 %2883  ;;  %v3524_v6 = vsel %vm826_vm3, %v8446_v0, %v3523_v8 }
 0x504   : >> { %v8400_v39 = vsel %vm932_vm5, %v2957_v24, %v2937_v51  ;;  %v5357_v51 = vld [vmem:[%s8106_s10 + $0xd8] sm:$0x3]  ;;  %v2955_v13 = vsel %vm245_vm0, %v8144_v43, %v2884_v21  ;;  %v8464_v24 = vld [vmem:[%s8106_s10 + $0xe0] sm:$0xff] }
 0x505   : >> { %v3743_v54 = vrot.slane %v5357_v51, 1  ;;  %v8472_v21 = vrot.slane %v8464_v24, 1  ;;  %v3791_v11 = vrot.slane %v5357_v51, 2  ;;  %v8500_v57 = vrot.slane %v8464_v24, 2 }
 0x507   : >> { %3541 = vrot.lane.b32.xlu2 %v3521_v38, %s5729_s26  ;;  %v3744_v32 = vsel %vm826_vm3, %v8446_v0, %v3743_v54  ;;  %v3526_v38 = vrot.slane %v5334_v30, 1  ;;  %v3792_v62 = vsel %vm875_vm4, %v8440_v53, %v3791_v11  ;;  %v3353_v11 = vrot.slane %v8311_v15, 2 }
 0x508   : >> { %3808 = vrot.lane.b32.xlu1 %v3786_v45, %s5730_s15 }
 0x509   : >> { %3587 = vrot.lane.b32.xlu0 %v3566_v49, %s5730_s15  ;;  %v8411_v46 = vpop.permute.xlu2 %3034  ;;  %v2959_v49 = vsel %vm245_vm0, %v8131_v37, %v8338_v17  ;;  %v5359_v17 = vld [vmem:[%s8106_s10 + $0xe8] sm:$0x3]  ;;  %v3354_v15 = vsel %vm875_vm4, %v8227_v4, %v3353_v11 }
 0x50a   : >> { %v8416_v16 = vpop.permute.xlu1 %2895  ;;  %v3746_v51 = vrot.slane %v5359_v17, 1 }
 0x50b   : >> { %v2894_v27 = vpop.permute.xlu0 %2893  ;;  %v2961_v35 = vsel %vm245_vm0, %v8163_v50, %v8416_v16 }
 0x50c   : >> { %v2960_v58 = vsel %vm245_vm0, %v8168_v22, %v2894_v27  ;;  %v3747_v16 = vsel %vm826_vm3, %v8472_v21, %v3746_v51 }
 0x50d   : >> { %v8432_v55 = vsel %vm932_vm5, %v2960_v58, %v2943_v19  ;;  %v3527_v58 = vsel %vm826_vm3, %v8472_v21, %v3526_v38 }
 0x50f   : >> { %3810 = vrot.lane.b32.xlu2 %v3789_v28, %s5730_s15 }
 0x510   : >> { %3589 = vrot.lane.b32.xlu1 %v3569_v48, %s5730_s15  ;;  %v3794_v48 = vrot.slane %v5359_v17, 2 }
 0x511   : >> { %3762 = vrot.lane.b32.xlu0 %v3741_v7, %s5729_s26  ;;  %v8443_v59 = vpop.permute.xlu2 %3040  ;;  %v3574_v7 = vrot.slane %v5334_v30, 2 }
 0x512   : >> { %v2935_v26 = vpop.permute.xlu1 %2934 }
 0x513   : >> { %v2933_v19 = vpop.permute.xlu0 %2932  ;;  %v8454_v3 = vsel %vm932_vm5, %v2956_v52, %v2935_v26  ;;  %v3795_v52 = vsel %vm875_vm4, %v8500_v57, %v3794_v48  ;;  %v3575_v8 = vsel %vm875_vm4, %v8500_v57, %v3574_v7  ;;  %v3356_v48 = vrot.slane %v8306_v25, 2 }
 0x514   : >> { %v8459_v40 = vsel %vm932_vm5, %v2955_v13, %v2933_v19  ;;  %v8514_v13 = vld [vmem:[%s8106_s10 + $0xf0] sm:$0xff]  ;;  %v5361_v19 = vld [vmem:[%s8106_s10 + $0xf8] sm:$0x3] }
 0x515   : >> { %v8526_v30 = vrot.slane %v8514_v13, 1  ;;  %v8557_v7 = vrot.slane %v8514_v13, 2  ;;  %v3797_v51 = vrot.slane %v5361_v19, 2  ;;  %v3357_v4 = vsel %vm875_vm4, %v3077_v5, %v3356_v48 }
 0x517   : >> { %3591 = vrot.lane.b32.xlu2 %v3572_v10, %s5730_s15  ;;  %v2973_v10 = vld [vmem:[%s9451_s3 + $0x10] sm:$0xff] }
 0x518   : >> { %3764 = vrot.lane.b32.xlu1 %v3744_v32, %s5729_s26  ;;  %v5336_v32 = vld [vmem:[%s8106_s10 + $0xf8] sm:$0x3]  ;;  %3227 = vmatpush.msrb.mxu1 %v2973_v10  ;;  %v8569_v10 = vld [vmem:[%s8106_s10 + $0x100] sm:$0xff] }
 0x519   : >> { %3543 = vrot.lane.b32.xlu0 %v3524_v6, %s5729_s26  ;;  %v8475_v45 = vpop.permute.xlu2 %3046  ;;  %v3749_v6 = vrot.slane %v5361_v19, 1  ;;  %v3529_v47 = vrot.slane %v5336_v32, 1  ;;  %v5338_v19 = vld [vmem:[%s8106_s10 + $0x108] sm:$0x3]  ;;  %v8579_v5 = vrot.slane %v8569_v10, 1 }
 0x51a   : >> { %v2941_v18 = vpop.permute.xlu1 %2940  ;;  %v3532_v11 = vrot.slane %v5338_v19, 1 }
 0x51b   : >> { %v2939_v63 = vpop.permute.xlu0 %2938  ;;  %v8485_v27 = vsel %vm932_vm5, %v2959_v49, %v2941_v18  ;;  %v2972_v49 = vld [vmem:[%s9451_s3 + $0x8] sm:$0xff] }
 0x51c   : >> { %v8490_v28 = vsel %vm932_vm5, %v2958_v9, %v2939_v63  ;;  %3228 = vmatpush.msrb.mxu1 %v2972_v49  ;;  %v2971_v63 = vld [vmem:[%s9451_s3] sm:$0xff]  ;;  %v3533_v48 = vsel %vm826_vm3, %v8579_v5, %v3532_v11 }
 0x51e   : >> { %3229 = vmatpush.msrb.mxu1 %v2971_v63 }
 0x51f   : >> { %3545 = vrot.lane.b32.xlu2 %v3527_v58, %s5729_s26 }
 0x520   : >> { %3369 = vrot.lane.b32.xlu1 %v3351_v60, %s5730_s15  ;;  %v3750_v60 = vsel %vm826_vm3, %v8526_v30, %v3749_v6 }
 0x521   : >> { %3812 = vrot.lane.b32.xlu0 %v3792_v62, %s5730_s15  ;;  %v3085_v34 = vpop.permute.xlu2 %3084  ;;  %v3530_v62 = vsel %vm826_vm3, %v8526_v30, %v3529_v47 }
 0x522   : >> { %v3033_v44 = vpop.permute.xlu1 %3032 }
 0x523   : >> { %v2945_v54 = vpop.permute.xlu0 %2944  ;;  %v3104_v63 = vsel %vm245_vm0, %v8144_v43, %v3033_v44  ;;  %v8598_v43 = vld [vmem:[%s8106_s10 + $0x110] sm:$0xff]  ;;  %v5340_v44 = vld [vmem:[%s8106_s10 + $0x118] sm:$0x3] }
 0x524   : >> { %v8509_v26 = vsel %vm932_vm5, %v2961_v35, %v2945_v54  ;;  %v3577_v54 = vrot.slane %v5336_v32, 2  ;;  %v3580_v32 = vrot.slane %v5338_v19, 2  ;;  %v3108_v19 = vsel %vm245_vm0, %v8131_v37, %v8443_v59  ;;  %v5314_v37 = vld [vmem:[%s9451_s3 + $0x30] sm:$0xff] }
 0x525   : >> { %v8615_v11 = vrot.slane %v8598_v43, 1 }
 0x526   : >> { %v3578_v25 = vsel %vm875_vm4, %v8557_v7, %v3577_v54 }
 0x527   : >> { %3814 = vrot.lane.b32.xlu2 %v3795_v52, %s5730_s15 }
 0x528   : >> { %3593 = vrot.lane.b32.xlu1 %v3575_v8, %s5730_s15  ;;  %v3798_v8 = vsel %vm875_vm4, %v8557_v7, %v3797_v51  ;;  %v3535_v51 = vrot.slane %v5340_v44, 1 }
 0x529   : >> { %3766 = vrot.lane.b32.xlu0 %v3747_v16, %s5729_s26  ;;  %v8529_v38 = vpop.permute.xlu2 %3090  ;;  %v5363_v16 = vld [vmem:[%s8106_s10 + $0x108] sm:$0x3] }
 0x52a   : >> { %v8534_v18 = vpop.permute.xlu1 %3038  ;;  %v3752_v47 = vrot.slane %v5363_v16, 1 }
 0x52b   : >> { %v3037_v9 = vpop.permute.xlu0 %3036 }
 0x52c   : >> { %v3106_v58 = vsel %vm245_vm0, %v8137_v36, %v3037_v9  ;;  %v8582_v9 = vrot.slane %v8569_v10, 2 }
 0x52d   : >> { %v3114_v17 = vsel %vm932_vm5, %v3106_v58, %v3085_v34 }
 0x52e   : >> { %5284 = vmatmul.msk.f32.vlgmr.msra.gmra.mxu1 %vm1094_vm6, %v3114_v17  ;;  %v3581_v17 = vsel %vm875_vm4, %v8582_v9, %v3580_v32 }
 0x52f   : >> { %3768 = vrot.lane.b32.xlu2 %v3750_v60, %s5729_s26 }
 0x530   : >> { %3547 = vrot.lane.b32.xlu1 %v3530_v62, %s5729_s26  ;;  %v3753_v62 = vsel %vm826_vm3, %v8579_v5, %v3752_v47  ;;  %v3800_v47 = vrot.slane %v5363_v16, 2 }
 0x531   : >> { %3371 = vrot.lane.b32.xlu0 %v3354_v15, %s5730_s15  ;;  %v8554_v34 = vpop.permute.xlu2 %3313  ;;  %v5316_v15 = vld [vmem:[%s9451_s3 + $0x40] sm:$0xff] }
 0x532   : >> { %v8559_v35 = vpop.permute.xlu1 %3044  ;;  %3442 = vmatpush.msrb.mxu2 %v5316_v15 }
 0x533   : >> { %v3043_v52 = vpop.permute.xlu0 %3042 }
 0x537   : >> { %3373 = vrot.lane.b32.xlu2 %v3357_v4, %s5730_s15  ;;  %v3358_v4 = vrot.slane %v8331_v42, 2  ;;  %v3105_v42 = vsel %vm245_vm0, %v8115_v33, %v8411_v46  ;;  %v3536_v46 = vsel %vm826_vm3, %v8615_v11, %v3535_v51  ;;  %v3583_v51 = vrot.slane %v5340_v44, 2 }
 0x538   : >> { %3816 = vrot.lane.b32.xlu1 %v3798_v8, %s5730_s15  ;;  %v3359_v8 = vrot.slane %v8334_v29, 2  ;;  %v3107_v29 = vsel %vm245_vm0, %v8109_v1, %v8534_v18  ;;  %v5343_v18 = vld [vmem:[%s9451_s3 + $0x58] sm:$0xff] }
 0x539   : >> { %3595 = vrot.lane.b32.xlu0 %v3578_v25, %s5730_s15  ;;  %v8576_v6 = vpop.permute.xlu2 %3319  ;;  %v5315_v25 = vld [vmem:[%s9451_s3 + $0x38] sm:$0xff]  ;;  %3666 = vmatpush.msrb.mxu3 %v5343_v18 }
 0x53a   : >> { %v3083_v49 = vpop.permute.xlu1 %3082  ;;  %3443 = vmatpush.msrb.mxu2 %v5315_v25  ;;  %v3360_v1 = vsel %vm875_vm4, %v3358_v4, %v3359_v8  ;;  %v5342_v4 = vld [vmem:[%s9451_s3 + $0x50] sm:$0xff] }
 0x53b   : >> { %v3081_v58 = vpop.permute.xlu0 %3080  ;;  %v3113_v59 = vsel %vm932_vm5, %v3105_v42, %v3083_v49  ;;  %v3801_v49 = vsel %vm875_vm4, %v8582_v9, %v3800_v47  ;;  %3667 = vmatpush.msrb.mxu3 %v5342_v4  ;;  %v5341_v47 = vld [vmem:[%s9451_s3 + $0x48] sm:$0xff]  ;;  %v5370_v4 = vld [vmem:[%s9451_s3 + $0x70] sm:$0xff] }
 0x53c   : >> { %v3112_v60 = vsel %vm932_vm5, %v3104_v63, %v3081_v58  ;;  %3444 = vmatpush.msrb.mxu2 %v5314_v37  ;;  %v5407_v42 = vld [vmem:[%s8106_s10 + $0x148] sm:$0x3]  ;;  %3889 = vmatpush.msrb.mxu0 %v5370_v4 }
 0x53d   : >> { %5282 = vmatmul.msk.f32.vlgmr.msra.gmra.mxu0 %vm1094_vm6, %v3112_v60  ;;  %v5365_v60 = vld [vmem:[%s8106_s10 + $0x118] sm:$0x3]  ;;  %3668 = vmatpush.msrb.mxu3 %v5341_v47  ;;  %v4184_v18 = vrot.slane %v5407_v42, 1 }
 0x53e   : >> { %v3755_v25 = vrot.slane %v5365_v60, 1 }
 0x53f   : >> { %3597 = vrot.lane.b32.xlu2 %v3581_v17, %s5730_s15  ;;  %v3109_v17 = vsel %vm245_vm0, %v8168_v22, %v3043_v52  ;;  %v3110_v22 = vsel %vm245_vm0, %v8163_v50, %v8559_v35  ;;  %v8674_v35 = vld [vmem:[%s8106_s10 + $0x140] sm:$0xff] }
 0x540   : >> { %3770 = vrot.lane.b32.xlu1 %v3753_v62, %s5729_s26  ;;  %v3803_v62 = vrot.slane %v5365_v60, 2 }
 0x541   : >> { %3549 = vrot.lane.b32.xlu0 %v3533_v48, %s5729_s26  ;;  %v8604_v54 = vpop.permute.xlu2 %3325  ;;  %v8649_v48 = vrot.slane %v8598_v43, 2 }
 0x542   : >> { %v3089_v32 = vpop.permute.xlu1 %3088 }
 0x543   : >> { %v3087_v63 = vpop.permute.xlu0 %3086  ;;  %v3116_v58 = vsel %vm932_vm5, %v3108_v19, %v3089_v32  ;;  %v3117_v19 = vsel %vm932_vm5, %v3109_v17, %v8529_v38  ;;  %v3804_v32 = vsel %vm875_vm4, %v8649_v48, %v3803_v62  ;;  %v3584_v50 = vsel %vm875_vm4, %v8649_v48, %v3583_v51 }
 0x544   : >> { %v3115_v16 = vsel %vm932_vm5, %v3107_v29, %v3087_v63  ;;  %5286 = vmatmul.msk.f32.vlgmr.msra.gmra.mxu2 %vm1094_vm6, %v3116_v58  ;;  %v3756_v38 = vsel %vm826_vm3, %v8615_v11, %v3755_v25  ;;  %v8678_v29 = vld [vmem:[%s8106_s10 + $0x120] sm:$0xff]  ;;  %v5367_v63 = vld [vmem:[%s8106_s10 + $0x128] sm:$0x3] }
 0x545   : >> { %5283 = vmatmul.msk.f32.gmra.mxu0 %vm1094_vm6, %v3113_v59  ;;  %5285 = vmatmul.msk.f32.gmra.mxu1 %vm1094_vm6, %v3115_v16  ;;  %v3757_v58 = vrot.slane %v8678_v29, 1  ;;  %v4231_v59 = vrot.slane %v8674_v35, 2  ;;  %v4232_v16 = vrot.slane %v5407_v42, 2  ;;  %v5368_v42 = vld [vmem:[%s9451_s3 + $0x60] sm:$0xff] }
 0x547   : >> { %3551 = vrot.lane.b32.xlu2 %v3536_v46, %s5729_s26  ;;  %v4233_v51 = vsel %vm875_vm4, %v4231_v59, %v4232_v16  ;;  %v5380_v16 = vld [vmem:[%s8106_s10 + $0xc8] sm:$0x3] }
 0x548   : >> { %3375 = vrot.lane.b32.xlu1 %v3360_v1, %s5730_s15  ;;  %v4183_v1 = vrot.slane %v8674_v35, 1 }
 0x549   : >> { %3818 = vrot.lane.b32.xlu0 %v3801_v49, %s5730_s15  ;;  %v8646_v15 = vpop.permute.xlu2 %3363  ;;  %v3111_v49 = vsel %vm245_vm0, %v8245_v20, %v8475_v45  ;;  %v8707_v45 = vld [vmem:[%s8106_s10 + $0x150] sm:$0xff] }
 0x54a   : >> { %v3095_v8 = vpop.permute.xlu1 %3094  ;;  %v4185_v20 = vsel %vm826_vm3, %v4183_v1, %v4184_v18  ;;  %v5409_v1 = vld [vmem:[%s8106_s10 + $0x158] sm:$0x3] }
 0x54b   : >> { %v3093_v52 = vpop.permute.xlu0 %3092  ;;  %v3119_v17 = vsel %vm932_vm5, %v3111_v49, %v3095_v8  ;;  %v5434_v8 = vld [vmem:[%s8106_s10 + $0x158] sm:$0x3]  ;;  %v4187_v18 = vrot.slane %v5409_v1, 1 }
 0x54c   : >> { %5287 = vmatmul.msk.f32.gmra.mxu2 %vm1094_vm6, %v3117_v19  ;;  %v3118_v44 = vsel %vm932_vm5, %v3110_v22, %v3093_v52  ;;  %v4455_v25 = vrot.slane %v5434_v8, 2  ;;  %v3805_v22 = vrot.slane %v8678_v29, 2  ;;  %v3806_v52 = vrot.slane %v5367_v63, 2  ;;  %v5369_v19 = vld [vmem:[%s9451_s3 + $0x68] sm:$0xff] }
 0x54d   : >> { %5288 = vmatmul.msk.f32.vlgmr.msra.gmra.mxu3 %vm1094_vm6, %v3118_v44  ;;  %5290 = vmatmul.msk.f32.vlgmr.msrb.gmra.mxu1 %vm1094_vm6, %v8376_v23  ;;  %v3758_v23 = vrot.slane %v5367_v63, 1  ;;  %v4407_v47 = vrot.slane %v5434_v8, 1 }
 0x54e   : >> { %3890 = vmatpush.msrb.mxu0 %v5369_v19  ;;  %v5461_v19 = vld [vmem:[%s8106_s10 + $0x168] sm:$0x3] }
 0x54f   : >> { %3820 = vrot.lane.b32.xlu2 %v3804_v32, %s5730_s15  ;;  %v3759_v62 = vsel %vm826_vm3, %v3757_v58, %v3758_v23  ;;  %v4406_v32 = vrot.slane %v8707_v45, 1  ;;  %v3807_v23 = vsel %vm875_vm4, %v3805_v22, %v3806_v52 }
 0x550   : >> { %3599 = vrot.lane.b32.xlu1 %v3584_v50, %s5730_s15  ;;  %v4234_v50 = vrot.slane %v8707_v45, 2  ;;  %3891 = vmatpush.msrb.mxu0 %v5368_v42 }
 0x551   : >> { %3772 = vrot.lane.b32.xlu0 %v3756_v38, %s5729_s26  ;;  %v8685_v37 = vpop.permute.xlu2 %3585  ;;  %v4408_v59 = vsel %vm826_vm3, %v4406_v32, %v4407_v47  ;;  %v4188_v8 = vsel %vm826_vm3, %v4406_v32, %v4187_v18  ;;  %v4630_v32 = vrot.slane %v5461_v19, 1  ;;  %v5382_v18 = vld [vmem:[%s8106_s10 + $0xd8] sm:$0x3] }
 0x552   : >> { %v8688_v46 = vpop.permute.xlu1 %3317  ;;  %v4456_v63 = vsel %vm875_vm4, %v4234_v50, %v4455_v25 }
 0x553   : >> { %v3316_v60 = vpop.permute.xlu0 %3315 }
 0x554   : >> { %v3386_v47 = vsel %vm245_vm0, %v8137_v36, %v3316_v60 }
 0x555   : >> { %5289 = vmatmul.msk.f32.gmra.mxu3 %vm1094_vm6, %v3119_v17  ;;  %5291 = vmatmul.msk.f32.gmra.mxu1 %vm1094_vm6, %v8459_v40  ;;  %v3385_v17 = vsel %vm245_vm0, %v8115_v33, %v8554_v34  ;;  %v8757_v33 = vld [vmem:[%s8106_s10 + $0x160] sm:$0xff]  ;;  %v5436_v34 = vld [vmem:[%s8106_s10 + $0x168] sm:$0x3]  ;;  %v3394_v36 = vsel %vm932_vm5, %v3386_v47, %v8646_v15  ;;  %v3963_v15 = vrot.slane %v5382_v18, 1 }
 0x556   : >> { %v5411_v47 = vld [vmem:[%s8106_s10 + $0x168] sm:$0x3] }
 0x557   : >> { %3774 = vrot.lane.b32.xlu2 %v3759_v62, %s5729_s26 }
 0x558   : >> { %4255 = vrot.lane.b32.xlu1 %v4233_v51, %s5730_s15  ;;  %v3960_v51 = vrot.slane %v5380_v16, 1 }
 0x559   : >> { %4207 = vrot.lane.b32.xlu0 %v4185_v20, %s5729_s26  ;;  %v8713_v40 = vpop.permute.xlu2 %3760 }
 0x55a   : >> { %v8719_v44 = vpop.permute.xlu1 %3323  ;;  %v3961_v52 = vsel %vm826_vm3, %v8388_v31, %v3960_v51  ;;  %v4410_v31 = vrot.slane %v5436_v34, 1 }
 0x55b   : >> { %v8723_v38 = vpop.permute.xlu0 %3321 }
 0x55d   : >> { %5292 = vmatmul.msk.f32.gmra.mxu1 %vm1094_vm6, %v8454_v3  ;;  %v4008_v3 = vrot.slane %v5380_v16, 2 }
 0x55f   : >> { %4478 = vrot.lane.b32.xlu2 %v4456_v63, %s5730_s15  ;;  %v4009_v25 = vsel %vm875_vm4, %v8408_v61, %v4008_v3  ;;  %v4409_v61 = vrot.slane %v8757_v33, 1  ;;  %v4235_v63 = vrot.slane %v5409_v1, 2  ;;  %v4677_v3 = vrot.slane %v8757_v33, 2 }
 0x560   : >> { %3822 = vrot.lane.b32.xlu1 %v3807_v23, %s5730_s15 }
 0x561   : >> { %4430 = vrot.lane.b32.xlu0 %v4408_v59, %s5729_s26  ;;  %v8740_v49 = vpop.permute.xlu2 %3541  ;;  %v4631_v16 = vsel %vm826_vm3, %v4409_v61, %v4630_v32  ;;  %v4411_v1 = vsel %vm826_vm3, %v4409_v61, %v4410_v31  ;;  %v4190_v32 = vrot.slane %v5411_v47, 1 }
 0x562   : >> { %v3362_v62 = vpop.permute.xlu1 %3361 }
 0x563   : >> { %v3393_v4 = vsel %vm932_vm5, %v3385_v17, %v3362_v62  ;;  %v8746_v20 = vpop.permute.xlu0 %3327  ;;  %v5597_v17 = vld [vmem:[%s8106_s10 + $0x40] sm:$0xff] }
 0x564   : >> { %5317 = vmatmul.msk.f32.vlgmr.msrb.gmra.mxu2 %vm1094_vm6, %v3393_v4  ;;  %v3387_v62 = vsel %vm245_vm0, %v5597_v17, %v8688_v46  ;;  %v3832_v46 = vsel %vm245_vm0, %v8359_v56, %v8713_v40 }
 0x565   : >> { %5293 = vmatmul.msk.f32.gmra.mxu1 %vm1094_vm6, %v8400_v39 }
 0x567   : >> { %4209 = vrot.lane.b32.xlu2 %v4188_v8, %s5729_s26 }
 0x568   : >> { %4031 = vrot.lane.b32.xlu1 %v4009_v25, %s5730_s15  ;;  %v3964_v25 = vsel %vm826_vm3, %v8446_v0, %v3963_v15  ;;  %v3611_v15 = vsel %vm245_vm0, %v8380_v12, %v8740_v49 }
 0x569   : >> { %3983 = vrot.lane.b32.xlu0 %v3961_v52, %s5729_s26  ;;  %v8766_v39 = vpop.permute.xlu2 %3810 }
 0x56a   : >> { %v3538_v42 = vpop.permute.xlu1 %3537 }
 0x56b   : >> { %v3609_v23 = vsel %vm245_vm0, %v8347_v14, %v3538_v42  ;;  %v3366_v59 = vpop.permute.xlu0 %3365  ;;  %v4236_v14 = vsel %vm875_vm4, %v4234_v50, %v4235_v63  ;;  %v4458_v50 = vrot.slane %v5436_v34, 2  ;;  %v4238_v34 = vrot.slane %v5411_v47, 2 }
 0x56c   : >> { %v3617_v60 = vsel %vm932_vm5, %v3609_v23, %v8685_v37  ;;  %5318 = vmatmul.msk.f32.gmra.mxu2 %vm1094_vm6, %v3394_v36  ;;  %v3395_v8 = vsel %vm932_vm5, %v3387_v62, %v3366_v59  ;;  %v4011_v63 = vrot.slane %v5382_v18, 2  ;;  %v5438_v18 = vld [vmem:[%s8106_s10 + $0x178] sm:$0x3] }
 0x56d   : >> { %5294 = vmatmul.msk.f32.gmra.mxu1 %vm1094_vm6, %v8490_v28  ;;  %5344 = vmatmul.msk.f32.vlgmr.msrb.gmra.mxu3 %vm1094_vm6, %v3617_v60  ;;  %v4678_v28 = vrot.slane %v5461_v19, 2  ;;  %v4459_v19 = vsel %vm875_vm4, %v4677_v3, %v4458_v50  ;;  %v4413_v17 = vrot.slane %v5438_v18, 1 }
 0x56f   : >> { %4653 = vrot.lane.b32.xlu2 %v4631_v16, %s5729_s26  ;;  %v4679_v52 = vsel %vm875_vm4, %v4677_v3, %v4678_v28  ;;  %v4012_v16 = vsel %vm875_vm4, %v8440_v53, %v4011_v63 }
 0x570   : >> { %4432 = vrot.lane.b32.xlu1 %v4411_v1, %s5729_s26  ;;  %v8827_v1 = vld [vmem:[%s8106_s10 + $0x170] sm:$0xff] }
 0x571   : >> { %4257 = vrot.lane.b32.xlu0 %v4236_v14, %s5730_s15  ;;  %v8786_v37 = vpop.permute.xlu2 %3591  ;;  %v5463_v14 = vld [vmem:[%s8106_s10 + $0x178] sm:$0x3]  ;;  %v4632_v53 = vrot.slane %v8827_v1, 1  ;;  %v4680_v62 = vrot.slane %v8827_v1, 2 }
 0x572   : >> { %v3540_v51 = vpop.permute.xlu1 %3539 }
 0x573   : >> { %v3368_v4 = vpop.permute.xlu0 %3367  ;;  %v3610_v40 = vsel %vm245_vm0, %v8359_v56, %v3540_v51  ;;  %v4191_v56 = vsel %vm826_vm3, %v4409_v61, %v4190_v32  ;;  %v4633_v61 = vrot.slane %v5463_v14, 1 }
 0x574   : >> { %5319 = vmatmul.msk.f32.gmra.mxu2 %vm1094_vm6, %v3395_v8 }
 0x575   : >> { %5295 = vmatmul.msk.f32.gmra.mxu1 %vm1094_vm6, %v8485_v27  ;;  %v5598_v27 = vld [vmem:[%s8106_s10 + $0x50] sm:$0xff] }
 0x576   : >> { %v3388_v31 = vsel %vm245_vm0, %v5598_v27, %v8576_v6  ;;  %v4239_v6 = vsel %vm875_vm4, %v4677_v3, %v4238_v34 }
 0x577   : >> { %3985 = vrot.lane.b32.xlu2 %v3964_v25, %s5729_s26  ;;  %v3396_v36 = vsel %vm932_vm5, %v3388_v31, %v3368_v4  ;;  %v4634_v25 = vsel %vm826_vm3, %v4632_v53, %v4633_v61 }
 0x578   : >> { %4701 = vrot.lane.b32.xlu1 %v4679_v52, %s5730_s15  ;;  %v4414_v52 = vsel %vm826_vm3, %v4632_v53, %v4413_v17  ;;  %v5465_v17 = vld [vmem:[%s8106_s10 + $0x188] sm:$0x3] }
 0x579   : >> { %4480 = vrot.lane.b32.xlu0 %v4459_v19, %s5730_s15  ;;  %v8807_v0 = vpop.permute.xlu2 %3545  ;;  %v5384_v19 = vld [vmem:[%s8106_s10 + $0xe8] sm:$0x3] }
 0x57a   : >> { %v3809_v42 = vpop.permute.xlu1 %3808 }
 0x57b   : >> { %v3840_v23 = vsel %vm932_vm5, %v3832_v46, %v3809_v42  ;;  %v3588_v59 = vpop.permute.xlu0 %3587  ;;  %v4681_v46 = vrot.slane %v5463_v14, 2 }
 0x57c   : >> { %5320 = vmatmul.msk.f32.gmra.mxu2 %vm1094_vm6, %v3396_v36  ;;  %v3618_v60 = vsel %vm932_vm5, %v3610_v40, %v3588_v59  ;;  %5371 = vmatmul.msk.f32.vlgmr.msrb.gmra.mxu0 %vm1094_vm6, %v3840_v23  ;;  %v5413_v40 = vld [vmem:[%s8106_s10 + $0x178] sm:$0x3]  ;;  %v8871_v23 = vld [vmem:[%s8106_s10 + $0x180] sm:$0xff]  ;;  %v5440_v59 = vld [vmem:[%s8106_s10 + $0x188] sm:$0x3] }
 0x57d   : >> { %5296 = vmatmul.msk.f32.gmra.mxu1 %vm1094_vm6, %v8432_v55  ;;  %5345 = vmatmul.msk.f32.gmra.mxu3 %vm1094_vm6, %v3618_v60  ;;  %v4461_v55 = vrot.slane %v5438_v18, 2  ;;  %v4682_v63 = vsel %vm875_vm4, %v4680_v62, %v4681_v46  ;;  %v4416_v36 = vrot.slane %v5440_v59, 1  ;;  %v5415_v46 = vld [vmem:[%s8106_s10 + $0x188] sm:$0x3] }
 0x57f   : >> { %4259 = vrot.lane.b32.xlu2 %v4239_v6, %s5730_s15  ;;  %v4462_v4 = vsel %vm875_vm4, %v4680_v62, %v4461_v55 }
 0x580   : >> { %4211 = vrot.lane.b32.xlu1 %v4191_v56, %s5729_s26  ;;  %v4193_v56 = vrot.slane %v5413_v40, 1 }
 0x581   : >> { %4033 = vrot.lane.b32.xlu0 %v4012_v16, %s5730_s15  ;;  %v8837_v3 = vpop.permute.xlu2 %3814  ;;  %v4635_v16 = vrot.slane %v8871_v23, 1 }
 0x582   : >> { %v3590_v28 = vpop.permute.xlu1 %3589 }
 0x583   : >> { %v3763_v51 = vpop.permute.xlu0 %3762  ;;  %v3619_v50 = vsel %vm932_vm5, %v3611_v15, %v3590_v28  ;;  %v4417_v61 = vsel %vm826_vm3, %v4635_v16, %v4416_v36  ;;  %v4194_v28 = vsel %vm826_vm3, %v4632_v53, %v4193_v56 }
 0x584   : >> { %v3833_v49 = vsel %vm245_vm0, %v8380_v12, %v3763_v51  ;;  %v4014_v12 = vrot.slane %v5384_v19, 2  ;;  %v4684_v51 = vrot.slane %v5465_v17, 2 }
 0x585   : >> { %5297 = vmatmul.msk.f32.gmra.mxu1 %vm1094_vm6, %v8509_v26  ;;  %5346 = vmatmul.msk.f32.gmra.mxu3 %vm1094_vm6, %v3619_v50  ;;  %v3841_v8 = vsel %vm932_vm5, %v3833_v49, %v8766_v39  ;;  %v3966_v39 = vrot.slane %v5384_v19, 1  ;;  %v8900_v50 = vrot.slane %v8871_v23, 2 }
 0x586   : >> { %5372 = vmatmul.msk.f32.gmra.mxu0 %vm1094_vm6, %v3841_v8  ;;  %v4015_v27 = vsel %vm875_vm4, %v8500_v57, %v4014_v12 }
 0x587   : >> { %4482 = vrot.lane.b32.xlu2 %v4462_v4, %s5730_s15  ;;  %v3967_v42 = vsel %vm826_vm3, %v8472_v21, %v3966_v39  ;;  %v5599_v21 = vld [vmem:[%s8106_s10 + $0x60] sm:$0xff]  ;;  %v4636_v4 = vrot.slane %v5465_v17, 1 }
 0x588   : >> { %4655 = vrot.lane.b32.xlu1 %v4634_v25, %s5729_s26  ;;  %v3389_v60 = vsel %vm245_vm0, %v5599_v21, %v8723_v38  ;;  %v8934_v21 = vld [vmem:[%s8106_s10 + $0x190] sm:$0xff] }
 0x589   : >> { %4434 = vrot.lane.b32.xlu0 %v4414_v52, %s5729_s26  ;;  %v8857_v26 = vpop.permute.xlu2 %3768  ;;  %v4685_v52 = vsel %vm875_vm4, %v8900_v50, %v4684_v51  ;;  %v4637_v39 = vsel %vm826_vm3, %v4635_v16, %v4636_v4  ;;  %v5451_v4 = vld [vmem:[%s9451_s3 + $0xb8] sm:$0xff] }
 0x58a   : >> { %v3765_v47 = vpop.permute.xlu1 %3764  ;;  %4559 = vmatpush.msra.mxu3 %v5451_v4 }
 0x58b   : >> { %v3544_v34 = vpop.permute.xlu0 %3543  ;;  %v3834_v14 = vsel %vm245_vm0, %v8428_v41, %v3765_v47  ;;  %v5386_v47 = vld [vmem:[%s8106_s10 + $0xf8] sm:$0x3] }
 0x58c   : >> { %v3612_v32 = vsel %vm245_vm0, %v8428_v41, %v3544_v34  ;;  %v3613_v41 = vsel %vm245_vm0, %v8464_v24, %v8807_v0 }
 0x58d   : >> { %v3620_v31 = vsel %vm932_vm5, %v3612_v32, %v8786_v37  ;;  %v4241_v37 = vrot.slane %v5413_v40, 2 }
 0x58e   : >> { %5347 = vmatmul.msk.f32.gmra.mxu3 %vm1094_vm6, %v3620_v31  ;;  %v5600_v31 = vld [vmem:[%s8106_s10 + $0x70] sm:$0xff] }
 0x58f   : >> { %4035 = vrot.lane.b32.xlu2 %v4015_v27, %s5730_s15  ;;  %v4242_v38 = vsel %vm875_vm4, %v4680_v62, %v4241_v37  ;;  %v4464_v62 = vrot.slane %v5440_v59, 2  ;;  %v3969_v27 = vrot.slane %v5386_v47, 1 }
 0x590   : >> { %3987 = vrot.lane.b32.xlu1 %v3967_v42, %s5729_s26  ;;  %v3390_v42 = vsel %vm245_vm0, %v5600_v31, %v8719_v44  ;;  %v3836_v44 = vsel %vm245_vm0, %v8514_v13, %v8857_v26  ;;  %v5423_v26 = vld [vmem:[%s9451_s3 + $0x98] sm:$0xff] }
 0x591   : >> { %4703 = vrot.lane.b32.xlu0 %v4682_v63, %s5730_s15  ;;  %v8877_v57 = vpop.permute.xlu2 %3373  ;;  %v4465_v12 = vsel %vm875_vm4, %v8900_v50, %v4464_v62  ;;  %v3970_v37 = vsel %vm826_vm3, %v8526_v30, %v3969_v27  ;;  %v8948_v30 = vrot.slane %v8934_v21, 1  ;;  %v5417_v31 = vld [vmem:[%s8106_s10 + $0x198] sm:$0x3] }
 0x592   : >> { %v3370_v6 = vpop.permute.xlu1 %3369 }
 0x593   : >> { %v3813_v18 = vpop.permute.xlu0 %3812  ;;  %v3397_v15 = vsel %vm932_vm5, %v3389_v60, %v3370_v6  ;;  %v5442_v60 = vld [vmem:[%s8106_s10 + $0x198] sm:$0x3] }
 0x594   : >> { %5321 = vmatmul.msk.f32.gmra.mxu2 %vm1094_vm6, %v3397_v15  ;;  %v3842_v55 = vsel %vm932_vm5, %v3834_v14, %v3813_v18  ;;  %v5467_v6 = vld [vmem:[%s8106_s10 + $0x198] sm:$0x3]  ;;  %v4244_v15 = vrot.slane %v5415_v46, 2 }
 0x595   : >> { %5373 = vmatmul.msk.f32.gmra.mxu0 %vm1094_vm6, %v3842_v55  ;;  %v4639_v56 = vrot.slane %v5467_v6, 1  ;;  %v5601_v55 = vld [vmem:[%s8106_s10 + $0x80] sm:$0xff] }
 0x597   : >> { %4436 = vrot.lane.b32.xlu2 %v4417_v61, %s5729_s26  ;;  %v3391_v61 = vsel %vm245_vm0, %v5601_v55, %v8604_v54  ;;  %v4640_v62 = vsel %vm826_vm3, %v8948_v30, %v4639_v56  ;;  %v5422_v54 = vld [vmem:[%s9451_s3 + $0x90] sm:$0xff]  ;;  %v5469_v55 = vld [vmem:[%s8106_s10 + $0x1a8] sm:$0x3] }
 0x598   : >> { %4261 = vrot.lane.b32.xlu1 %v4242_v38, %s5730_s15 }
 0x599   : >> { %4213 = vrot.lane.b32.xlu0 %v4194_v28, %s5729_s26  ;;  %v8902_v49 = vpop.permute.xlu2 %3597 }
 0x59a   : >> { %v3594_v53 = vpop.permute.xlu1 %3593 }
 0x59b   : >> { %v3767_v8 = vpop.permute.xlu0 %3766  ;;  %v3621_v25 = vsel %vm932_vm5, %v3613_v41, %v3594_v53  ;;  %v3399_v41 = vsel %vm932_vm5, %v3391_v61, %v8877_v57  ;;  %v4245_v57 = vsel %vm875_vm4, %v8900_v50, %v4244_v15  ;;  %v5388_v53 = vld [vmem:[%s8106_s10 + $0x108] sm:$0x3] }
 0x59c   : >> { %v3835_v0 = vsel %vm245_vm0, %v8464_v24, %v3767_v8  ;;  %5348 = vmatmul.msk.f32.gmra.mxu3 %vm1094_vm6, %v3621_v25  ;;  %v4196_v24 = vrot.slane %v5415_v46, 1  ;;  %v3972_v8 = vrot.slane %v5388_v53, 1  ;;  %v4686_v25 = vrot.slane %v8934_v21, 2  ;;  %v5444_v61 = vld [vmem:[%s8106_s10 + $0x1a8] sm:$0x3] }
 0x59d   : >> { %v3843_v19 = vsel %vm932_vm5, %v3835_v0, %v8837_v3  ;;  %v4017_v3 = vrot.slane %v5386_v47, 2  ;;  %v4687_v0 = vrot.slane %v5467_v6, 2  ;;  %v5396_v6 = vld [vmem:[%s9451_s3 + $0x80] sm:$0xff] }
 0x59e   : >> { %5374 = vmatmul.msk.f32.gmra.mxu0 %vm1094_vm6, %v3843_v19  ;;  %v4197_v59 = vsel %vm826_vm3, %v4635_v16, %v4196_v24  ;;  %v4419_v16 = vrot.slane %v5442_v60, 1  ;;  %v4467_v19 = vrot.slane %v5442_v60, 2  ;;  %v3973_v46 = vsel %vm826_vm3, %v8579_v5, %v3972_v8  ;;  %v5449_v24 = vld [vmem:[%s9451_s3 + $0xa8] sm:$0xff] }
 0x59f   : >> { %4705 = vrot.lane.b32.xlu2 %v4685_v52, %s5730_s15  ;;  %v4018_v36 = vsel %vm875_vm4, %v8557_v7, %v4017_v3  ;;  %v5424_v7 = vld [vmem:[%s9451_s3 + $0xa0] sm:$0xff]  ;;  %v5397_v5 = vld [vmem:[%s9451_s3 + $0x88] sm:$0xff]  ;;  %v4020_v60 = vrot.slane %v5388_v53, 2 }
 0x5a0   : >> { %4484 = vrot.lane.b32.xlu1 %v4465_v12, %s5730_s15  ;;  %4336 = vmatpush.msra.mxu2 %v5424_v7  ;;  %v5450_v12 = vld [vmem:[%s9451_s3 + $0xb0] sm:$0xff]  ;;  %v4468_v27 = vsel %vm875_vm4, %v4686_v25, %v4467_v19 }
 0x5a1   : >> { %4657 = vrot.lane.b32.xlu0 %v4637_v39, %s5729_s26  ;;  %v8921_v34 = vpop.permute.xlu2 %3551  ;;  %4560 = vmatpush.msra.mxu3 %v5450_v12 }
 0x5a2   : >> { %v3548_v32 = vpop.permute.xlu1 %3547  ;;  %4337 = vmatpush.msra.mxu2 %v5423_v26  ;;  %4112 = vmatpush.msra.mxu1 %v5397_v5  ;;  %v9033_v26 = vld [vmem:[%s8106_s10 + $0x1a0] sm:$0xff] }
 0x5a3   : >> { %v3372_v63 = vpop.permute.xlu0 %3371  ;;  %v3614_v38 = vsel %vm245_vm0, %v8514_v13, %v3548_v32  ;;  %v4420_v13 = vsel %vm826_vm3, %v8948_v30, %v4419_v16  ;;  %v4688_v32 = vsel %vm875_vm4, %v4686_v25, %v4687_v0  ;;  %4561 = vmatpush.msra.mxu3 %v5449_v24  ;;  %v5390_v0 = vld [vmem:[%s8106_s10 + $0x118] sm:$0x3] }
 0x5a4   : >> { %v3398_v40 = vsel %vm932_vm5, %v3390_v42, %v3372_v63  ;;  %4338 = vmatpush.msra.mxu2 %v5422_v54  ;;  %v4247_v42 = vrot.slane %v5417_v31, 2  ;;  %4113 = vmatpush.msra.mxu1 %v5396_v6  ;;  %v3975_v19 = vrot.slane %v5390_v0, 1 }
 0x5a5   : >> { %5322 = vmatmul.msk.f32.gmra.mxu2 %vm1094_vm6, %v3398_v40  ;;  %v5602_v40 = vld [vmem:[%s8106_s10 + $0x90] sm:$0xff] }
 0x5a6   : >> { %v4248_v16 = vsel %vm875_vm4, %v4686_v25, %v4247_v42  ;;  %v3976_v42 = vsel %vm826_vm3, %v8615_v11, %v3975_v19  ;;  %v5392_v19 = vld [vmem:[%s8106_s10 + $0x128] sm:$0x3] }
 0x5a7   : >> { %4215 = vrot.lane.b32.xlu2 %v4197_v59, %s5729_s26  ;;  %v3392_v59 = vsel %vm245_vm0, %v5602_v40, %v8746_v20  ;;  %v5419_v40 = vld [vmem:[%s8106_s10 + $0x1a8] sm:$0x3] }
 0x5a8   : >> { %4037 = vrot.lane.b32.xlu1 %v4018_v36, %s5730_s15  ;;  %v4250_v11 = vrot.slane %v5419_v40, 2 }
 0x5a9   : >> { %3989 = vrot.lane.b32.xlu0 %v3970_v37, %s5729_s26  ;;  %v8950_v14 = vpop.permute.xlu2 %3820 }
 0x5aa   : >> { %v3817_v18 = vpop.permute.xlu1 %3816 }
 0x5ab   : >> { %v3596_v28 = vpop.permute.xlu0 %3595  ;;  %v3844_v17 = vsel %vm932_vm5, %v3836_v44, %v3817_v18  ;;  %v9013_v36 = vpop.f32.mrf.mxu1  ;;  %v5395_v18 = vld [vmem:[%s9451_s3 + $0x78] sm:$0xff] }
 0x5ac   : >> { %v3622_v51 = vsel %vm932_vm5, %v3614_v38, %v3596_v28  ;;  %5375 = vmatmul.msk.f32.gmra.mxu0 %vm1094_vm6, %v3844_v17  ;;  %4114 = vmatpush.msra.mxu1 %v5395_v18  ;;  %v4470_v38 = vrot.slane %v5444_v61, 2  ;;  %v3616_v28 = vsel %vm245_vm0, %v8598_v43, %v8921_v34 }
 0x5ad   : >> { %5323 = vmatmul.msk.f32.gmra.mxu2 %vm1094_vm6, %v3399_v41  ;;  %5349 = vmatmul.msk.f32.gmra.mxu3 %vm1094_vm6, %v3622_v51  ;;  %v4422_v51 = vrot.slane %v5444_v61, 1 }
 0x5af   : >> { %4659 = vrot.lane.b32.xlu2 %v4640_v62, %s5729_s26  ;;  %v4689_v62 = vrot.slane %v9033_v26, 2 }
 0x5b0   : >> { %4438 = vrot.lane.b32.xlu1 %v4420_v13, %s5729_s26 }
 0x5b1   : >> { %4263 = vrot.lane.b32.xlu0 %v4245_v57, %s5730_s15  ;;  %v8984_v52 = vpop.permute.xlu2 %3774  ;;  %v4471_v53 = vsel %vm875_vm4, %v4689_v62, %v4470_v38  ;;  %v4251_v38 = vsel %vm875_vm4, %v4689_v62, %v4250_v11 }
 0x5b2   : >> { %v3771_v50 = vpop.permute.xlu1 %3770 }
 0x5b3   : >> { %v3550_v39 = vpop.permute.xlu0 %3549  ;;  %v3837_v44 = vsel %vm245_vm0, %v8569_v10, %v3771_v50 }
 0x5b4   : >> { %v3615_v47 = vsel %vm245_vm0, %v8569_v10, %v3550_v39  ;;  %v4021_v10 = vsel %vm875_vm4, %v8582_v9, %v4020_v60  ;;  %v4642_v9 = vrot.slane %v5469_v55, 1  ;;  %v5477_v39 = vld [vmem:[%s9451_s3 + $0xc8] sm:$0xff] }
 0x5b5   : >> { %v3623_v3 = vsel %vm932_vm5, %v3615_v47, %v8902_v49  ;;  %v4199_v49 = vrot.slane %v5417_v31, 1 }
 0x5b6   : >> { %5350 = vmatmul.msk.f32.gmra.mxu3 %vm1094_vm6, %v3623_v3 }
 0x5b7   : >> { %3991 = vrot.lane.b32.xlu2 %v3973_v46, %s5729_s26  ;;  %v4200_v15 = vsel %vm826_vm3, %v8948_v30, %v4199_v49  ;;  %v9044_v30 = vrot.slane %v9033_v26, 1  ;;  %v4690_v46 = vrot.slane %v5469_v55, 2 }
 0x5b8   : >> { %4707 = vrot.lane.b32.xlu1 %v4688_v32, %s5730_s15  ;;  %v5476_v32 = vld [vmem:[%s9451_s3 + $0xc0] sm:$0xff] }
 0x5b9   : >> { %4486 = vrot.lane.b32.xlu0 %v4468_v27, %s5730_s15  ;;  %v9008_v63 = vpop.permute.xlu2 %4478  ;;  %v4643_v8 = vsel %vm826_vm3, %v9044_v30, %v4642_v9  ;;  %v4423_v25 = vsel %vm826_vm3, %v9044_v30, %v4422_v51  ;;  %v4691_v49 = vsel %vm875_vm4, %v4689_v62, %v4690_v46  ;;  %v5471_v9 = vld [vmem:[%s8106_s10 + $0x1b8] sm:$0x3]  ;;  %v4026_v46 = vrot.slane %v5392_v19, 2 }
 0x5ba   : >> { %v3376_v37 = vpop.permute.xlu1 %3375  ;;  %v9068_v50 = vpop.f32.mrf.mxu0  ;;  %v4693_v51 = vrot.slane %v5471_v9, 2 }
 0x5bb   : >> { %v3819_v7 = vpop.permute.xlu0 %3818  ;;  %v3400_v56 = vsel %vm932_vm5, %v3392_v59, %v3376_v37  ;;  %v9093_v59 = vld [vmem:[%s8106_s10 + $0x1b0] sm:$0xff]  ;;  %v5446_v37 = vld [vmem:[%s8106_s10 + $0x1b8] sm:$0x3] }
 0x5bc   : >> { %5324 = vmatmul.msk.f32.gmra.mxu2 %vm1094_vm6, %v3400_v56  ;;  %v3845_v20 = vsel %vm932_vm5, %v3837_v44, %v3819_v7  ;;  %v4202_v7 = vrot.slane %v5419_v40, 1  ;;  %v4644_v56 = vrot.slane %v9093_v59, 1 }
 0x5bd   : >> { %5376 = vmatmul.msk.f32.gmra.mxu0 %vm1094_vm6, %v3845_v20 }
 0x5bf   : >> { %4265 = vrot.lane.b32.xlu2 %v4248_v16, %s5730_s15 }
 0x5c0   : >> { %4217 = vrot.lane.b32.xlu1 %v4200_v15, %s5729_s26 }
 0x5c1   : >> { %4039 = vrot.lane.b32.xlu0 %v4021_v10, %s5730_s15  ;;  %v9046_v17 = vpop.permute.xlu2 %4209 }
 0x5c2   : >> { %v9048_v41 = vpop.f32.mrf.mxu1  ;;  %v3600_v54 = vpop.permute.xlu1 %3599 }
 0x5c3   : >> { %v3773_v13 = vpop.permute.xlu0 %3772  ;;  %v3624_v34 = vsel %vm932_vm5, %v3616_v28, %v3600_v54  ;;  %v3169_v6 = vpop.f32.mrf.mxu0  ;;  %v4203_v28 = vsel %vm826_vm3, %v9044_v30, %v4202_v7  ;;  %v4473_v54 = vrot.slane %v5446_v37, 2 }
 0x5c4   : >> { %v3838_v57 = vsel %vm245_vm0, %v8598_v43, %v3773_v13  ;;  %5351 = vmatmul.msk.f32.gmra.mxu3 %vm1094_vm6, %v3624_v34  ;;  %v5478_v43 = vld [vmem:[%s9451_s3 + $0xd0] sm:$0xff] }
 0x5c5   : >> { %v3846_v4 = vsel %vm932_vm5, %v3838_v57, %v8950_v14  ;;  %4782 = vmatpush.msra.mxu0 %v5478_v43  ;;  %v4023_v14 = vrot.slane %v5390_v0, 2  ;;  %v4645_v57 = vrot.slane %v5471_v9, 1 }
 0x5c6   : >> { %5377 = vmatmul.msk.f32.gmra.mxu0 %vm1094_vm6, %v3846_v4  ;;  %v5603_v4 = vld [vmem:[%s8106_s10 + $0xc0] sm:$0xff] }
 0x5c7   : >> { %4488 = vrot.lane.b32.xlu2 %v4471_v53, %s5730_s15  ;;  %4783 = vmatpush.msra.mxu0 %v5477_v39  ;;  %v4024_v31 = vsel %vm875_vm4, %v8649_v48, %v4023_v14  ;;  %v3839_v48 = vsel %vm245_vm0, %v8678_v29, %v8984_v52  ;;  %v3178_v55 = vpop.f32.mrf.mxu2  ;;  %v4646_v14 = vsel %vm826_vm3, %v4644_v56, %v4645_v57 }
 0x5c8   : >> { %4661 = vrot.lane.b32.xlu1 %v4643_v8, %s5729_s26 }
 0x5c9   : >> { %4440 = vrot.lane.b32.xlu0 %v4423_v25, %s5729_s26  ;;  %v9072_v12 = vpop.permute.xlu2 %4653  ;;  %4784 = vmatpush.msra.mxu0 %v5476_v32  ;;  %v3978_v32 = vrot.slane %v5392_v19, 1  ;;  %v5394_v19 = vld [vmem:[%s8106_s10 + $0x138] sm:$0x3] }
 0x5ca   : >> { %v9077_v47 = vpop.f32.mrf.mxu1  ;;  %v4256_v24 = vpop.permute.xlu1 %4255 }
 0x5cb   : >> { %v4208_v3 = vpop.permute.xlu0 %4207 }
 0x5cc   : >> { %v4279_v27 = vsel %vm245_vm0, %v8674_v35, %v4208_v3  ;;  %v4425_v35 = vrot.slane %v5446_v37, 1  ;;  %v3979_v37 = vsel %vm826_vm3, %v3757_v58, %v3978_v32 }
 0x5cd   : >> { %v4287_v5 = vsel %vm932_vm5, %v4279_v27, %v4256_v24 }
 0x5ce   : >> { %5425 = vmatmul.msk.f32.vlgmr.msra.gmra.mxu2 %vm1094_vm6, %v4287_v5  ;;  %v4426_v10 = vsel %vm826_vm3, %v4644_v56, %v4425_v35  ;;  %v5448_v35 = vld [vmem:[%s8106_s10 + $0x1c8] sm:$0x3] }
 0x5cf   : >> { %4041 = vrot.lane.b32.xlu2 %v4024_v31, %s5730_s15  ;;  %v3181_v39 = vpop.f32.mrf.mxu2  ;;  %v4428_v58 = vrot.slane %v5448_v35, 1 }
 0x5d0   : >> { %3993 = vrot.lane.b32.xlu1 %v3976_v42, %s5729_s26  ;;  %v9153_v40 = vpop.f32.mrf.mxu3 }
 0x5d1   : >> { %4709 = vrot.lane.b32.xlu0 %v4691_v49, %s5730_s15  ;;  %v9102_v60 = vpop.permute.xlu2 %3985  ;;  %v5421_v49 = vld [vmem:[%s8106_s10 + $0x1b8] sm:$0x3] }
 0x5d2   : >> { %v3234_v44 = vpop.f32.mrf.mxu1  ;;  %v3823_v16 = vpop.permute.xlu1 %3822  ;;  %v4253_v7 = vrot.slane %v5421_v49, 2 }
 0x5d3   : >> { %v9105_v20 = vadd.f32 %v3234_v44, %v3169_v6  ;;  %v4431_v18 = vpop.permute.xlu0 %4430  ;;  %v3847_v52 = vsel %vm932_vm5, %v3839_v48, %v3823_v16 }
 0x5d4   : >> { %v4502_v15 = vsel %vm245_vm0, %v8707_v45, %v4431_v18  ;;  %5378 = vmatmul.msk.f32.gmra.mxu0 %vm1094_vm6, %v3847_v52 }
 0x5d5   : >> { %v4510_v61 = vsel %vm932_vm5, %v4502_v15, %v9008_v63  ;;  %v4472_v63 = vrot.slane %v9093_v59, 2 }
 0x5d6   : >> { %5452 = vmatmul.msk.f32.vlgmr.msra.gmra.mxu3 %vm1094_vm6, %v4510_v61 }
 0x5d7   : >> { %4442 = vrot.lane.b32.xlu2 %v4426_v10, %s5729_s26  ;;  %v4694_v25 = vsel %vm875_vm4, %v4472_v63, %v4693_v51  ;;  %v4474_v43 = vsel %vm875_vm4, %v4472_v63, %v4473_v54  ;;  %v5473_v10 = vld [vmem:[%s8106_s10 + $0x1c8] sm:$0x3] }
 0x5d8   : >> { %4267 = vrot.lane.b32.xlu1 %v4251_v38, %s5730_s15  ;;  %v4648_v38 = vrot.slane %v5473_v10, 1  ;;  %v9186_v51 = vpop.f32.mrf.mxu3 }
 0x5d9   : >> { %4219 = vrot.lane.b32.xlu0 %v4203_v28, %s5729_s26  ;;  %v9123_v13 = vpop.permute.xlu2 %4259  ;;  %v4254_v28 = vsel %vm875_vm4, %v4472_v63, %v4253_v7 }
 0x5da   : >> { %v3237_v62 = vpop.f32.mrf.mxu1  ;;  %v4032_v30 = vpop.permute.xlu1 %4031 }
 0x5db   : >> { %v9126_v34 = vadd.f32 %v3237_v62, %v9013_v36  ;;  %v3984_v53 = vpop.permute.xlu0 %3983  ;;  %v4280_v36 = vsel %vm245_vm0, %v8707_v45, %v9046_v17  ;;  %v4027_v45 = vsel %vm875_vm4, %v3805_v22, %v4026_v46  ;;  %v4205_v17 = vrot.slane %v5421_v49, 1  ;;  %v5604_v62 = vld [vmem:[%s8106_s10 + $0xd0] sm:$0xff] }
 0x5dc   : >> { %v4055_v8 = vsel %vm245_vm0, %v5603_v4, %v3984_v53  ;;  %v4725_v22 = vsel %vm245_vm0, %v8757_v33, %v9072_v12  ;;  %v4056_v57 = vsel %vm245_vm0, %v5604_v62, %v9102_v60  ;;  %v4476_v4 = vrot.slane %v5448_v35, 2  ;;  %v5605_v62 = vld [vmem:[%s8106_s10 + $0xe0] sm:$0xff] }
 0x5dd   : >> { %v4063_v0 = vsel %vm932_vm5, %v4055_v8, %v4032_v30  ;;  %v4206_v11 = vsel %vm826_vm3, %v4644_v56, %v4205_v17  ;;  %v4696_v30 = vrot.slane %v5473_v10, 2 }
 0x5de   : >> { %5398 = vmatmul.msk.f32.vlgmr.msra.gmra.mxu1 %vm1094_vm6, %v4063_v0 }
 0x5df   : >> { %4711 = vrot.lane.b32.xlu2 %v4694_v25, %s5730_s15 }
 0x5e0   : >> { %4490 = vrot.lane.b32.xlu1 %v4474_v43, %s5730_s15 }
 0x5e1   : >> { %4663 = vrot.lane.b32.xlu0 %v4646_v14, %s5729_s26  ;;  %v9142_v24 = vpop.permute.xlu2 %4482  ;;  %v9204_v14 = vld [vmem:[%s8106_s10 + $0x130] sm:$0xff] }
 0x5e2   : >> { %v3240_v3 = vpop.f32.mrf.mxu1  ;;  %v4433_v31 = vpop.permute.xlu1 %4432 }
 0x5e3   : >> { %v9145_v27 = vadd.f32 %v3240_v3, %v9048_v41  ;;  %v4258_v5 = vpop.permute.xlu0 %4257  ;;  %v9159_v41 = vld [vmem:[%s8106_s10 + $0x1c0] sm:$0xff]  ;;  %v4503_v56 = vsel %vm245_vm0, %v8757_v33, %v4433_v31  ;;  %v3981_v3 = vrot.slane %v5394_v19, 1  ;;  %v5475_v31 = vld [vmem:[%s8106_s10 + $0x1d8] sm:$0x3] }
 0x5e4   : >> { %v4288_v42 = vsel %vm932_vm5, %v4280_v36, %v4258_v5  ;;  %v4427_v29 = vrot.slane %v9159_v41, 1  ;;  %v4695_v63 = vrot.slane %v9159_v41, 2 }
 0x5e5   : >> { %5426 = vmatmul.msk.f32.gmra.mxu2 %vm1094_vm6, %v4288_v42 }
 0x5e6   : >> { %v4429_v61 = vsel %vm826_vm3, %v4427_v29, %v4428_v58  ;;  %v4697_v36 = vsel %vm875_vm4, %v4695_v63, %v4696_v30  ;;  %v4477_v32 = vsel %vm875_vm4, %v4695_v63, %v4476_v4 }
 0x5e7   : >> { %v9162_v48 = vpop.f32.mrf.mxu2  ;;  %4221 = vrot.lane.b32.xlu2 %v4206_v11, %s5729_s26  ;;  %v4028_v11 = vrot.slane %v9204_v14, 2 }
 0x5e8   : >> { %4043 = vrot.lane.b32.xlu1 %v4027_v45, %s5730_s15 }
 0x5e9   : >> { %3995 = vrot.lane.b32.xlu0 %v3979_v37, %s5729_s26  ;;  %v9172_v6 = vpop.permute.xlu2 %4035  ;;  %v4651_v37 = vrot.slane %v5475_v31, 1 }
 0x5ea   : >> { %v3243_v44 = vpop.f32.mrf.mxu1  ;;  %v4702_v18 = vpop.permute.xlu1 %4701 }
 0x5eb   : >> { %v9176_v16 = vadd.f32 %v3243_v44, %v3178_v55  ;;  %v4481_v15 = vpop.permute.xlu0 %4480  ;;  %v4733_v52 = vsel %vm932_vm5, %v4725_v22, %v4702_v18  ;;  %v4649_v55 = vsel %vm826_vm3, %v4427_v29, %v4648_v38  ;;  %v4029_v22 = vrot.slane %v5394_v19, 2 }
 0x5ec   : >> { %v4511_v12 = vsel %vm932_vm5, %v4503_v56, %v4481_v15  ;;  %5479 = vmatmul.msk.f32.vlgmr.msra.gmra.mxu0 %vm1094_vm6, %v4733_v52  ;;  %v4699_v52 = vrot.slane %v5475_v31, 2 }
 0x5ed   : >> { %5453 = vmatmul.msk.f32.gmra.mxu3 %vm1094_vm6, %v4511_v12 }
 0x5ef   : >> { %v3449_v9 = vpop.f32.mrf.mxu2  ;;  %4665 = vrot.lane.b32.xlu2 %v4649_v55, %s5729_s26 }
 0x5f0   : >> { %v3471_v54 = vadd.f32 %v3449_v9, %v9105_v20  ;;  %4444 = vrot.lane.b32.xlu1 %v4429_v61, %s5729_s26  ;;  %v9219_v49 = vpop.f32.mrf.mxu3 }
 0x5f1   : >> { %4269 = vrot.lane.b32.xlu0 %v4254_v28, %s5730_s15  ;;  %v9196_v8 = vpop.permute.xlu2 %4436 }
 0x5f2   : >> { %v3246_v53 = vpop.f32.mrf.mxu1  ;;  %v4212_v25 = vpop.permute.xlu1 %4211 }
 0x5f3   : >> { %v9198_v20 = vadd.f32 %v3246_v53, %v3181_v39  ;;  %v4034_v0 = vpop.permute.xlu0 %4033  ;;  %v4281_v43 = vsel %vm245_vm0, %v8757_v33, %v4212_v25  ;;  %v3980_v39 = vrot.slane %v9204_v14, 1  ;;  %v9215_v33 = vld [vmem:[%s8106_s10 + $0x1d0] sm:$0xff] }
 0x5f4   : >> { %v4064_v60 = vsel %vm932_vm5, %v4056_v57, %v4034_v0  ;;  %v4289_v46 = vsel %vm932_vm5, %v4281_v43, %v9123_v13  ;;  %v4650_v17 = vrot.slane %v9215_v33, 1  ;;  %v4698_v15 = vrot.slane %v9215_v33, 2 }
 0x5f5   : >> { %5399 = vmatmul.msk.f32.gmra.mxu1 %vm1094_vm6, %v4064_v60  ;;  %5427 = vmatmul.msk.f32.gmra.mxu2 %vm1094_vm6, %v4289_v46  ;;  %v3982_v42 = vsel %vm826_vm3, %v3980_v39, %v3981_v3 }
 0x5f6   : >> { %v4652_v18 = vsel %vm826_vm3, %v4650_v17, %v4651_v37  ;;  %v4700_v10 = vsel %vm875_vm4, %v4698_v15, %v4699_v52 }
 0x5f7   : >> { %v3452_v5 = vpop.f32.mrf.mxu2  ;;  %3997 = vrot.lane.b32.xlu2 %v3982_v42, %s5729_s26 }
 0x5f8   : >> { %v3472_v45 = vadd.f32 %v3452_v5, %v9126_v34  ;;  %4713 = vrot.lane.b32.xlu1 %v4697_v36, %s5730_s15 }
 0x5f9   : >> { %4492 = vrot.lane.b32.xlu0 %v4477_v32, %s5730_s15  ;;  %v9225_v13 = vpop.f32.mrf.mxu0  ;;  %v4706_v7 = vpop.permute.xlu2 %4705 }
 0x5fa   : >> { %v3249_v35 = vpop.f32.mrf.mxu1  ;;  %v4656_v58 = vpop.permute.xlu1 %4655 }
 0x5fb   : >> { %v9230_v29 = vadd.f32 %v3249_v35, %v9153_v40  ;;  %v4435_v34 = vpop.permute.xlu0 %4434  ;;  %v4030_v40 = vsel %vm875_vm4, %v4028_v11, %v4029_v22  ;;  %v4726_v55 = vsel %vm245_vm0, %v8827_v1, %v4656_v58 }
 0x5fc   : >> { %v4504_v44 = vsel %vm245_vm0, %v8827_v1, %v4435_v34  ;;  %v5606_v34 = vld [vmem:[%s8106_s10 + $0xf0] sm:$0xff] }
 0x5fd   : >> { %v4512_v56 = vsel %vm932_vm5, %v4504_v44, %v9142_v24 }
 0x5fe   : >> { %5454 = vmatmul.msk.f32.gmra.mxu3 %vm1094_vm6, %v4512_v56 }
 0x5ff   : >> { %v3455_v12 = vpop.f32.mrf.mxu2  ;;  %4715 = vrot.lane.b32.xlu2 %v4700_v10, %s5730_s15 }
 0x600   : >> { %v3473_v61 = vadd.f32 %v3455_v12, %v9145_v27  ;;  %v3673_v38 = vpop.f32.mrf.mxu3  ;;  %4667 = vrot.lane.b32.xlu1 %v4652_v18, %s5729_s26 }
 0x601   : >> { %v3695_v24 = vadd.f32 %v3673_v38, %v3471_v54  ;;  %4045 = vrot.lane.b32.xlu0 %v4030_v40, %s5730_s15  ;;  %v4216_v54 = vpop.permute.xlu2 %4215 }
 0x602   : >> { %v3988_v28 = vpop.permute.xlu1 %3987  ;;  %v4283_v15 = vsel %vm245_vm0, %v8871_v23, %v4216_v54 }
 0x603   : >> { %v3896_v9 = vpop.f32.mrf.mxu0  ;;  %v4057_v57 = vsel %vm245_vm0, %v5605_v62, %v3988_v28  ;;  %v4704_v30 = vpop.permute.xlu0 %4703 }
 0x604   : >> { %v9249_v63 = vadd.f32 %v3896_v9, %v3695_v24  ;;  %v4734_v27 = vsel %vm932_vm5, %v4726_v55, %v4704_v30  ;;  %v4065_v53 = vsel %vm932_vm5, %v4057_v57, %v9172_v6  ;;  %v4505_v6 = vsel %vm245_vm0, %v8871_v23, %v9196_v8 }
 0x605   : >> { %5480 = vmatmul.msk.f32.gmra.mxu0 %vm1094_vm6, %v4734_v27  ;;  %5400 = vmatmul.msk.f32.gmra.mxu1 %vm1094_vm6, %v4065_v53 }
 0x608   : >> { %v3676_v4 = vpop.f32.mrf.mxu3 }
 0x609   : >> { %v3696_v25 = vadd.f32 %v3676_v4, %v3472_v45  ;;  %v4660_v36 = vpop.permute.xlu2 %4659  ;;  %v5607_v4 = vld [vmem:[%s8106_s10 + $0x100] sm:$0xff] }
 0x60a   : >> { %v4262_v0 = vpop.permute.xlu1 %4261 }
 0x60b   : >> { %v4214_v43 = vpop.permute.xlu0 %4213 }
 0x60c   : >> { %v4282_v60 = vsel %vm245_vm0, %v8827_v1, %v4214_v43 }
 0x60d   : >> { %v4290_v19 = vsel %vm932_vm5, %v4282_v60, %v4262_v0 }
 0x60e   : >> { %5428 = vmatmul.msk.f32.gmra.mxu2 %vm1094_vm6, %v4290_v19 }
 0x611   : >> { %v3679_v46 = vpop.f32.mrf.mxu3  ;;  %v3992_v37 = vpop.permute.xlu2 %3991 }
 0x612   : >> { %v3697_v39 = vadd.f32 %v3679_v46, %v3473_v61  ;;  %v3899_v3 = vpop.f32.mrf.mxu0  ;;  %v4485_v31 = vpop.permute.xlu1 %4484  ;;  %v4728_v61 = vsel %vm245_vm0, %v8934_v21, %v4660_v36 }
 0x613   : >> { %v9263_v32 = vadd.f32 %v3899_v3, %v3696_v25  ;;  %v4658_v5 = vpop.permute.xlu0 %4657  ;;  %v4513_v42 = vsel %vm932_vm5, %v4505_v6, %v4485_v31  ;;  %v4059_v25 = vsel %vm245_vm0, %v5607_v4, %v3992_v37  ;;  %v3252_v3 = vpop.f32.mrf.mxu1 }
 0x614   : >> { %v4727_v1 = vsel %vm245_vm0, %v8871_v23, %v4658_v5  ;;  %5455 = vmatmul.msk.f32.gmra.mxu3 %vm1094_vm6, %v4513_v42 }
 0x615   : >> { %v4735_v45 = vsel %vm932_vm5, %v4727_v1, %v4706_v7  ;;  %v3253_v1 = vadd.f32 %v3252_v3, %v9186_v51 }
 0x616   : >> { %5481 = vmatmul.msk.f32.gmra.mxu0 %vm1094_vm6, %v4735_v45 }
 0x617   : >> { %v3458_v8 = vpop.f32.mrf.mxu2 }
 0x618   : >> { %v3474_v17 = vadd.f32 %v3458_v8, %v9176_v16 }
 0x619   : >> { %v4266_v40 = vpop.permute.xlu2 %4265 }
 0x61a   : >> { %v4038_v35 = vpop.permute.xlu1 %4037 }
 0x61b   : >> { %v3902_v11 = vpop.f32.mrf.mxu0  ;;  %v3990_v58 = vpop.permute.xlu0 %3989 }
 0x61c   : >> { %v9272_v22 = vadd.f32 %v3902_v11, %v3697_v39  ;;  %v4058_v44 = vsel %vm245_vm0, %v5606_v34, %v3990_v58  ;;  %v5608_v34 = vld [vmem:[%s8106_s10 + $0x110] sm:$0xff] }
 0x61d   : >> { %v4066_v56 = vsel %vm932_vm5, %v4058_v44, %v4038_v35 }
 0x61e   : >> { %5401 = vmatmul.msk.f32.gmra.mxu1 %vm1094_vm6, %v4066_v56 }
 0x61f   : >> { %v3682_v18 = vpop.f32.mrf.mxu3 }
 0x620   : >> { %v3698_v7 = vadd.f32 %v3682_v18, %v3474_v17 }
 0x621   : >> { %v4489_v30 = vpop.permute.xlu2 %4488 }
 0x622   : >> { %v4439_v52 = vpop.permute.xlu1 %4438 }
 0x623   : >> { %v4264_v16 = vpop.permute.xlu0 %4263  ;;  %v4506_v23 = vsel %vm245_vm0, %v8934_v21, %v4439_v52 }
 0x624   : >> { %v4291_v12 = vsel %vm932_vm5, %v4283_v15, %v4264_v16 }
 0x625   : >> { %5429 = vmatmul.msk.f32.gmra.mxu2 %vm1094_vm6, %v4291_v12 }
 0x628   : >> { %v3461_v10 = vpop.f32.mrf.mxu2 }
 0x629   : >> { %v3475_v38 = vadd.f32 %v3461_v10, %v9198_v20  ;;  %v3905_v24 = vpop.f32.mrf.mxu0  ;;  %v4042_v6 = vpop.permute.xlu2 %4041 }
 0x62a   : >> { %v9285_v28 = vadd.f32 %v3905_v24, %v3698_v7  ;;  %v4708_v9 = vpop.permute.xlu1 %4707 }
 0x62b   : >> { %v4487_v55 = vpop.permute.xlu0 %4486  ;;  %v4736_v62 = vsel %vm932_vm5, %v4728_v61, %v4708_v9 }
 0x62c   : >> { %v4514_v57 = vsel %vm932_vm5, %v4506_v23, %v4487_v55  ;;  %5482 = vmatmul.msk.f32.gmra.mxu0 %vm1094_vm6, %v4736_v62 }
 0x62d   : >> { %5456 = vmatmul.msk.f32.gmra.mxu3 %vm1094_vm6, %v4514_v57 }
 0x630   : >> { %v3464_v27 = vpop.f32.mrf.mxu2  ;;  %v3685_v53 = vpop.f32.mrf.mxu3 }
 0x631   : >> { %v3476_v20 = vadd.f32 %v3464_v27, %v9230_v29  ;;  %v3699_v54 = vadd.f32 %v3685_v53, %v3475_v38  ;;  %v4443_v37 = vpop.permute.xlu2 %4442  ;;  %v3232_v27 = vadd.f32 %v9077_v47, %v9068_v50 }
 0x632   : >> { %v4218_v0 = vpop.permute.xlu1 %4217  ;;  %v4508_v38 = vsel %vm245_vm0, %v9093_v59, %v4443_v37 }
 0x633   : >> { %v4284_v43 = vsel %vm245_vm0, %v8934_v21, %v4218_v0  ;;  %v4040_v60 = vpop.permute.xlu0 %4039  ;;  %v3470_v53 = vadd.f32 %v9162_v48, %v3232_v27 }
 0x634   : >> { %v4067_v19 = vsel %vm932_vm5, %v4059_v25, %v4040_v60  ;;  %v4292_v36 = vsel %vm932_vm5, %v4284_v43, %v4266_v40  ;;  %v5609_v25 = vld [vmem:[%s8106_s10 + $0x120] sm:$0xff]  ;;  %s5487_s10 = sshll.u32 %s5722_s8, 6  ;;  %s2821_s8 = sadd.s32 1, %s5722_s8  }
 0x635   : >> { %5402 = vmatmul.msk.f32.gmra.mxu1 %vm1094_vm6, %v4067_v19  ;;  %5430 = vmatmul.msk.f32.gmra.mxu2 %vm1094_vm6, %v4292_v36  ;;  %v3694_v4 = vadd.f32 %v9219_v49, %v3470_v53  ;;  %s9353_s26 = scalar_lea.vmem %s5855_s25, %s5487_s10 [#allocation4]  ;;  %s9364_s15 = scalar_lea.vmem %s6801_s17, %s5487_s10 [#allocation7] }
 0x636   : >> { %p2818_p9 = scmp.ge.s32.totalorder %s2821_s8, 8  }
 0x637   : >> { %v3917_v36 = vadd.f32 %v9225_v13, %v3694_v4  ;;  %s5494_s16 = sshll.u32 (%p2818_p9), %s5784_s22, 9  ;;  %s4877_s23 = sshll.u32 (%p2818_p9), %s6801_s17, 4  ;;  %s4878_s23 = int_to_ptr.vmem [resolvable:$true] %s4877_s23 }
 0x638   : > { %s4876_s14 = scalar_lea.hbm (%p2818_p9), %s9453_s5, %s5494_s16  ;;  %s4865_s13 = scalar_lea.sflag (%p2818_p9), [#allocation6], %s5849_s12 }
 0x639   : >> { %v3688_v46 = vpop.f32.mrf.mxu3  ;;  %v4712_v12 = vpop.permute.xlu2 %4711  ;;  %s4879_s29 = sshll.u32 (%p2818_p9), %s4876_s14, 4  ;;  %s5660_s22 = scalar_lea.hbm (%p2818_p9), %s9453_s5, 1024  ;;  %s4880_s29 = int_to_ptr.hbm [resolvable:$true] %s4879_s29 }
 0x63a   : >> { %v3700_v29 = vadd.f32 %v3688_v46, %v3476_v20  ;;  %v3908_v39 = vpop.f32.mrf.mxu0  ;;  %v4662_v5 = vpop.permute.xlu1 %4661  ;;  %s5654_s28 = sshra.s32 (%p2818_p9), %s4880_s29, 4  ;;  %s5655_s28 = int_to_ptr.hbm [resolvable:$true] %s5654_s28 }
 0x63b   : >> { %v9302_v31 = vadd.f32 %v3908_v39, %v3699_v54  ;;  %v4441_v42 = vpop.permute.xlu0 %4440  ;;  %v4729_v58 = vsel %vm245_vm0, %v9033_v26, %v4662_v5  ;;  %s5656_s9 = scalar_lea.hbm (%p2818_p9), %s5655_s28, 512  ;;  %p5661_p3 = scmp.lt.s32.totalorder (%p2818_p9), %s5655_s28, %s9453_s5 }
 0x63c   : >> { %v4507_v21 = vsel %vm245_vm0, %v9033_v26, %v4441_v42  ;;  %v9350_v42 = vperm.slane %v5881_v2, 0  ;;  %p5657_p13 = scmp.ne.s32.totalorder (%p2818_p9), %s5655_s28, %s5656_s9  ;;  %p5662_p4 = scmp.lt.s32.totalorder (%p2818_p9), %s5660_s22, %s5656_s9 }
 0x63d   : >> { %v4515_v45 = vsel %vm932_vm5, %v4507_v21, %v4489_v30 }
 0x63e   : >> { %5457 = vmatmul.msk.f32.gmra.mxu3 %vm1094_vm6, %v4515_v45  ;;  %p5658_p0 = pnand (%p2818_p9), %p5657_p13, %p5813_p11  ;;  %p5663_p7 = por (%p2818_p9), %p5662_p4, %p5661_p3 }
 0x63f   : >> { %v3467_v8 = vpop.f32.mrf.mxu2 }
 0x640   : >> { %v3477_v17 = vadd.f32 %v3467_v8, %v3253_v1  ;;  %p5659_p1 = pneg (%p2818_p9), %p5658_p0 }
 0x641   : >> { %v4222_v57 = vpop.permute.xlu2 %4221 }
 0x642   : >> { %v3994_v35 = vpop.permute.xlu1 %3993  ;;  %v4286_v50 = vsel %vm245_vm0, %v9093_v59, %v4222_v57  ;;  %p5664_p5 = pnand (%p2818_p9), %p5663_p7, %p5659_p1 }
 0x643   : >> { %v3911_v11 = vpop.f32.mrf.mxu0  ;;  %v4060_v44 = vsel %vm245_vm0, %v5608_v34, %v3994_v35  ;;  %v4710_v18 = vpop.permute.xlu0 %4709 }
 0x644   : >> { %v9313_v56 = vadd.f32 %v3911_v11, %v3700_v29  ;;  %v4737_v51 = vsel %vm932_vm5, %v4729_v58, %v4710_v18  ;;  %v4068_v7 = vsel %vm932_vm5, %v4060_v44, %v4042_v6  ;;  %v4839_v11 = vld [vmem:[%s9353_s26] sm:$0xff] }
 0x645   : >> { %5483 = vmatmul.msk.f32.gmra.mxu0 %vm1094_vm6, %v4737_v51  ;;  %5403 = vmatmul.msk.f32.gmra.mxu1 %vm1094_vm6, %v4068_v7 }
 0x647   : >> { %v3691_v15 = vpop.f32.mrf.mxu3 }
 0x648   : >> { %v3701_v52 = vadd.f32 %v3691_v15, %v3477_v17 }
 0x649   : >> { %v4666_v19 = vpop.permute.xlu2 %4665 }
 0x64a   : >> { %v4268_v16 = vpop.permute.xlu1 %4267  ;;  %v4731_v13 = vsel %vm245_vm0, %v9159_v41, %v4666_v19 }
 0x64b   : >> { %v4220_v40 = vpop.permute.xlu0 %4219 }
 0x64c   : >> { %v4285_v10 = vsel %vm245_vm0, %v9033_v26, %v4220_v40 }
 0x64d   : >> { %v4293_v61 = vsel %vm932_vm5, %v4285_v10, %v4268_v16 }
 0x64e   : >> { %5431 = vmatmul.msk.f32.gmra.mxu2 %vm1094_vm6, %v4293_v61 }
 0x651   : >> { %v3914_v24 = vpop.f32.mrf.mxu0  ;;  %v4340_v48 = vpop.f32.mrf.mxu2 }
 0x652   : >> { %v9325_v9 = vadd.f32 %v3914_v24, %v3701_v52  ;;  %v4491_v23 = vpop.permute.xlu1 %4490  ;;  %v3998_v3 = vpop.permute.xlu2 %3997 }
 0x653   : >> { %v4664_v55 = vpop.permute.xlu0 %4663  ;;  %v4516_v62 = vsel %vm932_vm5, %v4508_v38, %v4491_v23  ;;  %v4840_v23 = vld [vmem:[%s9353_s26 + $0x8] sm:$0xff] }
 0x654   : >> { %v4730_v30 = vsel %vm245_vm0, %v9093_v59, %v4664_v55  ;;  %5458 = vmatmul.msk.f32.gmra.mxu3 %vm1094_vm6, %v4516_v62 }
 0x655   : >> { %v4738_v26 = vsel %vm932_vm5, %v4730_v30, %v4712_v12 }
 0x656   : >> { %5484 = vmatmul.msk.f32.gmra.mxu0 %vm1094_vm6, %v4738_v26 }
 0x659   : >> { %v4563_v39 = vpop.f32.mrf.mxu3 }
 0x65a   : >> { %v4044_v20 = vpop.permute.xlu1 %4043  ;;  %v4716_v44 = vpop.permute.xlu2 %4715 }
 0x65b   : >> { %v3996_v54 = vpop.permute.xlu0 %3995  ;;  %v4116_v43 = vpop.f32.mrf.mxu1 }
 0x65c   : >> { %v4061_v0 = vsel %vm245_vm0, %v5609_v25, %v3996_v54  ;;  %v4140_v6 = vadd.f32 %v4116_v43, %v3917_v36  ;;  %v4841_v25 = vld [vmem:[%s9353_s26 + $0x10] sm:$0xff] }
 0x65d   : >> { %v4069_v60 = vsel %vm932_vm5, %v4061_v0, %v4044_v20 }
 0x65e   : >> { %5404 = vmatmul.msk.f32.gmra.mxu1 %vm1094_vm6, %v4069_v60  ;;  %v4364_v46 = vadd.f32 %v4340_v48, %v4140_v6 }
 0x660   : >> { %v4587_v5 = vadd.f32 %v4563_v39, %v4364_v46  ;;  %v4842_v46 = vld [vmem:[%s9353_s26 + $0x18] sm:$0xff] }
 0x662   : >> { %v4445_v47 = vpop.permute.xlu1 %4444 }
 0x663   : >> { %v4270_v49 = vpop.permute.xlu0 %4269  ;;  %v4509_v45 = vsel %vm245_vm0, %v9159_v41, %v4445_v47  ;;  %v4062_v41 = vsel %vm245_vm0, %v9204_v14, %v3998_v3 }
 0x664   : >> { %v4294_v29 = vsel %vm932_vm5, %v4286_v50, %v4270_v49 }
 0x665   : >> { %5432 = vmatmul.msk.f32.gmra.mxu2 %vm1094_vm6, %v4294_v29 }
 0x668   : >> { %v4343_v40 = vpop.f32.mrf.mxu2 }
 0x669   : >> { %v4786_v59 = vpop.f32.mrf.mxu0 }
 0x66a   : >> { %v4810_v21 = vadd.f32 %v4786_v59, %v4587_v5  ;;  %v4714_v1 = vpop.permute.xlu1 %4713 }
 0x66b   : >> { %v4493_v8 = vpop.permute.xlu0 %4492  ;;  %v4739_v17 = vsel %vm932_vm5, %v4731_v13, %v4714_v1 }
 0x66c   : >> { %v4821_v37 = vadd.f32 %v9350_v42, %v4810_v21  ;;  %v4517_v35 = vsel %vm932_vm5, %v4509_v45, %v4493_v8  ;;  %5485 = vmatmul.msk.f32.gmra.mxu0 %vm1094_vm6, %v4739_v17  ;;  %v4843_v17 = vld [vmem:[%s9353_s26 + $0x20] sm:$0xff] }
 0x66d   : >> { %5459 = vmatmul.msk.f32.gmra.mxu3 %vm1094_vm6, %v4517_v35 }
 0x66e   : >> { %v4829_v58 = vmax.f32 %v4821_v37, 0.0 }
 0x670   : >> { %v4847_v34 = vadd.f32 %v4839_v11, %v4829_v58  ;;  %v4566_v10 = vpop.f32.mrf.mxu3 }
 0x672   : >> { %4856 = vst.msk [vmem:[%s9364_s15] sm:$0xff] %vm245_vm0, %v4847_v34  ;;  %v4668_v18 = vpop.permute.xlu1 %4667  ;;  %v4119_v16 = vpop.f32.mrf.mxu1 }
 0x673   : >> { %v4046_v51 = vpop.permute.xlu0 %4045  ;;  %v4732_v7 = vsel %vm245_vm0, %v9215_v33, %v4668_v18  ;;  %v4141_v14 = vadd.f32 %v4119_v16, %v9249_v63 }
 0x674   : >> { %v4070_v15 = vsel %vm932_vm5, %v4062_v41, %v4046_v51  ;;  %v4740_v52 = vsel %vm932_vm5, %v4732_v7, %v4716_v44 }
 0x675   : >> { %5405 = vmatmul.msk.f32.gmra.mxu1 %vm1094_vm6, %v4070_v15  ;;  %5486 = vmatmul.msk.f32.gmra.mxu0 %vm1094_vm6, %v4740_v52  ;;  %v4365_v12 = vadd.f32 %v4343_v40, %v4141_v14  ;;  %v4844_v15 = vld [vmem:[%s9353_s26 + $0x28] sm:$0xff] }
 0x677   : >> { %v4588_v61 = vadd.f32 %v4566_v10, %v4365_v12 }
 0x678   : >> { %v4346_v26 = vpop.f32.mrf.mxu2 }
 0x681   : >> { %v4569_v27 = vpop.f32.mrf.mxu3 }
 0x682   : >> { %v4789_v38 = vpop.f32.mrf.mxu0  ;;  %v4122_v62 = vpop.f32.mrf.mxu1 }
 0x683   : >> { %v4811_v24 = vadd.f32 %v4789_v38, %v4588_v61  ;;  %v4142_v30 = vadd.f32 %v4122_v62, %v9263_v32 }
 0x685   : >> { %v4822_v33 = vadd.f32 %v9350_v42, %v4811_v24  ;;  %v4366_v63 = vadd.f32 %v4346_v26, %v4142_v30 }
 0x687   : >> { %v4830_v55 = vmax.f32 %v4822_v33, 0.0  ;;  %v4589_v53 = vadd.f32 %v4569_v27, %v4366_v63 }
 0x689   : >> { %v4848_v57 = vadd.f32 %v4840_v23, %v4830_v55  ;;  %v4845_v23 = vld [vmem:[%s9353_s26 + $0x30] sm:$0xff] }
 0x68b   : >> { %4857 = vst.msk [vmem:[%s9364_s15 + $0x8] sm:$0xff] %vm245_vm0, %v4848_v57 }
 0x691   : >> { %v4349_v19 = vpop.f32.mrf.mxu2 }
 0x693   : >> { %v4792_v20 = vpop.f32.mrf.mxu0 }
 0x694   : >> { %v4812_v54 = vadd.f32 %v4792_v20, %v4589_v53 }
 0x696   : >> { %v4823_v4 = vadd.f32 %v9350_v42, %v4812_v54 }
 0x697   : >> { %v4572_v6 = vpop.f32.mrf.mxu3 }
 0x698   : >> { %v4831_v0 = vmax.f32 %v4823_v4, 0.0  ;;  %v4846_v4 = vld [vmem:[%s9353_s26 + $0x38] sm:$0xff] }
 0x69a   : >> { %v4849_v43 = vadd.f32 %v4841_v25, %v4831_v0 }
 0x69b   : >> { %v4125_v60 = vpop.f32.mrf.mxu1 }
 0x69c   : >> { %4858 = vst.msk [vmem:[%s9364_s15 + $0x10] sm:$0xff] %vm245_vm0, %v4849_v43  ;;  %v4143_v32 = vadd.f32 %v4125_v60, %v9272_v22 }
 0x69e   : >> { %v4367_v36 = vadd.f32 %v4349_v19, %v4143_v32 }
 0x6a0   : >> { %v4590_v50 = vadd.f32 %v4572_v6, %v4367_v36 }
 0x6a8   : >> { %v4352_v5 = vpop.f32.mrf.mxu2 }
 0x6a9   : >> { %v4795_v47 = vpop.f32.mrf.mxu0 }
 0x6aa   : >> { %v4813_v48 = vadd.f32 %v4795_v47, %v4590_v50 }
 0x6ac   : >> { %v4824_v49 = vadd.f32 %v9350_v42, %v4813_v48 }
 0x6ae   : >> { %v4832_v29 = vmax.f32 %v4824_v49, 0.0 }
 0x6b0   : >> { %v4850_v39 = vadd.f32 %v4842_v46, %v4832_v29  ;;  %v4575_v59 = vpop.f32.mrf.mxu3 }
 0x6b2   : >> { %4859 = vst.msk [vmem:[%s9364_s15 + $0x18] sm:$0xff] %vm245_vm0, %v4850_v39  ;;  %v4128_v3 = vpop.f32.mrf.mxu1 }
 0x6b3   : >> { %v4144_v13 = vadd.f32 %v4128_v3, %v9285_v28 }
 0x6b5   : >> { %v4368_v22 = vadd.f32 %v4352_v5, %v4144_v13 }
 0x6b7   : >> { %v4591_v21 = vadd.f32 %v4575_v59, %v4368_v22 }
 0x6b8   : >> { %v4355_v34 = vpop.f32.mrf.mxu2 }
 0x6c1   : >> { %v4578_v41 = vpop.f32.mrf.mxu3 }
 0x6c2   : >> { %v4798_v1 = vpop.f32.mrf.mxu0  ;;  %v4131_v35 = vpop.f32.mrf.mxu1 }
 0x6c3   : >> { %v4814_v45 = vadd.f32 %v4798_v1, %v4591_v21  ;;  %v4145_v58 = vadd.f32 %v4131_v35, %v9302_v31 }
 0x6c5   : >> { %v4825_v8 = vadd.f32 %v9350_v42, %v4814_v45  ;;  %v4369_v28 = vadd.f32 %v4355_v34, %v4145_v58 }
 0x6c7   : >> { %v4833_v37 = vmax.f32 %v4825_v8, 0.0  ;;  %v4592_v44 = vadd.f32 %v4578_v41, %v4369_v28 }
 0x6c9   : >> { %v4851_v11 = vadd.f32 %v4843_v17, %v4833_v37 }
 0x6cb   : >> { %4860 = vst.msk [vmem:[%s9364_s15 + $0x20] sm:$0xff] %vm245_vm0, %v4851_v11 }
 0x6d1   : >> { %v4358_v40 = vpop.f32.mrf.mxu2 }
 0x6d3   : >> { %v4801_v18 = vpop.f32.mrf.mxu0 }
 0x6d4   : >> { %v4815_v51 = vadd.f32 %v4801_v18, %v4592_v44 }
 0x6d6   : >> { %v4826_v7 = vadd.f32 %v9350_v42, %v4815_v51 }
 0x6d7   : >> { %v4581_v10 = vpop.f32.mrf.mxu3 }
 0x6d8   : >> { %v4834_v52 = vmax.f32 %v4826_v7, 0.0 }
 0x6da   : >> { %v4852_v16 = vadd.f32 %v4844_v15, %v4834_v52 }
 0x6db   : >> { %v4134_v14 = vpop.f32.mrf.mxu1 }
 0x6dc   : >> { %4861 = vst.msk [vmem:[%s9364_s15 + $0x28] sm:$0xff] %vm245_vm0, %v4852_v16  ;;  %v4146_v31 = vadd.f32 %v4134_v14, %v9313_v56 }
 0x6de   : >> { %v4370_v12 = vadd.f32 %v4358_v40, %v4146_v31 }
 0x6e0   : >> { %v4593_v61 = vadd.f32 %v4581_v10, %v4370_v12 }
 0x6e8   : >> { %v4361_v26 = vpop.f32.mrf.mxu2 }
 0x6e9   : >> { %v4804_v38 = vpop.f32.mrf.mxu0 }
 0x6ea   : >> { %v4816_v24 = vadd.f32 %v4804_v38, %v4593_v61 }
 0x6ec   : >> { %v4827_v33 = vadd.f32 %v9350_v42, %v4816_v24 }
 0x6ee   : >> { %v4835_v55 = vmax.f32 %v4827_v33, 0.0 }
 0x6f0   : >> { %v4853_v62 = vadd.f32 %v4845_v23, %v4835_v55  ;;  %v4584_v63 = vpop.f32.mrf.mxu3 }
 0x6f2   : >> { %4862 = vst.msk [vmem:[%s9364_s15 + $0x30] sm:$0xff] %vm245_vm0, %v4853_v62  ;;  %v4137_v57 = vpop.f32.mrf.mxu1  ;;  %v4807_v27 = vpop.f32.mrf.mxu0 }
 0x6f3   : >> { %v4147_v30 = vadd.f32 %v4137_v57, %v9325_v9 }
 0x6f5   : >> { %v4371_v56 = vadd.f32 %v4361_v26, %v4147_v30 }
 0x6f7   : >> { %v4594_v53 = vadd.f32 %v4584_v63, %v4371_v56 }
 0x6f9   : >> { %v4817_v20 = vadd.f32 %v4807_v27, %v4594_v53 }
 0x6fb   : >> { %v4828_v54 = vadd.f32 %v9350_v42, %v4817_v20 }
 0x6fd   : >> { %v4836_v25 = vmax.f32 %v4828_v54, 0.0  ;;  %2820 = sbr.rel (!%p2818_p9) target bundleno = 1149 (0x47d), region = 155 }
 0x6ff   : >> { %v4854_v0 = vadd.f32 %v4846_v4, %v4836_v25 }
 0x701   : >> { %4863 = vst.msk [vmem:[%s9364_s15 + $0x38] sm:$0xff] %vm245_vm0, %v4854_v0 }
 0x702   : > { %5667 = shalt.err (!%p5664_p5)
}
 0x703   : > { %s5731_s12 = smov 128   ;;  %s5732_s17 = smov 8  }
 0x704   : > { %5515 = dma.vmem_to_hbm [thread:$0]  (%p5813_p11), %s4878_s23, 8192, %s4880_s29, %s4865_s13, %s5731_s12, %s5731_s12, %s5732_s17  }
 0x705 PF: > { %s4894_s15 = sand.u32 1, %s5702_s18   ;;  %p9459_p8 = scmp.ge.s32.totalorder %s5714_s21, 2 }
 0x706   : > { %s4895_s16 = scalar_lea.sflag [#allocation6], %s4894_s15 }
 0x707   : > { %p5522_p10 = pnand %p9459_p8, %p5817_p12 }
 0x709   : > { %p5523_p2 = pneg %p5522_p10 }
 0x70b   : > { %5697 = dma.done.wait (%p5523_p2), %s4895_s16, 8192  }
 0x70c   : > { %5699 = vsyncadd (%p5523_p2), %s4895_s16, 4294959104  ;;  %p18_p6 = scmp.ge.s32.totalorder %s5788_s24, 4   ;;  %s9460_s18 = smov %s5706_s19 }
 0x70d   : > { %s9461_s19 = smov %s5710_s20  ;;  %s9462_s20 = smov %s5800_s27 }
 0x70e   : > { %s9463_s21 = smov %s5788_s24  ;;  %20 = sbr.rel (!%p18_p6) target bundleno = 5 (0x5), region = 166 }
 0x713   :  { %4901 = vsyncpa [#allocation5], 1 }
 0x714   :  { %4903 = vsyncpa [#allocation5 + $0x1], 1 }
 0x715   :  { %4904 = vsyncpa [#allocation6], 1 }
 0x716   :  { %4906 = vsyncpa [#allocation6 + $0x1], 1 }

</bundles_post_ra>
